<compile_context>
chip_gen: v7x
topology: tpu7x:2x2x1
jax: 0.10.0
libtpu: 0.0.40
codegen_flags: <defaults>
</compile_context>

<pallas_src>
import math

import jax
import jax.numpy as jnp
from jax.experimental import pallas as pl
from jax.experimental.pallas import tpu as pltpu


def _pair(v):
    return (v, v) if isinstance(v, int) else tuple(v)


def _round_up(x, m):
    return ((x + m - 1) // m) * m


def _cdiv(a, b):
    return (a + b - 1) // b


def _same_pad_amount(x, k, s, d):
    # identical to Conv2d.get_same_padding
    return max((math.ceil(x / s) - 1) * s + (k - 1) * d + 1 - x, 0)


# ----------------------------- Pallas kernel -------------------------------

def _make_conv_kernel(tap_offsets, th, w_out, m_tile, c_in):
    """K-fused conv kernel: one im2col tile (cached across C_out tiles) and a
    single MXU matmul per (row-tile, C_out-tile)."""
    taps = list(tap_offsets)

    def kernel(x_ref, w_ref, b_ref, o_ref, lhs_ref):
        # x_ref  : (R_pad, Ws, C_in)        compute dtype, whole phase-folded image
        # w_ref  : (KH*KW*C_in, tn)         compute dtype (fused-K weight tile)
        # b_ref  : (1, tn)                  float32
        # o_ref  : (m_tile, tn)             output dtype (m_tile = th * W_out)
        # lhs_ref: (m_tile, KH*KW*C_in)     compute dtype scratch, persists over grid
        h0 = pl.program_id(1) * th              # first output row of this tile
        co = pl.program_id(2)

        # Build the K-fused LHS once per (batch, row-tile); co is the innermost
        # grid axis so every later C_out tile reuses it (no re-extraction).
        @pl.when(co == 0)
        def _build_lhs():
            # TODO(synk): switch to lax.fori_loop + SMEM tap table for KH*KW >= ~25.
            for t, (r0, c0) in enumerate(taps):
                # statically-offset window of the resident image; dynamic start
                # only on the untiled (major) row axis -> cheap address math.
                a = x_ref[pl.ds(h0 + r0, th), pl.ds(c0, w_out), :]
                # (th, W_out, C_in) -> (th*W_out, C_in); free when W_out % 8 == 0.
                lhs_ref[:, t * c_in:(t + 1) * c_in] = a.reshape(m_tile, c_in)

        # Single full-K matmul: f32 accumulation stays inside the MXU result
        # path (no per-tap accumulator RMW traffic in VMEM).
        acc = jnp.dot(lhs_ref[...], w_ref[...], preferred_element_type=jnp.float32)
        o_ref[...] = (acc + b_ref[...]).astype(o_ref.dtype)

    return kernel


def _conv2d_pallas(x_fold, w_fused, bias_row, *, tap_offsets, h_out, w_out,
                   out_dtype):
    """x_fold  : [N, R, Ws, C_in]            (SAME-padded, phase-folded, compute dtype)
       w_fused : [KH*KW*C_in, C_out_pad]     (compute dtype, K ordered (kh, kw, c))
       bias_row: [1, C_out_pad] f32
       returns   [N, H_out*W_out, C_out_pad] in `out_dtype`."""
    n, r_rows, ws, c_in = x_fold.shape
    k_dim, c_out_pad = w_fused.shape
    n_taps = len(tap_offsets)
    assert k_dim == n_taps * c_in

    # --- output-channel tile: lane dense (128 / 256) ---
    tn = 256 if c_out_pad % 256 == 0 else 128
    n_co = c_out_pad // tn

    # --- output-row tile: matmul M dim m_tile = th*W_out ~ 1024, prefer a th
    #     that divides h_out (no wasted masked MXU work in a ragged tile). ---
    th_cap = max(1, min(h_out, 1024 // max(1, w_out)))
    th = next((c for c in range(th_cap, 0, -1) if h_out % c == 0), 1)
    if th * w_out < 256 and th_cap * w_out >= 2 * th * w_out:
        th = th_cap                      # accept one ragged tile over tiny tiles
    m_tile = th * w_out
    n_h = _cdiv(h_out, th)

    # Ensure a ragged last row tile only reads in-bounds rows (values computed
    # from the padded rows are garbage but masked on store by Pallas).
    r_need = max(r0 for r0, _ in tap_offsets) + n_h * th
    if r_need > r_rows:
        x_fold = jnp.pad(x_fold, ((0, 0), (0, r_need - r_rows), (0, 0), (0, 0)))
        r_rows = r_need

    kernel = _make_conv_kernel(tap_offsets, th, w_out, m_tile, c_in)

    # --- VMEM budget (layout-padded estimate) + per-generation cap ---
    cbytes = jnp.dtype(x_fold.dtype).itemsize
    obytes = jnp.dtype(out_dtype).itemsize
    sub = 16 if cbytes == 2 else 8
    x_vmem = r_rows * _round_up(ws, sub) * _round_up(c_in, 128) * cbytes
    w_vmem = _round_up(k_dim, sub) * tn * cbytes
    o_vmem = _round_up(m_tile, 8) * tn * obytes
    lhs_vmem = _round_up(m_tile, sub) * _round_up(k_dim, 128) * cbytes
    est = 2 * x_vmem + 2 * w_vmem + 2 * o_vmem + lhs_vmem + (4 << 20)
    try:
        vmem_cap = int(pltpu.get_tpu_info().vmem_capacity_bytes)
    except Exception:
        vmem_cap = 64 << 20              # conservative fallback (v7x physical)
    vmem_limit = int(min(max(est, 32 << 20), max(vmem_cap - (16 << 20), 32 << 20)))
    # TODO(synk): if est still exceeds the cap, fall back to an H-halo tiled path.

    flops = 2 * n * h_out * w_out * k_dim * c_out_pad
    bytes_accessed = (n * r_rows * ws * c_in * cbytes
                      + n * n_h * k_dim * c_out_pad * cbytes
                      + n * h_out * w_out * c_out_pad * obytes)

    # Grid: co innermost so the LHS scratch is reused across C_out tiles.
    # batch / row-tile are "parallel" (v7x megacore splits on batch or H);
    # co must be "arbitrary" because of the cross-iteration LHS cache.
    grid = (n, n_h, n_co)
    out = pl.pallas_call(
        kernel,
        out_shape=jax.ShapeDtypeStruct((n, h_out * w_out, c_out_pad), out_dtype),
        grid_spec=pltpu.PrefetchScalarGridSpec(
            num_scalar_prefetch=0,
            grid=grid,
            in_specs=[
                # whole (phase-folded) image: DMA'd once per batch element,
                # resident across the h / co grid axes.
                pl.BlockSpec((None, r_rows, ws, c_in),
                             lambda b, h, co: (b, 0, 0, 0)),
                # fused-K weight tile for one C_out tile
                pl.BlockSpec((k_dim, tn), lambda b, h, co: (0, co)),
                pl.BlockSpec((1, tn), lambda b, h, co: (0, co)),
            ],
            out_specs=pl.BlockSpec((None, m_tile, tn),
                                   lambda b, h, co: (b, h, co)),
            scratch_shapes=[pltpu.VMEM((m_tile, k_dim), x_fold.dtype)],
        ),
        compiler_params=pltpu.CompilerParams(
            dimension_semantics=("parallel", "parallel", "arbitrary"),
            vmem_limit_bytes=vmem_limit),
        cost_estimate=pl.CostEstimate(flops=flops, transcendentals=0,
                                      bytes_accessed=bytes_accessed),
    )(x_fold, w_fused, bias_row)
    return out


# ----------------------------- Conv2d module -------------------------------

class Conv2dPallas:
    """JAX/Pallas port of the PyTorch Conv2d wrapper (SAME padding support)."""

    def __init__(self, in_channels, out_channels, kernel_size, stride=1,
                 padding='SAME', dilation=1, groups=1, w_in=None, *,
                 key=None, param_dtype=jnp.float32,
                 compute_dtype=jnp.bfloat16):
        if groups != 1:
            # TODO(synk): grouped convolution not implemented in the Pallas path.
            raise NotImplementedError("groups != 1 is not supported")
        if key is None:
            key = jax.random.PRNGKey(0)
        self.in_channels = in_channels
        self.out_channels = out_channels
        self.kernel_size = _pair(kernel_size)
        self.stride = _pair(stride)
        self.dilation = _pair(dilation)
        self.compute_dtype = compute_dtype

        self.padding_same = False
        if padding == 'SAME':
            self.padding_same = True
            padding = (0, 0)
        if padding is True:
            # In the reference module, bool padding survives the isinstance(int)
            # conversion and nn.Conv2d receives (True, True) == padding 1/side.
            padding = (1, 1)
        if isinstance(padding, int):
            padding = (int(padding), int(padding))
        self.padding = tuple(int(p) for p in padding)

        if w_in is not None:
            kh_, kw_ = self.kernel_size
            # NOTE: matches the original module's formula verbatim (divides by 1
            # rather than by the stride).
            self.w_out = int((w_in + 2 * self.padding[1]
                              - self.dilation[1] * (kw_ - 1) - 1) / 1 + 1)

        # Parameter init mimicking nn.Conv2d defaults (uniform +/- 1/sqrt(fan_in)).
        kh, kw = self.kernel_size
        fan_in = in_channels * kh * kw
        bound = 1.0 / math.sqrt(fan_in)
        k_w, k_b = jax.random.split(key)
        self.weight = jax.random.uniform(
            k_w, (out_channels, in_channels, kh, kw),
            minval=-bound, maxval=bound, dtype=param_dtype)        # OIHW
        self.bias = jax.random.uniform(
            k_b, (out_channels,), minval=-bound, maxval=bound, dtype=param_dtype)

        # Precompute kernel-side weight/bias layouts ONCE:
        # OIHW -> (KH*KW*C_in, C_out_pad) fused-K matrix, K ordered (kh, kw, c)
        # to match the kernel's LHS scratch column layout; C_out padded to a
        # 128 multiple for lane-dense output stores; cast to MXU compute dtype.
        self._c_out_pad = _round_up(out_channels, 128)
        w_khwc = jnp.transpose(self.weight, (2, 3, 1, 0))          # (KH,KW,Cin,Cout)
        w_fused = w_khwc.reshape(kh * kw * in_channels, out_channels)
        self._w_fused = jnp.pad(
            w_fused, ((0, 0), (0, self._c_out_pad - out_channels))
        ).astype(compute_dtype)
        self._bias_row = jnp.pad(
            self.bias.astype(jnp.float32),
            (0, self._c_out_pad - out_channels)).reshape(1, self._c_out_pad)

    # -- forward --------------------------------------------------------
    def __call__(self, x):
        """x: [N, C_in, H, W] (NCHW) -> [N, C_out, H_out, W_out]."""
        n, c, h, w = x.shape
        assert c == self.in_channels
        kh, kw = self.kernel_size
        sh, sw = self.stride
        dh, dw = self.dilation

        # --- padding (TF-SAME like the reference, or explicit) ---
        if self.padding_same:
            pad_h = _same_pad_amount(h, kh, sh, dh)
            pad_w = _same_pad_amount(w, kw, sw, dw)
            pads = ((pad_h // 2, pad_h - pad_h // 2),
                    (pad_w // 2, pad_w - pad_w // 2))
        else:
            ph_pad, pw_pad = self.padding
            pads = ((ph_pad, ph_pad), (pw_pad, pw_pad))

        x_nhwc = jnp.transpose(x.astype(self.compute_dtype), (0, 2, 3, 1))
        x_nhwc = jnp.pad(x_nhwc, ((0, 0), pads[0], pads[1], (0, 0)))
        hp = h + pads[0][0] + pads[0][1]
        wp = w + pads[1][0] + pads[1][1]
        h_out = (hp - dh * (kh - 1) - 1) // sh + 1
        w_out = (wp - dw * (kw - 1) - 1) // sw + 1

        # --- fold strides into "phases" (1x data reshuffle in XLA) so every
        #     kernel tap is a contiguous, statically-offset window of a single
        #     resident block.  Identity (no-op) for stride == 1. ---
        if sh == 1 and sw == 1:
            x_fold = x_nhwc
            taps = [(i * dh, j * dw) for i in range(kh) for j in range(kw)]
        else:
            hs = _cdiv(hp, sh)
            ws_ = _cdiv(wp, sw)
            x_nhwc = jnp.pad(x_nhwc, ((0, 0), (0, hs * sh - hp),
                                      (0, ws_ * sw - wp), (0, 0)))
            x_fold = x_nhwc.reshape(n, hs, sh, ws_, sw, c)
            x_fold = jnp.transpose(x_fold, (0, 2, 4, 1, 3, 5))
            x_fold = x_fold.reshape(n, sh * sw * hs, ws_, c)
            taps = []
            for i in range(kh):
                for j in range(kw):
                    ph_, rr = (i * dh) % sh, (i * dh) // sh
                    pw_, cc = (j * dw) % sw, (j * dw) // sw
                    taps.append(((ph_ * sw + pw_) * hs + rr, cc))

        # --- hot path: K-fused im2col-tile conv on the MXU ---
        out = _conv2d_pallas(
            x_fold, self._w_fused, self._bias_row,
            tap_offsets=taps, h_out=h_out, w_out=w_out, out_dtype=x.dtype)

        out = out[:, :, :self.out_channels]                  # strip C_out pad
        out = out.reshape(n, h_out, w_out, self.out_channels)
        return jnp.transpose(out, (0, 3, 1, 2))              # NHWC -> NCHW


# ------------------------------- demo / check -------------------------------

if __name__ == "__main__":
    key = jax.random.PRNGKey(0)
    k_x, k_m = jax.random.split(key)

    # small shapes consistent with the module's forward
    N, C_IN, H, W = 2, 4, 16, 16
    C_OUT, K = 8, 3

    x = jax.random.normal(k_x, (N, C_IN, H, W), dtype=jnp.float32)

    conv = Conv2dPallas(C_IN, C_OUT, kernel_size=K, stride=1,
                        padding='SAME', dilation=1, groups=1, w_in=W, key=k_m)

    y = jax.jit(lambda inp: conv(inp))(x)
    y = jax.block_until_ready(y)

    # Reference: lax conv with the same bf16 operands + f32 accumulation
    # (matches the kernel's compute dtype; differences are summation order only).
    x_c = x.astype(conv.compute_dtype)
    w_c = conv.weight.astype(conv.compute_dtype)
    y_ref = jax.lax.conv_general_dilated(
        x_c, w_c, window_strides=(1, 1), padding='SAME',
        rhs_dilation=(1, 1), dimension_numbers=('NCHW', 'OIHW', 'NCHW'),
        preferred_element_type=jnp.float32)
    y_ref = y_ref + conv.bias.reshape(1, C_OUT, 1, 1)

    assert y.shape == (N, C_OUT, H, W), y.shape
    err = float(jnp.max(jnp.abs(y.astype(jnp.float32) - y_ref)))
    assert err < 2e-2, err

    print("KERNEL_OK")
</pallas_src>

<mosaic_0001>
module attributes {stable_mosaic.version = 11 : i64} {
  func.func @kernel(%arg0: i32, %arg1: i32, %arg2: i32, %arg3: memref<1x18x18x4xbf16, #tpu.memory_space<vmem>>, %arg4: memref<36x128xbf16, #tpu.memory_space<vmem>>, %arg5: memref<1x128xf32, #tpu.memory_space<vmem>>, %arg6: memref<1x256x128xf32, #tpu.memory_space<vmem>>, %arg7: memref<256x36xbf16, #tpu.memory_space<vmem>>) attributes {dimension_semantics = [#tpu.dimension_semantics<parallel>, #tpu.dimension_semantics<parallel>, #tpu.dimension_semantics<arbitrary>], iteration_bounds = array<i64: 2, 1, 1>, scalar_prefetch = 0 : i64, scratch_operands = 1 : i64, tpu.core_type = #tpu.core_type<tc>, window_params = [{transform_indices = @transform_0, window_bounds = array<i64: 1, 18, 18, 4>}, {transform_indices = @transform_1, window_bounds = array<i64: 36, 128>}, {transform_indices = @transform_2, window_bounds = array<i64: 1, 128>}, {transform_indices = @transform_3, window_bounds = array<i64: 1, 256, 128>}]} {
    %c16_i32 = arith.constant 16 : i32
    %0 = arith.muli %arg1, %c16_i32 : i32
    %c0_i32 = arith.constant 0 : i32
    %1 = arith.cmpi eq, %arg2, %c0_i32 : i32
    %2 = arith.extui %1 : i1 to i32
    %c0_i32_0 = arith.constant 0 : i32
    %3 = arith.cmpi ne, %2, %c0_i32_0 : i32
    scf.if %3 {
      %c0_i32_9 = arith.constant 0 : i32
      %13 = arith.addi %0, %c0_i32_9 : i32
      %c0_10 = arith.constant 0 : index
      %14 = arith.index_cast %13 : i32 to index
      %c0_11 = arith.constant 0 : index
      %c0_12 = arith.constant 0 : index
      %15 = vector.load %arg3[%c0_10, %14, %c0_11, %c0_12] : memref<1x18x18x4xbf16, #tpu.memory_space<vmem>>, vector<1x16x16x4xbf16>
      %16 = vector.shape_cast %15 : vector<1x16x16x4xbf16> to vector<16x16x4xbf16>
      %17 = vector.shape_cast %16 : vector<16x16x4xbf16> to vector<256x4xbf16>
      %c0_13 = arith.constant 0 : index
      %c0_14 = arith.constant 0 : index
      %18 = vector.load %arg7[%c0_13, %c0_14] : memref<256x36xbf16, #tpu.memory_space<vmem>>, vector<256x4xbf16>
      tpu.vector_store %arg7[%c0_13, %c0_14], %17 {strides = array<i32>} : memref<256x36xbf16, #tpu.memory_space<vmem>>, vector<256x4xbf16>,
      %c0_i32_15 = arith.constant 0 : i32
      %19 = arith.addi %0, %c0_i32_15 : i32
      %c0_16 = arith.constant 0 : index
      %20 = arith.index_cast %19 : i32 to index
      %c1 = arith.constant 1 : index
      %c0_17 = arith.constant 0 : index
      %21 = vector.load %arg3[%c0_16, %20, %c1, %c0_17] : memref<1x18x18x4xbf16, #tpu.memory_space<vmem>>, vector<1x16x16x4xbf16>
      %22 = vector.shape_cast %21 : vector<1x16x16x4xbf16> to vector<16x16x4xbf16>
      %23 = vector.shape_cast %22 : vector<16x16x4xbf16> to vector<256x4xbf16>
      %c0_18 = arith.constant 0 : index
      %c4 = arith.constant 4 : index
      %24 = vector.load %arg7[%c0_18, %c4] : memref<256x36xbf16, #tpu.memory_space<vmem>>, vector<256x4xbf16>
      tpu.vector_store %arg7[%c0_18, %c4], %23 {strides = array<i32>} : memref<256x36xbf16, #tpu.memory_space<vmem>>, vector<256x4xbf16>,
      %c0_i32_19 = arith.constant 0 : i32
      %25 = arith.addi %0, %c0_i32_19 : i32
      %c0_20 = arith.constant 0 : index
      %26 = arith.index_cast %25 : i32 to index
      %c2 = arith.constant 2 : index
      %c0_21 = arith.constant 0 : index
      %27 = vector.load %arg3[%c0_20, %26, %c2, %c0_21] : memref<1x18x18x4xbf16, #tpu.memory_space<vmem>>, vector<1x16x16x4xbf16>
      %28 = vector.shape_cast %27 : vector<1x16x16x4xbf16> to vector<16x16x4xbf16>
      %29 = vector.shape_cast %28 : vector<16x16x4xbf16> to vector<256x4xbf16>
      %c0_22 = arith.constant 0 : index
      %c8 = arith.constant 8 : index
      %30 = vector.load %arg7[%c0_22, %c8] : memref<256x36xbf16, #tpu.memory_space<vmem>>, vector<256x4xbf16>
      tpu.vector_store %arg7[%c0_22, %c8], %29 {strides = array<i32>} : memref<256x36xbf16, #tpu.memory_space<vmem>>, vector<256x4xbf16>,
      %c1_i32 = arith.constant 1 : i32
      %31 = arith.addi %0, %c1_i32 : i32
      %c0_23 = arith.constant 0 : index
      %32 = arith.index_cast %31 : i32 to index
      %c0_24 = arith.constant 0 : index
      %c0_25 = arith.constant 0 : index
      %33 = vector.load %arg3[%c0_23, %32, %c0_24, %c0_25] : memref<1x18x18x4xbf16, #tpu.memory_space<vmem>>, vector<1x16x16x4xbf16>
      %34 = vector.shape_cast %33 : vector<1x16x16x4xbf16> to vector<16x16x4xbf16>
      %35 = vector.shape_cast %34 : vector<16x16x4xbf16> to vector<256x4xbf16>
      %c0_26 = arith.constant 0 : index
      %c12 = arith.constant 12 : index
      %36 = vector.load %arg7[%c0_26, %c12] : memref<256x36xbf16, #tpu.memory_space<vmem>>, vector<256x4xbf16>
      tpu.vector_store %arg7[%c0_26, %c12], %35 {strides = array<i32>} : memref<256x36xbf16, #tpu.memory_space<vmem>>, vector<256x4xbf16>,
      %c1_i32_27 = arith.constant 1 : i32
      %37 = arith.addi %0, %c1_i32_27 : i32
      %c0_28 = arith.constant 0 : index
      %38 = arith.index_cast %37 : i32 to index
      %c1_29 = arith.constant 1 : index
      %c0_30 = arith.constant 0 : index
      %39 = vector.load %arg3[%c0_28, %38, %c1_29, %c0_30] : memref<1x18x18x4xbf16, #tpu.memory_space<vmem>>, vector<1x16x16x4xbf16>
      %40 = vector.shape_cast %39 : vector<1x16x16x4xbf16> to vector<16x16x4xbf16>
      %41 = vector.shape_cast %40 : vector<16x16x4xbf16> to vector<256x4xbf16>
      %c0_31 = arith.constant 0 : index
      %c16 = arith.constant 16 : index
      %42 = vector.load %arg7[%c0_31, %c16] : memref<256x36xbf16, #tpu.memory_space<vmem>>, vector<256x4xbf16>
      tpu.vector_store %arg7[%c0_31, %c16], %41 {strides = array<i32>} : memref<256x36xbf16, #tpu.memory_space<vmem>>, vector<256x4xbf16>,
      %c1_i32_32 = arith.constant 1 : i32
      %43 = arith.addi %0, %c1_i32_32 : i32
      %c0_33 = arith.constant 0 : index
      %44 = arith.index_cast %43 : i32 to index
      %c2_34 = arith.constant 2 : index
      %c0_35 = arith.constant 0 : index
      %45 = vector.load %arg3[%c0_33, %44, %c2_34, %c0_35] : memref<1x18x18x4xbf16, #tpu.memory_space<vmem>>, vector<1x16x16x4xbf16>
      %46 = vector.shape_cast %45 : vector<1x16x16x4xbf16> to vector<16x16x4xbf16>
      %47 = vector.shape_cast %46 : vector<16x16x4xbf16> to vector<256x4xbf16>
      %c0_36 = arith.constant 0 : index
      %c20 = arith.constant 20 : index
      %48 = vector.load %arg7[%c0_36, %c20] : memref<256x36xbf16, #tpu.memory_space<vmem>>, vector<256x4xbf16>
      tpu.vector_store %arg7[%c0_36, %c20], %47 {strides = array<i32>} : memref<256x36xbf16, #tpu.memory_space<vmem>>, vector<256x4xbf16>,
      %c2_i32 = arith.constant 2 : i32
      %49 = arith.addi %0, %c2_i32 : i32
      %c0_37 = arith.constant 0 : index
      %50 = arith.index_cast %49 : i32 to index
      %c0_38 = arith.constant 0 : index
      %c0_39 = arith.constant 0 : index
      %51 = vector.load %arg3[%c0_37, %50, %c0_38, %c0_39] : memref<1x18x18x4xbf16, #tpu.memory_space<vmem>>, vector<1x16x16x4xbf16>
      %52 = vector.shape_cast %51 : vector<1x16x16x4xbf16> to vector<16x16x4xbf16>
      %53 = vector.shape_cast %52 : vector<16x16x4xbf16> to vector<256x4xbf16>
      %c0_40 = arith.constant 0 : index
      %c24 = arith.constant 24 : index
      %54 = vector.load %arg7[%c0_40, %c24] : memref<256x36xbf16, #tpu.memory_space<vmem>>, vector<256x4xbf16>
      tpu.vector_store %arg7[%c0_40, %c24], %53 {strides = array<i32>} : memref<256x36xbf16, #tpu.memory_space<vmem>>, vector<256x4xbf16>,
      %c2_i32_41 = arith.constant 2 : i32
      %55 = arith.addi %0, %c2_i32_41 : i32
      %c0_42 = arith.constant 0 : index
      %56 = arith.index_cast %55 : i32 to index
      %c1_43 = arith.constant 1 : index
      %c0_44 = arith.constant 0 : index
      %57 = vector.load %arg3[%c0_42, %56, %c1_43, %c0_44] : memref<1x18x18x4xbf16, #tpu.memory_space<vmem>>, vector<1x16x16x4xbf16>
      %58 = vector.shape_cast %57 : vector<1x16x16x4xbf16> to vector<16x16x4xbf16>
      %59 = vector.shape_cast %58 : vector<16x16x4xbf16> to vector<256x4xbf16>
      %c0_45 = arith.constant 0 : index
      %c28 = arith.constant 28 : index
      %60 = vector.load %arg7[%c0_45, %c28] : memref<256x36xbf16, #tpu.memory_space<vmem>>, vector<256x4xbf16>
      tpu.vector_store %arg7[%c0_45, %c28], %59 {strides = array<i32>} : memref<256x36xbf16, #tpu.memory_space<vmem>>, vector<256x4xbf16>,
      %c2_i32_46 = arith.constant 2 : i32
      %61 = arith.addi %0, %c2_i32_46 : i32
      %c0_47 = arith.constant 0 : index
      %62 = arith.index_cast %61 : i32 to index
      %c2_48 = arith.constant 2 : index
      %c0_49 = arith.constant 0 : index
      %63 = vector.load %arg3[%c0_47, %62, %c2_48, %c0_49] : memref<1x18x18x4xbf16, #tpu.memory_space<vmem>>, vector<1x16x16x4xbf16>
      %64 = vector.shape_cast %63 : vector<1x16x16x4xbf16> to vector<16x16x4xbf16>
      %65 = vector.shape_cast %64 : vector<16x16x4xbf16> to vector<256x4xbf16>
      %c0_50 = arith.constant 0 : index
      %c32 = arith.constant 32 : index
      %66 = vector.load %arg7[%c0_50, %c32] : memref<256x36xbf16, #tpu.memory_space<vmem>>, vector<256x4xbf16>
      tpu.vector_store %arg7[%c0_50, %c32], %65 {strides = array<i32>} : memref<256x36xbf16, #tpu.memory_space<vmem>>, vector<256x4xbf16>,
    } else {
    }
    %c0 = arith.constant 0 : index
    %c0_1 = arith.constant 0 : index
    %4 = vector.load %arg7[%c0, %c0_1] : memref<256x36xbf16, #tpu.memory_space<vmem>>, vector<256x36xbf16>
    %c0_2 = arith.constant 0 : index
    %c0_3 = arith.constant 0 : index
    %5 = vector.load %arg4[%c0_2, %c0_3] : memref<36x128xbf16, #tpu.memory_space<vmem>>, vector<36x128xbf16>
    %cst = arith.constant dense<0.000000e+00> : vector<256x128xf32>
    %6 = tpu.matmul %4, %5, %cst {dimension_numbers = #tpu.dot_dimension_numbers<[1], [0], [0], [1], [0, 0, 1, 1], [], []>} : vector<256x36xbf16>, vector<36x128xbf16>, vector<256x128xf32> -> vector<256x128xf32>
    %c0_4 = arith.constant 0 : index
    %c0_5 = arith.constant 0 : index
    %7 = vector.load %arg5[%c0_4, %c0_5] : memref<1x128xf32, #tpu.memory_space<vmem>>, vector<1x128xf32>
    %8 = vector.broadcast %7 : vector<1x128xf32> to vector<256x128xf32>
    %9 = arith.addf %6, %8 : vector<256x128xf32>
    %c0_6 = arith.constant 0 : index
    %c0_7 = arith.constant 0 : index
    %c0_8 = arith.constant 0 : index
    %10 = vector.load %arg6[%c0_6, %c0_7, %c0_8] : memref<1x256x128xf32, #tpu.memory_space<vmem>>, vector<1x256x128xf32>
    %11 = vector.shape_cast %10 : vector<1x256x128xf32> to vector<256x128xf32>
    %12 = vector.shape_cast %9 : vector<256x128xf32> to vector<1x256x128xf32>
    tpu.vector_store %arg6[%c0_6, %c0_7, %c0_8], %12 {strides = array<i32>} : memref<1x256x128xf32, #tpu.memory_space<vmem>>, vector<1x256x128xf32>,
    return
  }
  func.func @transform_0(%arg0: i32, %arg1: i32, %arg2: i32) -> (i32, i32, i32, i32) {
    %c0_i32 = arith.constant 0 : i32
    %c0_i32_0 = arith.constant 0 : i32
    %c0_i32_1 = arith.constant 0 : i32
    %c0_i32_2 = arith.constant 0 : i32
    return %arg0, %c0_i32, %c0_i32_0, %c0_i32_1 : i32, i32, i32, i32
  }
  func.func @transform_1(%arg0: i32, %arg1: i32, %arg2: i32) -> (i32, i32) {
    %c0_i32 = arith.constant 0 : i32
    %c0_i32_0 = arith.constant 0 : i32
    return %c0_i32, %arg2 : i32, i32
  }
  func.func @transform_2(%arg0: i32, %arg1: i32, %arg2: i32) -> (i32, i32) {
    %c0_i32 = arith.constant 0 : i32
    %c0_i32_0 = arith.constant 0 : i32
    return %c0_i32, %arg2 : i32, i32
  }
  func.func @transform_3(%arg0: i32, %arg1: i32, %arg2: i32) -> (i32, i32, i32) {
    %c0_i32 = arith.constant 0 : i32
    return %arg0, %arg1, %arg2 : i32, i32, i32
  }
}

</mosaic_0001>

<bundles_post_ra>
// kernel: _lambda_.1
= control target key start
LH: loop header
LB: loop body
LE: loop exit
PB: predicated region body
PF: predicated region fallthrough
CT: control target
= control target key end

     0   :  { %s4462_s12 = smov 0   ;;  %s4464_s13 = smov 0   ;;  %s5669_s0 = inlined_call_operand.vmem [shape: bf16[2,18,18,4], index: 0, kind: input, shape index: {}]   ;;  %s5670_s1 = inlined_call_operand.vmem [shape: bf16[36,128], index: 1, kind: input, shape index: {}]   ;;  %s5671_s2 = inlined_call_operand.vmem [shape: f32[1,128], index: 2, kind: input, shape index: {}]   ;;  %s5672_s3 = inlined_call_operand.vmem [shape: f32[2,256,128], index: 3, kind: output, shape index: {}]  }
   0x1   :  { %s4466_s14 = smov 0  }
   0x2 LB: > { %s32_s15 = sadd.s32 1, %s4428_s13  ;;  %p3786_p0 = scmp.ge.s32.totalorder %s4432_s14, 1  ;;  %s4432_s14 = sphi %s4466_s14, %s13_s14   ;;  %s4428_s13 = sphi %s4464_s13, %s5678_s13   ;;  %s4424_s12 = sphi %s4462_s12, %s5677_s12  }
   0x3   : > { %p34_p1 = scmp.ge.s32.totalorder %s32_s15, 2  ;;  %p177_p2 = scmp.lt.s32.totalorder %s4432_s14, 3 }
   0x5   : > { %s5680_s15 = smov (%p34_p1, %s32_s15), 0  ;;  %p178_p3 = pnand %p3786_p0, %p177_p2 }
   0x6   : > { %p215_p4 = scmp.lt.s32.totalorder (!%p178_p3), %s4424_s12, 1  ;;  %vm1038_vm0 = vcmask (!%p178_p3), 1042432   ;;  %vm1039_vm1 = vcmask (!%p178_p3), 1046532   ;;  %s4434_s20 = smov (!%p178_p3), 12   ;;  %vm442_vm3 = vsmask.f32 (!%p178_p3), 3328 }
   0x7   : > { %181 = sbr.rel (%p178_p3) target bundleno = 659 (0x293), region = 32  ;;  %vm4488_vm2 = vmor (!%p178_p3), %vm1038_vm0, %vm1039_vm1  ;;  %vm443_vm4 = vsmask.f32 (!%p178_p3), 7440  ;;  %s4435_s21 = smov (!%p178_p3), 8   ;;  %vm377_vm6 = vcmask (!%p178_p3), 31744   ;;  %vm925_vm7 = vcmask (!%p178_p3), 64544  }
   0x8   : > { %vm4538_vm5 = vmor (!%p178_p3), %vm442_vm3, %vm443_vm4  ;;  %s4436_s22 = smov (!%p178_p3), 4   ;;  %s4437_s23 = smov (!%p178_p3), 16   ;;  %vm1249_vm8 = vcmask (!%p178_p3), 97344   ;;  %vm1430_vm9 = vcmask (!%p178_p3), 130144   ;;  %vm1975_vm10 = vcmask (!%p178_p3), 162944   ;;  %vm2296_vm11 = vcmask (!%p178_p3), 195744  }
   0x9   : > { %s4438_s24 = smov (!%p178_p3), 20   ;;  %s4439_s25 = smov (!%p178_p3), 24   ;;  %vm2477_vm12 = vcmask (!%p178_p3), 228544   ;;  %vm3022_vm13 = vcmask (!%p178_p3), 261344   ;;  %vm3343_vm14 = vcmask (!%p178_p3), 294144   ;;  %vm3403_vm15 = vcmask (!%p178_p3), 293888  }
   0xa   : > { %s4440_s26 = smov (!%p178_p3), 28   ;;  %s4441_s27 = smov (!%p178_p3), 32   ;;  %vm3452_vm0 = vcmask (!%p178_p3), 1041408  }
   0xe   : > { %s5682_s12 = smov (!%p215_p4, %s4424_s12), 1 }
   0xf   : > { %s4326_s16 = smul.u32 216, %s5682_s12  ;;  %s4260_s7 = sshll.u32 %s5682_s12, 8 }
  0x11   : > { %s4486_s19 = scalar_lea.vmem %s5669_s0, %s4326_s16  ;;  %s5594_s16 = scalar_lea.vmem %s5672_s3, %s4260_s7 }
  0x12   : > { %v4359_v1 = vld [vmem:[%s4486_s19 + $0x6c] sm:$0xff]   ;;  %v966_v3 = vld [vmem:[%s4486_s19 + $0x60] sm:$0xe]  ;;  %v967_v4 = vld [vmem:[%s4486_s19 + $0x64] sm:$0xf] }
  0x13   : > { %v4360_v2 = vld [vmem:[%s4486_s19 + $0xc] sm:$0xff]   ;;  %1398 = vrot.lane.b32.xlu1 %v4359_v1, %s4434_s20  ;;  %v968_v5 = vld [vmem:[%s4486_s19 + $0x68] sm:$0x1]  ;;  %v3830_v6 = vrot.slane %v966_v3, 9  ;;  %v1099_v7 = vrot.slane %v967_v4, 5 }
  0x14   : > { %1382 = vrot.lane.b32.xlu0 %v4360_v2, %s4434_s20  ;;  %v1102_v8 = vrot.slane %v968_v5, 5  ;;  %v942_v9 = vld [vmem:[%s4486_s19] sm:$0xe]  ;;  %v943_v10 = vld [vmem:[%s4486_s19 + $0x4] sm:$0xf] }
  0x15   : > { %v944_v11 = vld [vmem:[%s4486_s19 + $0x8] sm:$0x1]  ;;  %v3822_v12 = vrot.slane %v942_v9, 9  ;;  %v1100_v13 = vsel %vm4488_vm2, %v3830_v6, %v1099_v7  ;;  %v1101_v14 = vrot.slane %v1099_v7, 4  ;;  %v1043_v15 = vrot.slane %v943_v10, 5 }
  0x16   : > { %v1046_v16 = vrot.slane %v944_v11, 5  ;;  %v969_v17 = vld [vmem:[%s4486_s19 + $0x6c] sm:$0xe]  ;;  %v970_v18 = vld [vmem:[%s4486_s19 + $0x70] sm:$0xf] }
  0x17   : > { %v971_v19 = vld [vmem:[%s4486_s19 + $0x74] sm:$0x1]  ;;  %v3831_v20 = vrot.slane %v969_v17, 9  ;;  %v1103_v21 = vsel %vm4488_vm2, %v1101_v14, %v1102_v8  ;;  %v1044_v22 = vsel %vm4488_vm2, %v3822_v12, %v1043_v15  ;;  %v1045_v23 = vrot.slane %v1043_v15, 4  ;;  %v945_v25 = vld [vmem:[%s4486_s19 + $0xc] sm:$0xe] }
  0x18   : > { %v1106_v24 = vrot.slane %v970_v18, 5  ;;  %v946_v26 = vld [vmem:[%s4486_s19 + $0x10] sm:$0xf]  ;;  %v3846_v27 = vcombine.low %v1100_v13, %v1103_v21  ;;  %v1109_v28 = vrot.slane %v971_v19, 5  ;;  %v947_v29 = vld [vmem:[%s4486_s19 + $0x14] sm:$0x1] }
  0x19   : > { %v3823_v30 = vrot.slane %v945_v25, 9  ;;  %v1050_v31 = vrot.slane %v946_v26, 5  ;;  %v1047_v32 = vsel %vm4488_vm2, %v1045_v23, %v1046_v16  ;;  %v1053_v35 = vrot.slane %v947_v29, 5  ;;  %v397_v36 = vld [vmem:[%s4486_s19 + $0xc] sm:$0xf] }
  0x1a   : > { %v1107_v33 = vsel %vm4488_vm2, %v3831_v20, %v1106_v24  ;;  %v1108_v34 = vrot.slane %v1106_v24, 4  ;;  %v398_v37 = vld [vmem:[%s4486_s19 + $0x10] sm:$0xf]  ;;  %1217 = vrot.lane.b32.xlu1 %v3846_v27, %s4435_s21  ;;  %v3838_v38 = vcombine.low %v1044_v22, %v1047_v32  ;;  %v399_v41 = vld [vmem:[%s4486_s19 + $0x14] sm:$0x1]  ;;  %v470_v42 = vshrl.u32 %v397_v36, 16 }
  0x1b   : > { %v1051_v39 = vsel %vm4488_vm2, %v3823_v30, %v1050_v31  ;;  %v1052_v40 = vrot.slane %v1050_v31, 4  ;;  %v394_v43 = vld [vmem:[%s4486_s19] sm:$0xf]  ;;  %v473_v45 = vshll.u32 %v397_v36, 16  ;;  %v479_v46 = vshll.u32 %v398_v37, 16 }
  0x1c   : > { %v1110_v44 = vsel %vm4488_vm2, %v1108_v34, %v1109_v28  ;;  %v483_v47 = vshrl.u32 %v398_v37, 16  ;;  %v395_v48 = vld [vmem:[%s4486_s19 + $0x4] sm:$0xf]  ;;  %1201 = vrot.lane.b32.xlu0 %v3838_v38, %s4435_s21  ;;  %v472_v51 = vrot.slane %v470_v42, 4  ;;  %v489_v52 = vshll.u32 %v399_v41, 16 }
  0x1d   : > { %v3847_v49 = vcombine.low %v1107_v33, %v1110_v44  ;;  %v1054_v50 = vsel %vm4488_vm2, %v1052_v40, %v1053_v35  ;;  %v396_v53 = vld [vmem:[%s4486_s19 + $0x8] sm:$0x1]  ;;  %v475_v55 = vrot.slane %v473_v45, 5  ;;  %v481_v56 = vrot.slane %v479_v46, 5  ;;  %v421_v58 = vld [vmem:[%s4486_s19 + $0x6c] sm:$0xf] }
  0x1e   : > { %v3839_v54 = vcombine.low %v1051_v39, %v1054_v50  ;;  %v485_v57 = vrot.slane %v483_v47, 4  ;;  %v491_v59 = vrot.slane %v489_v52, 5  ;;  %v446_v60 = vshrl.u32 %v394_v43, 16  ;;  %v422_v4 = vld [vmem:[%s4486_s19 + $0x70] sm:$0xf] }
  0x1f   : > { %1219 = vrot.lane.b32.xlu1 %v3847_v49, %s4435_s21  ;;  %v449_v61 = vshll.u32 %v394_v43, 16  ;;  %v455_v62 = vshll.u32 %v395_v48, 16  ;;  %v476_v63 = vor.u32 %v475_v55, %v472_v51  ;;  %v459_v2 = vshrl.u32 %v395_v48, 16  ;;  %v423_v9 = vld [vmem:[%s4486_s19 + $0x74] sm:$0x1] }
  0x20   : > { %v486_v1 = vor.u32 %v485_v57, %v481_v56  ;;  %v465_v3 = vshll.u32 %v396_v53, 16  ;;  %1203 = vrot.lane.b32.xlu0 %v3839_v54, %s4435_s21  ;;  %v448_v6 = vrot.slane %v446_v60, 4  ;;  %v662_v10 = vshrl.u32 %v421_v58, 16  ;;  %v418_v11 = vld [vmem:[%s4486_s19 + $0x60] sm:$0xf] }
  0x21   : > { %v451_v7 = vrot.slane %v449_v61, 5  ;;  %v457_v8 = vrot.slane %v455_v62, 5  ;;  %v477_v12 = vrot.slane %v476_v63, 4  ;;  %v461_v14 = vrot.slane %v459_v2, 4  ;;  %v419_v16 = vld [vmem:[%s4486_s19 + $0x64] sm:$0xf] }
  0x22   : > { %v487_v13 = vrot.slane %v486_v1, 4  ;;  %v467_v15 = vrot.slane %v465_v3, 5  ;;  %v664_v18 = vrot.slane %v662_v10, 4  ;;  %v665_v19 = vshll.u32 %v421_v58, 16  ;;  %v420_v35 = vld [vmem:[%s4486_s19 + $0x68] sm:$0x1] }
  0x23   : > { %v452_v17 = vor.u32 %v451_v7, %v448_v6  ;;  %v671_v20 = vshll.u32 %v422_v4, 16  ;;  %v482_v21 = vsel %vm4538_vm5, %v477_v12, %v481_v56  ;;  %v462_v23 = vor.u32 %v461_v14, %v457_v8  ;;  %v3926_v38 = vld [vmem:[%s4486_s19 + $0x6c] sm:$0xf]  ;;  %v3927_v43 = vld [vmem:[%s4486_s19 + $0x70] sm:$0xf]  ;;  %v4361_v6 = vld [vmem:[%s4486_s19 + $0x78] sm:$0xff]  }
  0x24   : > { %v492_v22 = vsel %vm4538_vm5, %v487_v13, %v491_v59  ;;  %v675_v24 = vshrl.u32 %v422_v4, 16  ;;  %v667_v27 = vrot.slane %v665_v19, 5  ;;  %v681_v31 = vshll.u32 %v423_v9, 16  ;;  %v3928_v54 = vld [vmem:[%s4486_s19 + $0x74] sm:$0x1] }
  0x25   : > { %v3807_v25 = vcombine.low %v482_v21, %v492_v22  ;;  %v453_v26 = vrot.slane %v452_v17, 4  ;;  %v673_v28 = vrot.slane %v671_v20, 5  ;;  %v463_v29 = vrot.slane %v462_v23, 4  ;;  %v3902_v57 = vld [vmem:[%s4486_s19 + $0xc] sm:$0xf] }
  0x26   : > { %v677_v30 = vrot.slane %v675_v24, 4  ;;  %v638_v32 = vshrl.u32 %v418_v11, 16  ;;  %v668_v34 = vor.u32 %v667_v27, %v664_v18  ;;  %v641_v36 = vshll.u32 %v418_v11, 16  ;;  %v3903_v62 = vld [vmem:[%s4486_s19 + $0x10] sm:$0xf] }
  0x27   : > { %879 = vrot.lane.b32.xlu1 %v3807_v25, %s4436_s22  ;;  %v458_v33 = vsel %vm4538_vm5, %v453_v26, %v457_v8  ;;  %v647_v37 = vshll.u32 %v419_v16, 16  ;;  %v468_v39 = vsel %vm4538_vm5, %v463_v29, %v467_v15  ;;  %v683_v41 = vrot.slane %v681_v31, 5  ;;  %v3904_v12 = vld [vmem:[%s4486_s19 + $0x14] sm:$0x1]  ;;  %v3929_v15 = vld [vmem:[%s4486_s19 + $0x78] sm:$0xf] }
  0x28   : > { %v678_v40 = vor.u32 %v677_v30, %v673_v28  ;;  %v640_v42 = vrot.slane %v638_v32, 4  ;;  %v3806_v44 = vcombine.low %v458_v33, %v468_v39  ;;  %v669_v45 = vrot.slane %v668_v34, 4  ;;  %v3930_v27 = vld [vmem:[%s4486_s19 + $0x7c] sm:$0xf]  ;;  %v3931_v33 = vld [vmem:[%s4486_s19 + $0x80] sm:$0x1] }
  0x29   : > { %v643_v46 = vrot.slane %v641_v36, 5  ;;  %v649_v47 = vrot.slane %v647_v37, 5  ;;  %v651_v49 = vshrl.u32 %v419_v16, 16  ;;  %v657_v50 = vshll.u32 %v420_v35, 16  ;;  %v3905_v34 = vld [vmem:[%s4486_s19 + $0x18] sm:$0xf] }
  0x2a   : > { %v679_v48 = vrot.slane %v678_v40, 4  ;;  %v1688_v51 = vshrl.u32 %v3926_v38, 16  ;;  %877 = vrot.lane.b32.xlu0 %v3806_v44, %s4436_s22  ;;  %v674_v52 = vsel %vm4538_vm5, %v669_v45, %v673_v28  ;;  %v1691_v55 = vshll.u32 %v3926_v38, 16  ;;  %v3906_v39 = vld [vmem:[%s4486_s19 + $0x1c] sm:$0xf] }
  0x2b   : > { %v644_v53 = vor.u32 %v643_v46, %v640_v42  ;;  %v1697_v56 = vshll.u32 %v3927_v43, 16  ;;  %v653_v59 = vrot.slane %v651_v49, 4  ;;  %v659_v60 = vrot.slane %v657_v50, 5  ;;  %v4362_v40 = vld [vmem:[%s4486_s19 + $0x18] sm:$0xff]   ;;  %v3907_v45 = vld [vmem:[%s4486_s19 + $0x20] sm:$0x1] }
  0x2c   : > { %v684_v58 = vsel %vm4538_vm5, %v679_v48, %v683_v41  ;;  %v1690_v61 = vrot.slane %v1688_v51, 4  ;;  %v1693_v2 = vrot.slane %v1691_v55, 5  ;;  %v1701_v7 = vshrl.u32 %v3927_v43, 16  ;;  %v3990_v50 = vld [vmem:[%s4486_s19 + $0x6c] sm:$0xe] }
  0x2d   : > { %v3815_v63 = vcombine.low %v674_v52, %v684_v58  ;;  %v645_v1 = vrot.slane %v644_v53, 4  ;;  %v1699_v3 = vrot.slane %v1697_v56, 5  ;;  %v654_v4 = vor.u32 %v653_v59, %v649_v47  ;;  %v3991_v55 = vld [vmem:[%s4486_s19 + $0x70] sm:$0xf] }
  0x2e   : > { %v1707_v8 = vshll.u32 %v3928_v54, 16  ;;  %v1496_v9 = vshrl.u32 %v3902_v57, 16  ;;  %v1694_v11 = vor.u32 %v1693_v2, %v1690_v61  ;;  %v1499_v13 = vshll.u32 %v3902_v57, 16  ;;  %v3966_v61 = vld [vmem:[%s4486_s19 + $0xc] sm:$0xe] }
  0x2f   : > { %895 = vrot.lane.b32.xlu1 %v3815_v63, %s4436_s22  ;;  %v650_v10 = vsel %vm4538_vm5, %v645_v1, %v649_v47  ;;  %v1505_v14 = vshll.u32 %v3903_v62, 16  ;;  %v655_v16 = vrot.slane %v654_v4, 4  ;;  %v1703_v17 = vrot.slane %v1701_v7, 4 }
  0x30   : > { %v1709_v18 = vrot.slane %v1707_v8, 5  ;;  %v1498_v19 = vrot.slane %v1496_v9, 4  ;;  %v1695_v20 = vrot.slane %v1694_v11, 4  ;;  %v1501_v21 = vrot.slane %v1499_v13, 5  ;;  %v3968_v9 = vld [vmem:[%s4486_s19 + $0x14] sm:$0x1] }
  0x31   : > { %v1507_v22 = vrot.slane %v1505_v14, 5  ;;  %v1509_v23 = vshrl.u32 %v3903_v62, 16  ;;  %v660_v24 = vsel %vm4538_vm5, %v655_v16, %v659_v60  ;;  %v1704_v25 = vor.u32 %v1703_v17, %v1699_v3  ;;  %v3992_v60 = vld [vmem:[%s4486_s19 + $0x74] sm:$0x1] }
  0x32   : > { %v1515_v26 = vshll.u32 %v3904_v12, 16  ;;  %v1712_v28 = vshrl.u32 %v3929_v15, 16  ;;  %v3814_v29 = vcombine.low %v650_v10, %v660_v24  ;;  %v1700_v30 = vsel %vm4538_vm5, %v1695_v20, %v1699_v3  ;;  %v3967_v3 = vld [vmem:[%s4486_s19 + $0x10] sm:$0xf] }
  0x33   : > { %1400 = vrot.lane.b32.xlu1 %v4361_v6, %s4434_s20  ;;  %v1502_v31 = vor.u32 %v1501_v21, %v1498_v19  ;;  %v1511_v32 = vrot.slane %v1509_v23, 4  ;;  %v1705_v35 = vrot.slane %v1704_v25, 4  ;;  %v1715_v38 = vshll.u32 %v3929_v15, 16 }
  0x34   : > { %v1517_v36 = vrot.slane %v1515_v26, 5  ;;  %v1714_v37 = vrot.slane %v1712_v28, 4  ;;  %893 = vrot.lane.b32.xlu0 %v3814_v29, %s4436_s22  ;;  %v1721_v43 = vshll.u32 %v3930_v27, 16  ;;  %v1725_v44 = vshrl.u32 %v3930_v27, 16  ;;  %v3994_v27 = vld [vmem:[%s4486_s19 + $0x7c] sm:$0xf] }
  0x35   : > { %v1503_v41 = vrot.slane %v1502_v31, 4  ;;  %v1512_v42 = vor.u32 %v1511_v32, %v1507_v22  ;;  %v1710_v46 = vsel %vm4538_vm5, %v1705_v35, %v1709_v18  ;;  %v1717_v47 = vrot.slane %v1715_v38, 5  ;;  %v3995_v28 = vld [vmem:[%s4486_s19 + $0x80] sm:$0x1]  ;;  %v3970_v38 = vld [vmem:[%s4486_s19 + $0x1c] sm:$0xf] }
  0x36   : > { %v1731_v48 = vshll.u32 %v3931_v33, 16  ;;  %v1520_v49 = vshrl.u32 %v3905_v34, 16  ;;  %v3958_v51 = vcombine.low %v1700_v30, %v1710_v46  ;;  %v1723_v54 = vrot.slane %v1721_v43, 5  ;;  %v3969_v33 = vld [vmem:[%s4486_s19 + $0x18] sm:$0xe] }
  0x37   : > { %v1508_v52 = vsel %vm4538_vm5, %v1503_v41, %v1507_v22  ;;  %v1513_v53 = vrot.slane %v1512_v42, 4  ;;  %v1718_v56 = vor.u32 %v1717_v47, %v1714_v37  ;;  %v1727_v57 = vrot.slane %v1725_v44, 4  ;;  %v3993_v22 = vld [vmem:[%s4486_s19 + $0x78] sm:$0xe] }
  0x38   : > { %v1733_v58 = vrot.slane %v1731_v48, 5  ;;  %v1522_v59 = vrot.slane %v1520_v49, 4  ;;  %1384 = vrot.lane.b32.xlu0 %v4362_v40, %s4434_s20  ;;  %1943 = vrot.lane.b32.xlu1 %v3958_v51, %s4437_s23  ;;  %v1523_v63 = vshll.u32 %v3905_v34, 16  ;;  %v1529_v1 = vshll.u32 %v3906_v39, 16  ;;  %v4118_v44 = vld [vmem:[%s4486_s19 + $0x78] sm:$0xf] }
  0x39   : > { %v1518_v62 = vsel %vm4538_vm5, %v1513_v53, %v1517_v36  ;;  %v1533_v2 = vshrl.u32 %v3906_v39, 16  ;;  %v1719_v6 = vrot.slane %v1718_v56, 4  ;;  %v1728_v7 = vor.u32 %v1727_v57, %v1723_v54  ;;  %v3971_v39 = vld [vmem:[%s4486_s19 + $0x20] sm:$0x1] }
  0x3a   : > { %v3950_v4 = vcombine.low %v1508_v52, %v1518_v62  ;;  %v1539_v8 = vshll.u32 %v3907_v45, 16  ;;  %v1525_v10 = vrot.slane %v1523_v63, 5  ;;  %v1531_v11 = vrot.slane %v1529_v1, 5  ;;  %v4119_v45 = vld [vmem:[%s4486_s19 + $0x7c] sm:$0xf] }
  0x3b   : > { %v1535_v12 = vrot.slane %v1533_v2, 4  ;;  %v4022_v13 = vrot.slane %v3990_v50, 9  ;;  %v1724_v14 = vsel %vm4538_vm5, %v1719_v6, %v1723_v54  ;;  %v1729_v15 = vrot.slane %v1728_v7, 4  ;;  %v4120_v54 = vld [vmem:[%s4486_s19 + $0x80] sm:$0x1] }
  0x3c   : > { %v1541_v16 = vrot.slane %v1539_v8, 5  ;;  %v2146_v17 = vrot.slane %v3991_v55, 5  ;;  %1927 = vrot.lane.b32.xlu0 %v3950_v4, %s4437_s23  ;;  %v1526_v18 = vor.u32 %v1525_v10, %v1522_v59  ;;  %v2149_v20 = vrot.slane %v3992_v60, 5  ;;  %v4094_v59 = vld [vmem:[%s4486_s19 + $0x18] sm:$0xf] }
  0x3d   : > { %v1536_v19 = vor.u32 %v1535_v12, %v1531_v11  ;;  %v4014_v21 = vrot.slane %v3966_v61, 9  ;;  %v1734_v23 = vsel %vm4538_vm5, %v1729_v15, %v1733_v58  ;;  %v2090_v26 = vrot.slane %v3967_v3, 5  ;;  %v4095_v1 = vld [vmem:[%s4486_s19 + $0x1c] sm:$0xf]  ;;  %v4096_v10 = vld [vmem:[%s4486_s19 + $0x20] sm:$0x1] }
  0x3e   : > { %v2147_v24 = vsel %vm4488_vm2, %v4022_v13, %v2146_v17  ;;  %v2148_v25 = vrot.slane %v2146_v17, 4  ;;  %v3959_v29 = vcombine.low %v1724_v14, %v1734_v23  ;;  %v1527_v30 = vrot.slane %v1526_v18, 4  ;;  %v4363_v17 = vld [vmem:[%s4486_s19 + $0x78] sm:$0xff]  }
  0x3f   : > { %v1537_v31 = vrot.slane %v1536_v19, 4  ;;  %v2093_v32 = vrot.slane %v3968_v9, 5  ;;  %v2091_v35 = vsel %vm4488_vm2, %v4014_v21, %v2090_v26  ;;  %v2092_v36 = vrot.slane %v2090_v26, 4 }
  0x40   : > { %v2150_v34 = vsel %vm4488_vm2, %v2148_v25, %v2149_v20  ;;  %v4023_v37 = vrot.slane %v3993_v22, 9  ;;  %1945 = vrot.lane.b32.xlu1 %v3959_v29, %s4437_s23  ;;  %v1532_v40 = vsel %vm4538_vm5, %v1527_v30, %v1531_v11  ;;  %v2153_v43 = vrot.slane %v3994_v27, 5  ;;  %v4122_v22 = vld [vmem:[%s4486_s19 + $0x88] sm:$0xf]  ;;  %v4364_v27 = vld [vmem:[%s4486_s19 + $0x18] sm:$0xff]  }
  0x41   : > { %v1542_v41 = vsel %vm4538_vm5, %v1537_v31, %v1541_v16  ;;  %v4038_v42 = vcombine.low %v2147_v24, %v2150_v34  ;;  %v2094_v47 = vsel %vm4488_vm2, %v2092_v36, %v2093_v32  ;;  %v2156_v48 = vrot.slane %v3995_v28, 5  ;;  %v4121_v16 = vld [vmem:[%s4486_s19 + $0x84] sm:$0xf] }
  0x42   : > { %v3951_v46 = vcombine.low %v1532_v40, %v1542_v41  ;;  %v4015_v49 = vrot.slane %v3969_v33, 9  ;;  %v4030_v50 = vcombine.low %v2091_v35, %v2094_v47  ;;  %v2154_v51 = vsel %vm4488_vm2, %v4023_v37, %v2153_v43  ;;  %v4123_v35 = vld [vmem:[%s4486_s19 + $0x8c] sm:$0x1]  ;;  %v4097_v37 = vld [vmem:[%s4486_s19 + $0x24] sm:$0xf] }
  0x43   : > { %v2155_v52 = vrot.slane %v2153_v43, 4  ;;  %v2097_v53 = vrot.slane %v3970_v38, 5  ;;  %v2100_v55 = vrot.slane %v3971_v39, 5  ;;  %v2735_v56 = vshrl.u32 %v4118_v44, 16  ;;  %v4365_v38 = vld [vmem:[%s4486_s19 + $0x84] sm:$0xff]  }
  0x44   : > { %1929 = vrot.lane.b32.xlu0 %v3951_v46, %s4437_s23  ;;  %v2738_v57 = vshll.u32 %v4118_v44, 16  ;;  %v2744_v58 = vshll.u32 %v4119_v45, 16  ;;  %2264 = vrot.lane.b32.xlu1 %v4038_v42, %s4438_s24  ;;  %v2748_v63 = vshrl.u32 %v4119_v45, 16  ;;  %v2754_v9 = vshll.u32 %v4120_v54, 16  ;;  %v4098_v43 = vld [vmem:[%s4486_s19 + $0x28] sm:$0xf] }
  0x45   : > { %v2157_v60 = vsel %vm4488_vm2, %v2155_v52, %v2156_v48  ;;  %v2098_v61 = vsel %vm4488_vm2, %v4015_v49, %v2097_v53  ;;  %v2099_v62 = vrot.slane %v2097_v53, 4  ;;  %v2737_v3 = vrot.slane %v2735_v56, 4  ;;  %v4099_v48 = vld [vmem:[%s4486_s19 + $0x2c] sm:$0x1]  ;;  %v4182_v53 = vld [vmem:[%s4486_s19 + $0x78] sm:$0xe] }
  0x46   : > { %v4039_v2 = vcombine.low %v2154_v51, %v2157_v60  ;;  %v2740_v4 = vrot.slane %v2738_v57, 5  ;;  %v2746_v6 = vrot.slane %v2744_v58, 5  ;;  %v2750_v8 = vrot.slane %v2748_v63, 4  ;;  %v4366_v54 = vld [vmem:[%s4486_s19 + $0x24] sm:$0xff]  }
  0x47   : > { %v2101_v7 = vsel %vm4488_vm2, %v2099_v62, %v2100_v55  ;;  %v2543_v11 = vshrl.u32 %v4094_v59, 16  ;;  %v2546_v14 = vshll.u32 %v4094_v59, 16  ;;  %v2552_v15 = vshll.u32 %v4095_v1, 16  ;;  %v4183_v59 = vld [vmem:[%s4486_s19 + $0x7c] sm:$0xf] }
  0x48   : > { %2248 = vrot.lane.b32.xlu0 %v4030_v50, %s4438_s24  ;;  %v4031_v12 = vcombine.low %v2098_v61, %v2101_v7  ;;  %v2741_v13 = vor.u32 %v2740_v4, %v2737_v3  ;;  %2266 = vrot.lane.b32.xlu1 %v4039_v2, %s4438_s24  ;;  %v2751_v18 = vor.u32 %v2750_v8, %v2746_v6  ;;  %v2756_v19 = vrot.slane %v2754_v9, 5  ;;  %v4158_v7 = vld [vmem:[%s4486_s19 + $0x18] sm:$0xe]  ;;  %v4159_v8 = vld [vmem:[%s4486_s19 + $0x1c] sm:$0xf] }
  0x49   : > { %v2545_v20 = vrot.slane %v2543_v11, 4  ;;  %v2556_v21 = vshrl.u32 %v4095_v1, 16  ;;  %v2548_v24 = vrot.slane %v2546_v14, 5  ;;  %v2554_v25 = vrot.slane %v2552_v15, 5  ;;  %v4184_v1 = vld [vmem:[%s4486_s19 + $0x80] sm:$0x1] }
  0x4a   : > { %v2742_v23 = vrot.slane %v2741_v13, 4  ;;  %v2562_v26 = vshll.u32 %v4096_v10, 16  ;;  %v2752_v28 = vrot.slane %v2751_v18, 4  ;;  %v2759_v30 = vshrl.u32 %v4121_v16, 16 }
  0x4b   : > { %v2558_v29 = vrot.slane %v2556_v21, 4  ;;  %v2762_v31 = vshll.u32 %v4121_v16, 16  ;;  %v2549_v33 = vor.u32 %v2548_v24, %v2545_v20  ;;  %v2768_v36 = vshll.u32 %v4122_v22, 16 }
  0x4c   : > { %2250 = vrot.lane.b32.xlu0 %v4031_v12, %s4438_s24  ;;  %v2747_v32 = vsel %vm4538_vm5, %v2742_v23, %v2746_v6  ;;  %v2564_v34 = vrot.slane %v2562_v26, 5  ;;  %2445 = vrot.lane.b32.xlu1 %v4363_v17, %s4439_s25  ;;  %v2757_v39 = vsel %vm4538_vm5, %v2752_v28, %v2756_v19  ;;  %v2761_v41 = vrot.slane %v2759_v30, 4  ;;  %v4160_v17 = vld [vmem:[%s4486_s19 + $0x20] sm:$0x1] }
  0x4d   : > { %v2559_v40 = vor.u32 %v2558_v29, %v2554_v25  ;;  %v2764_v42 = vrot.slane %v2762_v31, 5  ;;  %v4150_v44 = vcombine.low %v2747_v32, %v2757_v39  ;;  %v2550_v45 = vrot.slane %v2549_v33, 4  ;;  %v426_v32 = vld [vmem:[%s4486_s19 + $0x80] sm:$0x1] }
  0x4e   : > { %v2770_v46 = vrot.slane %v2768_v36, 5  ;;  %v2772_v47 = vshrl.u32 %v4122_v22, 16  ;;  %v2778_v51 = vshll.u32 %v4123_v35, 16  ;;  %v2567_v52 = vshrl.u32 %v4097_v37, 16  ;;  %v424_v22 = vld [vmem:[%s4486_s19 + $0x78] sm:$0xf] }
  0x4f   : > { %v2560_v49 = vrot.slane %v2559_v40, 4  ;;  %v2765_v50 = vor.u32 %v2764_v42, %v2761_v41  ;;  %v2555_v55 = vsel %vm4538_vm5, %v2550_v45, %v2554_v25  ;;  %v2570_v57 = vshll.u32 %v4097_v37, 16  ;;  %v400_v37 = vld [vmem:[%s4486_s19 + $0x18] sm:$0xf] }
  0x50   : > { %2429 = vrot.lane.b32.xlu0 %v4364_v27, %s4439_s25  ;;  %v2774_v56 = vrot.slane %v2772_v47, 4  ;;  %v2576_v58 = vshll.u32 %v4098_v43, 16  ;;  %2447 = vrot.lane.b32.xlu1 %v4365_v38, %s4439_s25  ;;  %v2780_v62 = vrot.slane %v2778_v51, 5  ;;  %v2569_v63 = vrot.slane %v2567_v52, 4  ;;  %v425_v27 = vld [vmem:[%s4486_s19 + $0x7c] sm:$0xf] }
  0x51   : > { %v2565_v60 = vsel %vm4538_vm5, %v2560_v49, %v2564_v34  ;;  %v2766_v61 = vrot.slane %v2765_v50, 4  ;;  %v2572_v4 = vrot.slane %v2570_v57, 5  ;;  %v2580_v10 = vshrl.u32 %v4098_v43, 16  ;;  %v401_v38 = vld [vmem:[%s4486_s19 + $0x1c] sm:$0xf] }
  0x52   : > { %v4142_v2 = vcombine.low %v2555_v55, %v2565_v60  ;;  %v2775_v3 = vor.u32 %v2774_v56, %v2770_v46  ;;  %v2578_v6 = vrot.slane %v2576_v58, 5  ;;  %v2586_v11 = vshll.u32 %v4099_v48, 16  ;;  %v402_v43 = vld [vmem:[%s4486_s19 + $0x20] sm:$0x1]  ;;  %v4185_v48 = vld [vmem:[%s4486_s19 + $0x84] sm:$0xe] }
  0x53   : > { %v2771_v9 = vsel %vm4538_vm5, %v2766_v61, %v2770_v46  ;;  %v4214_v12 = vrot.slane %v4182_v53, 9  ;;  %v2573_v14 = vor.u32 %v2572_v4, %v2569_v63  ;;  %v3193_v15 = vrot.slane %v4183_v59, 5  ;;  %v4186_v53 = vld [vmem:[%s4486_s19 + $0x88] sm:$0xf]  ;;  %v4161_v59 = vld [vmem:[%s4486_s19 + $0x24] sm:$0xe] }
  0x54   : > { %2431 = vrot.lane.b32.xlu0 %v4366_v54, %s4439_s25  ;;  %v2776_v13 = vrot.slane %v2775_v3, 4  ;;  %v3196_v16 = vrot.slane %v4184_v1, 5  ;;  %2990 = vrot.lane.b32.xlu1 %v4150_v44, %s4440_s26  ;;  %v2582_v18 = vrot.slane %v2580_v10, 4  ;;  %v2588_v19 = vrot.slane %v2586_v11, 5  ;;  %v4187_v54 = vld [vmem:[%s4486_s19 + $0x8c] sm:$0x1] }
  0x55   : > { %v4206_v20 = vrot.slane %v4158_v7, 9  ;;  %v3137_v21 = vrot.slane %v4159_v8, 5  ;;  %v2574_v24 = vrot.slane %v2573_v14, 4  ;;  %v3194_v25 = vsel %vm4488_vm2, %v4214_v12, %v3193_v15  ;;  %v4162_v1 = vld [vmem:[%s4486_s19 + $0x28] sm:$0xf] }
  0x56   : > { %v2781_v23 = vsel %vm4538_vm5, %v2776_v13, %v2780_v62  ;;  %v3195_v26 = vrot.slane %v3193_v15, 4  ;;  %v2583_v29 = vor.u32 %v2582_v18, %v2578_v6  ;;  %v3140_v35 = vrot.slane %v4160_v17, 5  ;;  %v4163_v7 = vld [vmem:[%s4486_s19 + $0x2c] sm:$0x1]  ;;  %v427_v12 = vld [vmem:[%s4486_s19 + $0x84] sm:$0xf] }
  0x57   : > { %v4151_v28 = vcombine.low %v2771_v9, %v2781_v23  ;;  %v3138_v30 = vsel %vm4488_vm2, %v4206_v20, %v3137_v21  ;;  %v3139_v31 = vrot.slane %v3137_v21, 4  ;;  %v2579_v33 = vsel %vm4538_vm5, %v2574_v24, %v2578_v6  ;;  %v428_v21 = vld [vmem:[%s4486_s19 + $0x88] sm:$0xf] }
  0x58   : > { %2974 = vrot.lane.b32.xlu0 %v4142_v2, %s4440_s26  ;;  %v3197_v34 = vsel %vm4488_vm2, %v3195_v26, %v3196_v16  ;;  %v686_v36 = vshrl.u32 %v424_v22, 16  ;;  %v2584_v39 = vrot.slane %v2583_v29, 4  ;;  %v689_v41 = vshll.u32 %v424_v22, 16 }
  0x59   : > { %2992 = vrot.lane.b32.xlu1 %v4151_v28, %s4440_s26  ;;  %v4230_v40 = vcombine.low %v3194_v25, %v3197_v34  ;;  %v695_v42 = vshll.u32 %v425_v27, 16  ;;  %v3141_v44 = vsel %vm4488_vm2, %v3139_v31, %v3140_v35  ;;  %v699_v46 = vshrl.u32 %v425_v27, 16 }
  0x5a   : > { %v688_v45 = vrot.slane %v686_v36, 4  ;;  %v705_v47 = vshll.u32 %v426_v32, 16  ;;  %v2589_v49 = vsel %vm4538_vm5, %v2584_v39, %v2588_v19  ;;  %v4222_v50 = vcombine.low %v3138_v30, %v3141_v44  ;;  %v403_v39 = vld [vmem:[%s4486_s19 + $0x24] sm:$0xf] }
  0x5b   : > { %v691_v51 = vrot.slane %v689_v41, 5  ;;  %v697_v52 = vrot.slane %v695_v42, 5  ;;  %v4143_v55 = vcombine.low %v2579_v33, %v2589_v49  ;;  %v701_v56 = vrot.slane %v699_v46, 4  ;;  %v429_v33 = vld [vmem:[%s4486_s19 + $0x8c] sm:$0x1] }
  0x5c   : > { %v707_v57 = vrot.slane %v705_v47, 5  ;;  %v494_v58 = vshrl.u32 %v400_v37, 16  ;;  %v497_v61 = vshll.u32 %v400_v37, 16  ;;  %v503_v62 = vshll.u32 %v401_v38, 16  ;;  %v972_v46 = vld [vmem:[%s4486_s19 + $0x78] sm:$0xe] }
  0x5d   : > { %3311 = vrot.lane.b32.xlu1 %v4230_v40, %s4441_s27  ;;  %v692_v60 = vor.u32 %v691_v51, %v688_v45  ;;  %v507_v63 = vshrl.u32 %v401_v38, 16  ;;  %2976 = vrot.lane.b32.xlu0 %v4143_v55, %s4440_s26  ;;  %v702_v2 = vor.u32 %v701_v56, %v697_v52  ;;  %v513_v4 = vshll.u32 %v402_v43, 16  ;;  %v404_v40 = vld [vmem:[%s4486_s19 + $0x28] sm:$0xf]  ;;  %v405_v45 = vld [vmem:[%s4486_s19 + $0x2c] sm:$0x1] }
  0x5e   : > { %v496_v3 = vrot.slane %v494_v58, 4  ;;  %v4215_v6 = vrot.slane %v4185_v48, 9  ;;  %v499_v9 = vrot.slane %v497_v61, 5  ;;  %v505_v10 = vrot.slane %v503_v62, 5  ;;  %v973_v51 = vld [vmem:[%s4486_s19 + $0x7c] sm:$0xf] }
  0x5f   : > { %v693_v8 = vrot.slane %v692_v60, 4  ;;  %v509_v11 = vrot.slane %v507_v63, 4  ;;  %v703_v13 = vrot.slane %v702_v2, 4  ;;  %v515_v14 = vrot.slane %v513_v4, 5  ;;  %v974_v56 = vld [vmem:[%s4486_s19 + $0x80] sm:$0x1] }
  0x60   : > { %v3200_v15 = vrot.slane %v4186_v53, 5  ;;  %v3203_v16 = vrot.slane %v4187_v54, 5  ;;  %v500_v18 = vor.u32 %v499_v9, %v496_v3  ;;  %v4207_v20 = vrot.slane %v4161_v59, 9  ;;  %v948_v61 = vld [vmem:[%s4486_s19 + $0x18] sm:$0xe] }
  0x61   : > { %v698_v17 = vsel %vm4538_vm5, %v693_v8, %v697_v52  ;;  %v510_v19 = vor.u32 %v509_v11, %v505_v10  ;;  %3295 = vrot.lane.b32.xlu0 %v4222_v50, %s4441_s27  ;;  %v708_v22 = vsel %vm4538_vm5, %v703_v13, %v707_v57  ;;  %v3144_v25 = vrot.slane %v4162_v1, 5  ;;  %v949_v3 = vld [vmem:[%s4486_s19 + $0x1c] sm:$0xf]  ;;  %v950_v9 = vld [vmem:[%s4486_s19 + $0x20] sm:$0x1] }
  0x62   : > { %v3201_v23 = vsel %vm4488_vm2, %v4215_v6, %v3200_v15  ;;  %v3202_v24 = vrot.slane %v3200_v15, 4  ;;  %v3816_v26 = vcombine.low %v698_v17, %v708_v22  ;;  %v501_v27 = vrot.slane %v500_v18, 4  ;;  %v4389_v15 = vld [vmem:[%s5670_s1] sm:$0xff]  }
  0x63   : > { %v511_v28 = vrot.slane %v510_v19, 4  ;;  %v3147_v29 = vrot.slane %v4163_v7, 5  ;;  %v3145_v31 = vsel %vm4488_vm2, %v4207_v20, %v3144_v25  ;;  %v3146_v32 = vrot.slane %v3144_v25, 4  ;;  %v976_v20 = vld [vmem:[%s4486_s19 + $0x88] sm:$0xf]  ;;  %4280 = vmatprep.subr.bf16.mxu0 %v4389_v15  ;;  %4318 = vmatprep.subr.bf16.mxu1 %v4389_v15 }
  0x64   : > { %v3204_v30 = vsel %vm4488_vm2, %v3202_v24, %v3203_v16  ;;  %v710_v34 = vshrl.u32 %v427_v12, 16  ;;  %897 = vrot.lane.b32.xlu1 %v3816_v26, %s4436_s22  ;;  %v506_v35 = vsel %vm4538_vm5, %v501_v27, %v505_v10  ;;  %v713_v38 = vshll.u32 %v427_v12, 16  ;;  %v951_v26 = vld [vmem:[%s4486_s19 + $0x24] sm:$0xe]  ;;  %v4390_v27 = vld [vmem:[%s5670_s1 + $0x8] sm:$0xff]   ;;  %4281 = vmatpush3.bf16.msra.mxu0 %v4389_v15 }
  0x65   : > { %v516_v36 = vsel %vm4538_vm5, %v511_v28, %v515_v14  ;;  %v4231_v37 = vcombine.low %v3201_v23, %v3204_v30  ;;  %v3148_v42 = vsel %vm4488_vm2, %v3146_v32, %v3147_v29  ;;  %v719_v44 = vshll.u32 %v428_v21, 16  ;;  %v975_v14 = vld [vmem:[%s4486_s19 + $0x84] sm:$0xe]  ;;  %v952_v32 = vld [vmem:[%s4486_s19 + $0x28] sm:$0xf]  ;;  %4321 = vmatpush3.bf16.msra.mxu1 %v4389_v15  ;;  %4282 = vmatprep.subr.bf16.mxu0 %v4390_v27 }
  0x66   : > { %v3808_v41 = vcombine.low %v506_v35, %v516_v36  ;;  %v712_v43 = vrot.slane %v710_v34, 4  ;;  %v4223_v47 = vcombine.low %v3145_v31, %v3148_v42  ;;  %v715_v48 = vrot.slane %v713_v38, 5  ;;  %v3932_v42 = vld [vmem:[%s4486_s19 + $0x84] sm:$0xf]  ;;  %4319 = vmatprep.subr.bf16.mxu1 %v4390_v27 }
  0x67   : > { %v723_v49 = vshrl.u32 %v428_v21, 16  ;;  %v729_v50 = vshll.u32 %v429_v33, 16  ;;  %v721_v52 = vrot.slane %v719_v44, 5  ;;  %v518_v53 = vshrl.u32 %v403_v39, 16  ;;  %v977_v21 = vld [vmem:[%s4486_s19 + $0x8c] sm:$0x1] }
  0x68   : > { %881 = vrot.lane.b32.xlu0 %v3808_v41, %s4436_s22  ;;  %v521_v54 = vshll.u32 %v403_v39, 16  ;;  %v527_v55 = vshll.u32 %v404_v40, 16  ;;  %3313 = vrot.lane.b32.xlu1 %v4231_v37, %s4441_s27  ;;  %v716_v57 = vor.u32 %v715_v48, %v712_v43  ;;  %v531_v60 = vshrl.u32 %v404_v40, 16  ;;  %v953_v37 = vld [vmem:[%s4486_s19 + $0x2c] sm:$0x1] }
  0x69   : > { %v725_v58 = vrot.slane %v723_v49, 4  ;;  %v731_v59 = vrot.slane %v729_v50, 5  ;;  %v520_v62 = vrot.slane %v518_v53, 4  ;;  %v537_v2 = vshll.u32 %v405_v45, 16  ;;  %v3933_v43 = vld [vmem:[%s4486_s19 + $0x88] sm:$0xf]  ;;  %4283 = vmatpush3.bf16.msra.mxu0 %v4390_v27  ;;  %4322 = vmatpush3.bf16.msra.mxu1 %v4390_v27 }
  0x6a   : > { %v523_v63 = vrot.slane %v521_v54, 5  ;;  %v529_v1 = vrot.slane %v527_v55, 5  ;;  %v717_v4 = vrot.slane %v716_v57, 4  ;;  %v533_v7 = vrot.slane %v531_v60, 4  ;;  %v3934_v48 = vld [vmem:[%s4486_s19 + $0x8c] sm:$0x1] }
  0x6b   : > { %v726_v6 = vor.u32 %v725_v58, %v721_v52  ;;  %v3832_v8 = vrot.slane %v972_v46, 9  ;;  %v539_v11 = vrot.slane %v537_v2, 5  ;;  %v1113_v12 = vrot.slane %v973_v51, 5  ;;  %v3908_v53 = vld [vmem:[%s4486_s19 + $0x24] sm:$0xf] }
  0x6c   : > { %3297 = vrot.lane.b32.xlu0 %v4223_v47, %s4441_s27  ;;  %v524_v10 = vor.u32 %v523_v63, %v520_v62  ;;  %v1116_v13 = vrot.slane %v974_v56, 5  ;;  %v722_v16 = vsel %vm4538_vm5, %v717_v4, %v721_v52  ;;  %v534_v18 = vor.u32 %v533_v7, %v529_v1  ;;  %v3909_v54 = vld [vmem:[%s4486_s19 + $0x28] sm:$0xf] }
  0x6d   : > { %v727_v17 = vrot.slane %v726_v6, 4  ;;  %v3824_v19 = vrot.slane %v948_v61, 9  ;;  %v1114_v23 = vsel %vm4488_vm2, %v3832_v8, %v1113_v12  ;;  %v1115_v24 = vrot.slane %v1113_v12, 4 }
  0x6e   : > { %v525_v22 = vrot.slane %v524_v10, 4  ;;  %v1057_v25 = vrot.slane %v949_v3, 5  ;;  %v535_v29 = vrot.slane %v534_v18, 4  ;;  %v1060_v30 = vrot.slane %v950_v9, 5 }
  0x6f   : > { %v732_v28 = vsel %vm4538_vm5, %v727_v17, %v731_v59  ;;  %v3833_v31 = vrot.slane %v975_v14, 9  ;;  %v1117_v35 = vsel %vm4488_vm2, %v1115_v24, %v1116_v13  ;;  %v1120_v41 = vrot.slane %v976_v20, 5  ;;  %v3910_v59 = vld [vmem:[%s4486_s19 + $0x2c] sm:$0x1]  ;;  %v4367_v20 = vld [vmem:[%s4486_s19 + $0x84] sm:$0xff]  }
  0x70   : > { %v3817_v33 = vcombine.low %v722_v16, %v732_v28  ;;  %v530_v34 = vsel %vm4538_vm5, %v525_v22, %v529_v1  ;;  %v1058_v36 = vsel %vm4488_vm2, %v3824_v19, %v1057_v25  ;;  %v540_v38 = vsel %vm4538_vm5, %v535_v29, %v539_v11  ;;  %v3935_v1 = vld [vmem:[%s4486_s19 + $0x90] sm:$0xf]  ;;  %v3936_v19 = vld [vmem:[%s4486_s19 + $0x94] sm:$0xf]  ;;  %v3937_v29 = vld [vmem:[%s4486_s19 + $0x98] sm:$0x1] }
  0x71   : > { %v3848_v39 = vcombine.low %v1114_v23, %v1117_v35  ;;  %v1059_v40 = vrot.slane %v1057_v25, 4  ;;  %v3809_v44 = vcombine.low %v530_v34, %v540_v38  ;;  %v1123_v45 = vrot.slane %v977_v21, 5  ;;  %v3911_v35 = vld [vmem:[%s4486_s19 + $0x30] sm:$0xf] }
  0x72   : > { %899 = vrot.lane.b32.xlu1 %v3817_v33, %s4436_s22  ;;  %v3825_v46 = vrot.slane %v951_v26, 9  ;;  %v1064_v47 = vrot.slane %v952_v32, 5  ;;  %v1121_v50 = vsel %vm4488_vm2, %v3833_v31, %v1120_v41  ;;  %v1122_v51 = vrot.slane %v1120_v41, 4  ;;  %v4369_v41 = vld [vmem:[%s4486_s19 + $0x90] sm:$0xff]  }
  0x73   : > { %v1061_v49 = vsel %vm4488_vm2, %v1059_v40, %v1060_v30  ;;  %v1067_v52 = vrot.slane %v953_v37, 5  ;;  %883 = vrot.lane.b32.xlu0 %v3809_v44, %s4436_s22  ;;  %v1736_v58 = vshrl.u32 %v3932_v42, 16  ;;  %v1739_v61 = vshll.u32 %v3932_v42, 16  ;;  %v4368_v30 = vld [vmem:[%s4486_s19 + $0x24] sm:$0xff]   ;;  %v3912_v40 = vld [vmem:[%s4486_s19 + $0x34] sm:$0xf] }
  0x74   : > { %v3840_v55 = vcombine.low %v1058_v36, %v1061_v49  ;;  %v1065_v56 = vsel %vm4488_vm2, %v3825_v46, %v1064_v47  ;;  %v1066_v57 = vrot.slane %v1064_v47, 4  ;;  %v1124_v60 = vsel %vm4488_vm2, %v1122_v51, %v1123_v45  ;;  %v4370_v42 = vld [vmem:[%s4486_s19 + $0x30] sm:$0xff]  }
  0x75   : > { %v1745_v62 = vshll.u32 %v3933_v43, 16  ;;  %v1749_v63 = vshrl.u32 %v3933_v43, 16  ;;  %v3849_v2 = vcombine.low %v1121_v50, %v1124_v60  ;;  %v1738_v4 = vrot.slane %v1736_v58, 4  ;;  %v3913_v50 = vld [vmem:[%s4486_s19 + $0x38] sm:$0x1] }
  0x76   : > { %1221 = vrot.lane.b32.xlu1 %v3848_v39, %s4435_s21  ;;  %v1068_v3 = vsel %vm4488_vm2, %v1066_v57, %v1067_v52  ;;  %v1755_v6 = vshll.u32 %v3934_v48, 16  ;;  %v1741_v8 = vrot.slane %v1739_v61, 5  ;;  %v1544_v12 = vshrl.u32 %v3908_v53, 16  ;;  %v3997_v57 = vld [vmem:[%s4486_s19 + $0x88] sm:$0xf] }
  0x77   : > { %v3841_v7 = vcombine.low %v1065_v56, %v1068_v3  ;;  %v1747_v9 = vrot.slane %v1745_v62, 5  ;;  %v1751_v10 = vrot.slane %v1749_v63, 4  ;;  %1205 = vrot.lane.b32.xlu0 %v3840_v55, %s4435_s21  ;;  %v1547_v13 = vshll.u32 %v3908_v53, 16  ;;  %v3996_v56 = vld [vmem:[%s4486_s19 + $0x84] sm:$0xe] }
  0x78   : > { %v1757_v11 = vrot.slane %v1755_v6, 5  ;;  %v1553_v14 = vshll.u32 %v3909_v54, 16  ;;  %v1742_v15 = vor.u32 %v1741_v8, %v1738_v4  ;;  %v1557_v17 = vshrl.u32 %v3909_v54, 16  ;;  %v3998_v62 = vld [vmem:[%s4486_s19 + $0x8c] sm:$0x1] }
  0x79   : > { %v1752_v16 = vor.u32 %v1751_v10, %v1747_v9  ;;  %v1563_v18 = vshll.u32 %v3910_v59, 16  ;;  %v1546_v21 = vrot.slane %v1544_v12, 4  ;;  %v1549_v22 = vrot.slane %v1547_v13, 5  ;;  %v3972_v63 = vld [vmem:[%s4486_s19 + $0x24] sm:$0xe] }
  0x7a   : > { %1223 = vrot.lane.b32.xlu1 %v3849_v2, %s4435_s21  ;;  %v1555_v23 = vrot.slane %v1553_v14, 5  ;;  %v1760_v24 = vshrl.u32 %v3935_v1, 16  ;;  %v1743_v25 = vrot.slane %v1742_v15, 4  ;;  %v1559_v27 = vrot.slane %v1557_v17, 4  ;;  %v3973_v6 = vld [vmem:[%s4486_s19 + $0x28] sm:$0xf] }
  0x7b   : > { %v1753_v26 = vrot.slane %v1752_v16, 4  ;;  %v1565_v28 = vrot.slane %v1563_v18, 5  ;;  %1207 = vrot.lane.b32.xlu0 %v3841_v7, %s4435_s21  ;;  %v1550_v31 = vor.u32 %v1549_v22, %v1546_v21  ;;  %v1763_v33 = vshll.u32 %v3935_v1, 16  ;;  %v3999_v16 = vld [vmem:[%s4486_s19 + $0x90] sm:$0xe] }
  0x7c   : > { %v1762_v32 = vrot.slane %v1760_v24, 4  ;;  %v1769_v34 = vshll.u32 %v3936_v19, 16  ;;  %v1748_v36 = vsel %vm4538_vm5, %v1743_v25, %v1747_v9  ;;  %v1560_v38 = vor.u32 %v1559_v27, %v1555_v23  ;;  %v4000_v17 = vld [vmem:[%s4486_s19 + $0x94] sm:$0xf]  ;;  %v4001_v22 = vld [vmem:[%s4486_s19 + $0x98] sm:$0x1] }
  0x7d   : > { %v1758_v37 = vsel %vm4538_vm5, %v1753_v26, %v1757_v11  ;;  %v1773_v39 = vshrl.u32 %v3936_v19, 16  ;;  %v1551_v44 = vrot.slane %v1550_v31, 4  ;;  %v1765_v45 = vrot.slane %v1763_v33, 5  ;;  %v3974_v11 = vld [vmem:[%s4486_s19 + $0x2c] sm:$0x1] }
  0x7e   : > { %1402 = vrot.lane.b32.xlu1 %v4367_v20, %s4434_s20  ;;  %v3960_v43 = vcombine.low %v1748_v36, %v1758_v37  ;;  %v1771_v46 = vrot.slane %v1769_v34, 5  ;;  %v1561_v47 = vrot.slane %v1560_v38, 4  ;;  %v1779_v49 = vshll.u32 %v3937_v29, 16  ;;  %v3975_v27 = vld [vmem:[%s4486_s19 + $0x30] sm:$0xe] }
  0x7f   : > { %v1775_v48 = vrot.slane %v1773_v39, 4  ;;  %v1568_v51 = vshrl.u32 %v3911_v35, 16  ;;  %1386 = vrot.lane.b32.xlu0 %v4368_v30, %s4434_s20  ;;  %v1556_v52 = vsel %vm4538_vm5, %v1551_v44, %v1555_v23  ;;  %v1766_v53 = vor.u32 %v1765_v45, %v1762_v32  ;;  %v3976_v32 = vld [vmem:[%s4486_s19 + $0x34] sm:$0xf]  ;;  %v3977_v37 = vld [vmem:[%s4486_s19 + $0x38] sm:$0x1] }
  0x80   : > { %v1571_v54 = vshll.u32 %v3911_v35, 16  ;;  %v1577_v55 = vshll.u32 %v3912_v40, 16  ;;  %v1566_v58 = vsel %vm4538_vm5, %v1561_v47, %v1565_v28  ;;  %v1781_v60 = vrot.slane %v1779_v49, 5  ;;  %v4124_v38 = vld [vmem:[%s4486_s19 + $0x90] sm:$0xf] }
  0x81   : > { %v1776_v59 = vor.u32 %v1775_v48, %v1771_v46  ;;  %v1570_v61 = vrot.slane %v1568_v51, 4  ;;  %v3952_v1 = vcombine.low %v1556_v52, %v1566_v58  ;;  %v1767_v2 = vrot.slane %v1766_v53, 4  ;;  %v4126_v44 = vld [vmem:[%s4486_s19 + $0x98] sm:$0x1]  ;;  %v4100_v45 = vld [vmem:[%s4486_s19 + $0x30] sm:$0xf] }
  0x82   : > { %1404 = vrot.lane.b32.xlu1 %v4369_v41, %s4434_s20  ;;  %v1573_v3 = vrot.slane %v1571_v54, 5  ;;  %v1579_v4 = vrot.slane %v1577_v55, 5  ;;  %v1581_v8 = vshrl.u32 %v3912_v40, 16  ;;  %v1587_v9 = vshll.u32 %v3913_v50, 16 }
  0x83   : > { %v1777_v7 = vrot.slane %v1776_v59, 4  ;;  %v4024_v10 = vrot.slane %v3996_v56, 9  ;;  %1388 = vrot.lane.b32.xlu0 %v4370_v42, %s4434_s20  ;;  %v1772_v12 = vsel %vm4538_vm5, %v1767_v2, %v1771_v46  ;;  %v2160_v14 = vrot.slane %v3997_v57, 5  ;;  %v4101_v59 = vld [vmem:[%s4486_s19 + $0x34] sm:$0xf] }
  0x84   : > { %v1574_v13 = vor.u32 %v1573_v3, %v1570_v61  ;;  %v2163_v15 = vrot.slane %v3998_v62, 5  ;;  %v1583_v19 = vrot.slane %v1581_v8, 4  ;;  %v1589_v20 = vrot.slane %v1587_v9, 5 }
  0x85   : > { %v1782_v18 = vsel %vm4538_vm5, %v1777_v7, %v1781_v60  ;;  %v4016_v21 = vrot.slane %v3972_v63, 9  ;;  %v2161_v25 = vsel %vm4488_vm2, %v4024_v10, %v2160_v14  ;;  %v2162_v26 = vrot.slane %v2160_v14, 4  ;;  %v4834_v46 = vpop.permute.xlu1 %1398 }
  0x86   : > { %1947 = vrot.lane.b32.xlu1 %v3960_v43, %s4437_s23  ;;  %v3961_v23 = vcombine.low %v1772_v12, %v1782_v18  ;;  %v1575_v24 = vrot.slane %v1574_v13, 4  ;;  %v1584_v28 = vor.u32 %v1583_v19, %v1579_v4  ;;  %v2104_v29 = vrot.slane %v3973_v6, 5  ;;  %v4125_v43 = vld [vmem:[%s4486_s19 + $0x94] sm:$0xf]  ;;  %v4127_v12 = vld [vmem:[%s4486_s19 + $0x9c] sm:$0xf] }
  0x87   : > { %v2107_v30 = vrot.slane %v3974_v11, 5  ;;  %v4025_v31 = vrot.slane %v3999_v16, 9  ;;  %1931 = vrot.lane.b32.xlu0 %v3952_v1, %s4437_s23  ;;  %v2164_v34 = vsel %vm4488_vm2, %v2162_v26, %v2163_v15  ;;  %v2167_v35 = vrot.slane %v4000_v17, 5  ;;  %v4853_v11 = vpop.permute.xlu0 %1382  ;;  %v4128_v18 = vld [vmem:[%s4486_s19 + $0xa0] sm:$0xf] }
  0x88   : > { %v1580_v33 = vsel %vm4538_vm5, %v1575_v24, %v1579_v4  ;;  %v2170_v36 = vrot.slane %v4001_v22, 5  ;;  %v1585_v39 = vrot.slane %v1584_v28, 4  ;;  %v4040_v40 = vcombine.low %v2161_v25, %v2164_v34  ;;  %v4102_v4 = vld [vmem:[%s4486_s19 + $0x38] sm:$0x1]  ;;  %v4371_v24 = vld [vmem:[%s4486_s19 + $0x90] sm:$0xff]  }
  0x89   : > { %v2105_v41 = vsel %vm4488_vm2, %v4016_v21, %v2104_v29  ;;  %v2106_v42 = vrot.slane %v2104_v29, 4  ;;  %v2168_v47 = vsel %vm4488_vm2, %v4025_v31, %v2167_v35  ;;  %v2169_v48 = vrot.slane %v2167_v35, 4  ;;  %v4103_v29 = vld [vmem:[%s4486_s19 + $0x3c] sm:$0xf] }
  0x8a   : > { %1949 = vrot.lane.b32.xlu1 %v3961_v23, %s4437_s23  ;;  %v4017_v49 = vrot.slane %v3975_v27, 9  ;;  %v2111_v50 = vrot.slane %v3976_v32, 5  ;;  %v1590_v51 = vsel %vm4538_vm5, %v1585_v39, %v1589_v20  ;;  %v2114_v53 = vrot.slane %v3977_v37, 5  ;;  %v4129_v23 = vld [vmem:[%s4486_s19 + $0xa4] sm:$0x1] }
  0x8b   : > { %v2108_v52 = vsel %vm4488_vm2, %v2106_v42, %v2107_v30  ;;  %v2783_v54 = vshrl.u32 %v4124_v38, 16  ;;  %v3953_v55 = vcombine.low %v1580_v33, %v1590_v51  ;;  %v2171_v57 = vsel %vm4488_vm2, %v2169_v48, %v2170_v36  ;;  %v4104_v51 = vld [vmem:[%s4486_s19 + $0x40] sm:$0xf] }
  0x8c   : > { %v4032_v56 = vcombine.low %v2105_v41, %v2108_v52  ;;  %v2112_v58 = vsel %vm4488_vm2, %v4017_v49, %v2111_v50  ;;  %v4041_v60 = vcombine.low %v2168_v47, %v2171_v57  ;;  %v2113_v61 = vrot.slane %v2111_v50, 4  ;;  %v4856_v13 = vpop.permute.xlu1 %1217  ;;  %v4374_v57 = vld [vmem:[%s4486_s19 + $0x3c] sm:$0xff]  }
  0x8d   : > { %v2785_v62 = vrot.slane %v2783_v54, 4  ;;  %v2786_v63 = vshll.u32 %v4124_v38, 16  ;;  %1933 = vrot.lane.b32.xlu0 %v3953_v55, %s4437_s23  ;;  %v2792_v1 = vshll.u32 %v4125_v43, 16  ;;  %v2796_v2 = vshrl.u32 %v4125_v43, 16  ;;  %v4372_v38 = vld [vmem:[%s4486_s19 + $0x30] sm:$0xff]  }
  0x8e   : > { %2268 = vrot.lane.b32.xlu1 %v4040_v40, %s4438_s24  ;;  %v2802_v3 = vshll.u32 %v4126_v44, 16  ;;  %v2591_v6 = vshrl.u32 %v4100_v45, 16  ;;  %v2115_v7 = vsel %vm4488_vm2, %v2113_v61, %v2114_v53  ;;  %v2594_v9 = vshll.u32 %v4100_v45, 16  ;;  %v4867_v43 = vpop.permute.xlu0 %1201  ;;  %v4373_v45 = vld [vmem:[%s4486_s19 + $0x9c] sm:$0xff]   ;;  %v4105_v55 = vld [vmem:[%s4486_s19 + $0x44] sm:$0x1] }
  0x8f   : > { %v2788_v8 = vrot.slane %v2786_v63, 5  ;;  %v2600_v10 = vshll.u32 %v4101_v59, 16  ;;  %v4033_v14 = vcombine.low %v2112_v58, %v2115_v7  ;;  %v2794_v15 = vrot.slane %v2792_v1, 5 }
  0x90   : > { %v2798_v16 = vrot.slane %v2796_v2, 4  ;;  %v2804_v17 = vrot.slane %v2802_v3, 5  ;;  %v2593_v20 = vrot.slane %v2591_v6, 4  ;;  %v2596_v21 = vrot.slane %v2594_v9, 5 }
  0x91   : > { %v2789_v19 = vor.u32 %v2788_v8, %v2785_v62  ;;  %v2602_v22 = vrot.slane %v2600_v10, 5  ;;  %2252 = vrot.lane.b32.xlu0 %v4032_v56, %s4438_s24  ;;  %v2604_v26 = vshrl.u32 %v4101_v59, 16  ;;  %v2610_v27 = vshll.u32 %v4102_v4, 16  ;;  %v4869_v44 = vpop.permute.xlu1 %1219  ;;  %v4188_v62 = vld [vmem:[%s4486_s19 + $0x90] sm:$0xe] }
  0x92   : > { %2270 = vrot.lane.b32.xlu1 %v4041_v60, %s4438_s24  ;;  %v2799_v25 = vor.u32 %v2798_v16, %v2794_v15  ;;  %v2807_v28 = vshrl.u32 %v4127_v12, 16  ;;  %v2597_v31 = vor.u32 %v2596_v21, %v2593_v20  ;;  %v2810_v32 = vshll.u32 %v4127_v12, 16  ;;  %v4189_v4 = vld [vmem:[%s4486_s19 + $0x94] sm:$0xf]  ;;  %v4190_v10 = vld [vmem:[%s4486_s19 + $0x98] sm:$0x1]  ;;  %v4893_v20 = vpop.permute.xlu0 %1203 }
  0x93   : > { %v2790_v30 = vrot.slane %v2789_v19, 4  ;;  %v2816_v33 = vshll.u32 %v4128_v18, 16  ;;  %v2606_v35 = vrot.slane %v2604_v26, 4  ;;  %v2612_v36 = vrot.slane %v2610_v27, 5  ;;  %v4164_v12 = vld [vmem:[%s4486_s19 + $0x30] sm:$0xe] }
  0x94   : > { %v2800_v34 = vrot.slane %v2799_v25, 4  ;;  %v2809_v37 = vrot.slane %v2807_v28, 4  ;;  %v2598_v40 = vrot.slane %v2597_v31, 4  ;;  %v2812_v41 = vrot.slane %v2810_v32, 5  ;;  %v4166_v19 = vld [vmem:[%s4486_s19 + $0x38] sm:$0x1] }
  0x95   : > { %v2795_v39 = vsel %vm4538_vm5, %v2790_v30, %v2794_v15  ;;  %v2818_v42 = vrot.slane %v2816_v33, 5  ;;  %2254 = vrot.lane.b32.xlu0 %v4033_v14, %s4438_s24  ;;  %v2607_v48 = vor.u32 %v2606_v35, %v2602_v22  ;;  %v2820_v49 = vshrl.u32 %v4128_v18, 16  ;;  %v4165_v18 = vld [vmem:[%s4486_s19 + $0x34] sm:$0xf]  ;;  %v430_v30 = vld [vmem:[%s4486_s19 + $0x90] sm:$0xf] }
  0x96   : > { %2449 = vrot.lane.b32.xlu1 %v4371_v24, %s4439_s25  ;;  %v2805_v47 = vsel %vm4538_vm5, %v2800_v34, %v2804_v17  ;;  %v2826_v50 = vshll.u32 %v4129_v23, 16  ;;  %v2603_v53 = vsel %vm4538_vm5, %v2598_v40, %v2602_v22  ;;  %v2813_v54 = vor.u32 %v2812_v41, %v2809_v37  ;;  %v431_v35 = vld [vmem:[%s4486_s19 + $0x94] sm:$0xf]  ;;  %v432_v40 = vld [vmem:[%s4486_s19 + $0x98] sm:$0x1] }
  0x97   : > { %v4152_v52 = vcombine.low %v2795_v39, %v2805_v47  ;;  %v2615_v56 = vshrl.u32 %v4103_v29, 16  ;;  %v2608_v58 = vrot.slane %v2607_v48, 4  ;;  %v2822_v59 = vrot.slane %v2820_v49, 4  ;;  %v406_v41 = vld [vmem:[%s4486_s19 + $0x30] sm:$0xf] }
  0x98   : > { %v2828_v60 = vrot.slane %v2826_v50, 5  ;;  %v2618_v61 = vshll.u32 %v4103_v29, 16  ;;  %v2814_v63 = vrot.slane %v2813_v54, 4  ;;  %v2624_v2 = vshll.u32 %v4104_v51, 16  ;;  %v407_v49 = vld [vmem:[%s4486_s19 + $0x34] sm:$0xf] }
  0x99   : > { %v2617_v1 = vrot.slane %v2615_v56, 4  ;;  %v2628_v3 = vshrl.u32 %v4104_v51, 16  ;;  %2433 = vrot.lane.b32.xlu0 %v4372_v38, %s4439_s25  ;;  %v2613_v6 = vsel %vm4538_vm5, %v2608_v58, %v2612_v36  ;;  %v2823_v7 = vor.u32 %v2822_v59, %v2818_v42  ;;  %v4895_v21 = vpop.permute.xlu1 %879  ;;  %v408_v50 = vld [vmem:[%s4486_s19 + $0x38] sm:$0x1] }
  0x9a   : > { %2451 = vrot.lane.b32.xlu1 %v4373_v45, %s4439_s25  ;;  %v2620_v8 = vrot.slane %v2618_v61, 5  ;;  %v2634_v9 = vshll.u32 %v4105_v55, 16  ;;  %v4144_v14 = vcombine.low %v2603_v53, %v2613_v6  ;;  %v2819_v15 = vsel %vm4538_vm5, %v2814_v63, %v2818_v42  ;;  %v4378_v6 = vld [vmem:[%s4486_s19 + $0x60] sm:$0xff]  }
  0x9b   : > { %v2626_v16 = vrot.slane %v2624_v2, 5  ;;  %v2630_v17 = vrot.slane %v2628_v3, 4  ;;  %v2824_v22 = vrot.slane %v2823_v7, 4  ;;  %v4216_v25 = vrot.slane %v4188_v62, 9  ;;  %v4375_v2 = vld [vmem:[%s4486_s19 + $0xc] sm:$0xff]   ;;  %v4376_v3 = vld [vmem:[%s4486_s19] sm:$0xff]  }
  0x9c   : > { %v2621_v23 = vor.u32 %v2620_v8, %v2617_v1  ;;  %v2636_v24 = vrot.slane %v2634_v9, 5  ;;  %v3207_v27 = vrot.slane %v4189_v4, 5  ;;  %v3210_v28 = vrot.slane %v4190_v10, 5  ;;  %v4919_v55 = vpop.permute.xlu0 %877  ;;  %v4377_v4 = vld [vmem:[%s4486_s19 + $0x6c] sm:$0xff]   ;;  %v4387_v7 = vld [vmem:[%s4486_s19 + $0x78] sm:$0xff]   ;;  %v4391_v9 = vld [vmem:[%s4486_s19 + $0x84] sm:$0xff]  }
  0x9d   : > { %v2631_v26 = vor.u32 %v2630_v17, %v2626_v16  ;;  %v4208_v29 = vrot.slane %v4164_v12, 9  ;;  %2435 = vrot.lane.b32.xlu0 %v4374_v57, %s4439_s25  ;;  %v2829_v31 = vsel %vm4538_vm5, %v2824_v22, %v2828_v60  ;;  %v3151_v33 = vrot.slane %v4165_v18, 5  ;;  %v4388_v8 = vld [vmem:[%s4486_s19 + $0x18] sm:$0xff]   ;;  %379 = vst.msk [vmem:[#allocation2 + $0x8] sm:$0xff] %vm377_vm6, %v4375_v2  ;;  %378 = vst.msk [vmem:[#allocation2] sm:$0xff] %vm377_vm6, %v4376_v3 }
  0x9e   : > { %2994 = vrot.lane.b32.xlu1 %v4152_v52, %s4440_s26  ;;  %v2622_v32 = vrot.slane %v2621_v23, 4  ;;  %v3154_v34 = vrot.slane %v4166_v19, 5  ;;  %v4153_v36 = vcombine.low %v2819_v15, %v2829_v31  ;;  %v3208_v38 = vsel %vm4488_vm2, %v4216_v25, %v3207_v27  ;;  %v4192_v23 = vld [vmem:[%s4486_s19 + $0xa0] sm:$0xf]  ;;  %v4167_v25 = vld [vmem:[%s4486_s19 + $0x3c] sm:$0xe] }
  0x9f   : > { %v2632_v37 = vrot.slane %v2631_v26, 4  ;;  %v3209_v39 = vrot.slane %v3207_v27, 4  ;;  %v4911_v45 = vsel %vm4488_vm2, %v4208_v29, %v3151_v33  ;;  %v3153_v47 = vrot.slane %v3151_v33, 4  ;;  %v4392_v26 = vld [vmem:[%s4486_s19 + $0x24] sm:$0xff]   ;;  %387 = vst.msk [vmem:[#allocation2 + $0x48] sm:$0xff] %vm377_vm6, %v4377_v4  ;;  %386 = vst.msk [vmem:[#allocation2 + $0x40] sm:$0xff] %vm377_vm6, %v4378_v6 }
  0xa0   : > { %v2627_v42 = vsel %vm4538_vm5, %v2622_v32, %v2626_v16  ;;  %v734_v48 = vshrl.u32 %v430_v30, 16  ;;  %v737_v53 = vshll.u32 %v430_v30, 16  ;;  %v743_v54 = vshll.u32 %v431_v35, 16  ;;  %v4938_v16 = vld [vmem:[%s4486_s19 + $0x9c] sm:$0xe]  ;;  %388 = vst.msk [vmem:[#allocation2 + $0x50] sm:$0xff] %vm377_vm6, %v4387_v7 }
  0xa1   : > { %v2637_v51 = vsel %vm4538_vm5, %v2632_v37, %v2636_v24  ;;  %v3211_v52 = vsel %vm4488_vm2, %v3209_v39, %v3210_v28  ;;  %v4921_v56 = vpop.permute.xlu1 %895  ;;  %2978 = vrot.lane.b32.xlu0 %v4144_v14, %s4440_s26  ;;  %v3155_v59 = vsel %vm4488_vm2, %v3153_v47, %v3154_v34  ;;  %v747_v1 = vshrl.u32 %v431_v35, 16  ;;  %v4942_v24 = vld [vmem:[%s4486_s19 + $0xa4] sm:$0x1]  ;;  %v4168_v35 = vld [vmem:[%s4486_s19 + $0x40] sm:$0xf]  ;;  %380 = vst.msk [vmem:[#allocation2 + $0x10] sm:$0xff] %vm377_vm6, %v4388_v8 }
  0xa2   : > { %2996 = vrot.lane.b32.xlu1 %v4153_v36, %s4440_s26  ;;  %v4145_v57 = vcombine.low %v2627_v42, %v2637_v51  ;;  %v4232_v58 = vcombine.low %v3208_v38, %v3211_v52  ;;  %v736_v60 = vrot.slane %v734_v48, 4  ;;  %v4224_v61 = vcombine.low %v4911_v45, %v3155_v59  ;;  %v4169_v39 = vld [vmem:[%s4486_s19 + $0x44] sm:$0x1]  ;;  %389 = vst.msk [vmem:[#allocation2 + $0x58] sm:$0xff] %vm377_vm6, %v4391_v9  ;;  %v433_v51 = vld [vmem:[%s4486_s19 + $0x9c] sm:$0xf] }
  0xa3   : > { %v739_v62 = vrot.slane %v737_v53, 5  ;;  %v4928_v63 = vrot.slane %v743_v54, 5  ;;  %v753_v10 = vshll.u32 %v432_v40, 16  ;;  %v542_v12 = vshrl.u32 %v406_v41, 16  ;;  %381 = vst.msk [vmem:[#allocation2 + $0x18] sm:$0xff] %vm377_vm6, %v4392_v26 }
  0xa4   : > { %v545_v14 = vshll.u32 %v406_v41, 16  ;;  %v551_v15 = vshll.u32 %v407_v49, 16  ;;  %v749_v18 = vrot.slane %v747_v1, 4  ;;  %v555_v19 = vshrl.u32 %v407_v49, 16  ;;  %927 = vst.msk [vmem:[#allocation2 + $0x8] sm:$0xff] %vm925_vm7, %v4895_v21  ;;  %926 = vst.msk [vmem:[#allocation2] sm:$0xff] %vm925_vm7, %v4919_v55 }
  0xa5   : > { %v740_v17 = vor.u32 %v739_v62, %v736_v60  ;;  %v561_v22 = vshll.u32 %v408_v50, 16  ;;  %2980 = vrot.lane.b32.xlu0 %v4145_v57, %s4440_s26  ;;  %v755_v27 = vrot.slane %v753_v10, 5  ;;  %v544_v28 = vrot.slane %v542_v12, 4  ;;  %v4950_v37 = vpop.permute.xlu1 %1400  ;;  %935 = vst.msk [vmem:[#allocation2 + $0x48] sm:$0xff] %vm925_vm7, %v4921_v56  ;;  %v434_v55 = vld [vmem:[%s4486_s19 + $0xa0] sm:$0xf] }
  0xa6   : > { %3315 = vrot.lane.b32.xlu1 %v4232_v58, %s4441_s27  ;;  %v547_v29 = vrot.slane %v545_v14, 5  ;;  %v553_v30 = vrot.slane %v551_v15, 5  ;;  %v750_v32 = vor.u32 %v749_v18, %v4928_v63  ;;  %v557_v33 = vrot.slane %v555_v19, 4  ;;  %v894_v36 = vpop.permute.xlu0 %893  ;;  %1250 = vst.msk [vmem:[#allocation2] sm:$0xff] %vm1249_vm8, %v4867_v43  ;;  %1251 = vst.msk [vmem:[#allocation2 + $0x8] sm:$0xff] %vm1249_vm8, %v4893_v20 }
  0xa7   : > { %v741_v31 = vrot.slane %v740_v17, 4  ;;  %v563_v34 = vrot.slane %v561_v22, 5  ;;  %v4217_v45 = vrot.slane %v4938_v16, 9  ;;  %v3214_v48 = vrot.slane %v4192_v23, 5  ;;  %934 = vst.msk [vmem:[#allocation2 + $0x40] sm:$0xff] %vm925_vm7, %v894_v36 }
  0xa8   : > { %v548_v38 = vor.u32 %v547_v29, %v544_v28  ;;  %v751_v41 = vrot.slane %v750_v32, 4  ;;  %v558_v42 = vor.u32 %v557_v33, %v553_v30  ;;  %v3217_v49 = vrot.slane %v4942_v24, 5  ;;  %1259 = vst.msk [vmem:[#allocation2 + $0x48] sm:$0xff] %vm1249_vm8, %v4869_v44  ;;  %1258 = vst.msk [vmem:[#allocation2 + $0x40] sm:$0xff] %vm1249_vm8, %v4856_v13  ;;  %v435_v60 = vld [vmem:[%s4486_s19 + $0xa4] sm:$0x1] }
  0xa9   : > { %v746_v40 = vsel %vm4538_vm5, %v741_v31, %v4928_v63  ;;  %3299 = vrot.lane.b32.xlu0 %v4224_v61, %s4441_s27  ;;  %v4209_v50 = vrot.slane %v4167_v25, 9  ;;  %v3158_v21 = vrot.slane %v4168_v35, 5  ;;  %v3161_v54 = vrot.slane %v4169_v39, 5  ;;  %v409_v4 = vld [vmem:[%s4486_s19 + $0x3c] sm:$0xf]  ;;  %1440 = vst.msk [vmem:[#allocation2 + $0x48] sm:$0xff] %vm1430_vm9, %v4950_v37 }
  0xaa   : > { %v549_v47 = vrot.slane %v548_v38, 4  ;;  %v756_v52 = vsel %vm4538_vm5, %v751_v41, %v755_v27  ;;  %v559_v53 = vrot.slane %v558_v42, 4  ;;  %v1385_v56 = vpop.permute.xlu0 %1384  ;;  %v3215_v43 = vsel %vm4488_vm2, %v4217_v45, %v3214_v48  ;;  %v4995_v62 = vpop.permute.xlu1 %1943  ;;  %v410_v6 = vld [vmem:[%s4486_s19 + $0x40] sm:$0xf]  ;;  %v411_v12 = vld [vmem:[%s4486_s19 + $0x44] sm:$0x1] }
  0xab   : > { %v3818_v57 = vcombine.low %v746_v40, %v756_v52  ;;  %v3216_v20 = vrot.slane %v3214_v48, 4  ;;  %v3159_v44 = vsel %vm4488_vm2, %v4209_v50, %v3158_v21  ;;  %v3160_v13 = vrot.slane %v3158_v21, 4  ;;  %v978_v18 = vld [vmem:[%s4486_s19 + $0x90] sm:$0xe]  ;;  %v979_v19 = vld [vmem:[%s4486_s19 + $0x94] sm:$0xf] }
  0xac   : > { %v554_v58 = vsel %vm4538_vm5, %v549_v47, %v553_v30  ;;  %v564_v59 = vsel %vm4538_vm5, %v559_v53, %v563_v34  ;;  %v758_v61 = vshrl.u32 %v433_v51, 16  ;;  %v761_v2 = vshll.u32 %v433_v51, 16  ;;  %v980_v27 = vld [vmem:[%s4486_s19 + $0x98] sm:$0x1]  ;;  %v954_v32 = vld [vmem:[%s4486_s19 + $0x30] sm:$0xe] }
  0xad   : > { %901 = vrot.lane.b32.xlu1 %v3818_v57, %s4436_s22  ;;  %v3810_v63 = vcombine.low %v554_v58, %v564_v59  ;;  %v3218_v1 = vsel %vm4488_vm2, %v3216_v20, %v3217_v49  ;;  %v767_v3 = vshll.u32 %v434_v55, 16  ;;  %v3162_v8 = vsel %vm4488_vm2, %v3160_v13, %v3161_v54  ;;  %v955_v38 = vld [vmem:[%s4486_s19 + $0x34] sm:$0xf]  ;;  %v956_v47 = vld [vmem:[%s4486_s19 + $0x38] sm:$0x1]  ;;  %1431 = vst.msk [vmem:[#allocation2] sm:$0xff] %vm1430_vm9, %v4853_v11 }
  0xae   : > { %v4233_v7 = vcombine.low %v3215_v43, %v3218_v1  ;;  %v760_v9 = vrot.slane %v758_v61, 4  ;;  %v771_v10 = vshrl.u32 %v434_v55, 16  ;;  %v4225_v14 = vcombine.low %v3159_v44, %v3162_v8  ;;  %v5008_v22 = vpop.permute.xlu0 %1927  ;;  %v4402_v40 = vld [vmem:[%s4486_s19 + $0x90] sm:$0xff]   ;;  %1439 = vst.msk [vmem:[#allocation2 + $0x40] sm:$0xff] %vm1430_vm9, %v4834_v46  ;;  %1432 = vst.msk [vmem:[#allocation2 + $0x8] sm:$0xff] %vm1430_vm9, %v1385_v56 }
  0xaf   : > { %885 = vrot.lane.b32.xlu0 %v3810_v63, %s4436_s22  ;;  %v763_v15 = vrot.slane %v761_v2, 5  ;;  %v769_v16 = vrot.slane %v767_v3, 5  ;;  %v777_v17 = vshll.u32 %v435_v60, 16  ;;  %v566_v24 = vshrl.u32 %v409_v4, 16  ;;  %v981_v52 = vld [vmem:[%s4486_s19 + $0x9c] sm:$0xe] }
  0xb0   : > { %v773_v23 = vrot.slane %v771_v10, 4  ;;  %v569_v25 = vshll.u32 %v409_v4, 16  ;;  %v575_v26 = vshll.u32 %v410_v6, 16  ;;  %v579_v30 = vshrl.u32 %v410_v6, 16  ;;  %390 = vst.msk [vmem:[#allocation2 + $0x60] sm:$0xff] %vm377_vm6, %v4402_v40  ;;  %v4403_v53 = vld [vmem:[%s4486_s19 + $0x30] sm:$0xff]  }
  0xb1   : > { %3317 = vrot.lane.b32.xlu1 %v4233_v7, %s4441_s27  ;;  %v764_v28 = vor.u32 %v763_v15, %v760_v9  ;;  %v779_v29 = vrot.slane %v777_v17, 5  ;;  %v585_v31 = vshll.u32 %v411_v12, 16  ;;  %v568_v34 = vrot.slane %v566_v24, 4  ;;  %v982_v11 = vld [vmem:[%s4486_s19 + $0xa0] sm:$0xf]  ;;  %382 = vst.msk [vmem:[#allocation2 + $0x20] sm:$0xff] %vm377_vm6, %v4403_v53 }
  0xb2   : > { %v774_v33 = vor.u32 %v773_v23, %v769_v16  ;;  %v571_v35 = vrot.slane %v569_v25, 5  ;;  %v577_v36 = vrot.slane %v575_v26, 5  ;;  %v1946_v39 = vpop.permute.xlu1 %1945  ;;  %v581_v42 = vrot.slane %v579_v30, 4  ;;  %v5031_v57 = vld [vmem:[%s4486_s19 + $0xa4] sm:$0x1]  ;;  %1984 = vst.msk [vmem:[#allocation2 + $0x40] sm:$0xff] %vm1975_vm10, %v4995_v62 }
  0xb3   : > { %3301 = vrot.lane.b32.xlu0 %v4225_v14, %s4441_s27  ;;  %v765_v41 = vrot.slane %v764_v28, 4  ;;  %v587_v45 = vrot.slane %v585_v31, 5  ;;  %v3834_v50 = vrot.slane %v978_v18, 9  ;;  %v1127_v51 = vrot.slane %v979_v19, 5  ;;  %v957_v46 = vld [vmem:[%s4486_s19 + $0x3c] sm:$0xe] }
  0xb4   : > { %v775_v48 = vrot.slane %v774_v33, 4  ;;  %v572_v49 = vor.u32 %v571_v35, %v568_v34  ;;  %v582_v37 = vor.u32 %v581_v42, %v577_v36  ;;  %v1130_v54 = vrot.slane %v980_v27, 5  ;;  %v958_v44 = vld [vmem:[%s4486_s19 + $0x40] sm:$0xf]  ;;  %v959_v13 = vld [vmem:[%s4486_s19 + $0x44] sm:$0x1] }
  0xb5   : > { %v770_v21 = vsel %vm4538_vm5, %v765_v41, %v769_v16  ;;  %v3826_v55 = vrot.slane %v954_v32, 9  ;;  %v1128_v20 = vsel %vm4488_vm2, %v3834_v50, %v1127_v51  ;;  %v1129_v59 = vrot.slane %v1127_v51, 4  ;;  %v3938_v3 = vld [vmem:[%s4486_s19 + $0x9c] sm:$0xf]  ;;  %v3939_v8 = vld [vmem:[%s4486_s19 + $0xa0] sm:$0xf] }
  0xb6   : > { %v1930_v56 = vpop.permute.xlu0 %1929  ;;  %v780_v58 = vsel %vm4538_vm5, %v775_v48, %v779_v29  ;;  %v573_v43 = vrot.slane %v572_v49, 4  ;;  %v2265_v60 = vpop.permute.xlu1 %2264  ;;  %v583_v63 = vrot.slane %v582_v37, 4  ;;  %v1071_v1 = vrot.slane %v955_v38, 5  ;;  %1976 = vst.msk [vmem:[#allocation2] sm:$0xff] %vm1975_vm10, %v5008_v22  ;;  %1985 = vst.msk [vmem:[#allocation2 + $0x48] sm:$0xff] %vm1975_vm10, %v1946_v39  ;;  %v4404_v17 = vld [vmem:[%s4486_s19 + $0x9c] sm:$0xff]  }
  0xb7   : > { %v3819_v61 = vcombine.low %v770_v21, %v780_v58  ;;  %v1074_v2 = vrot.slane %v956_v47, 5  ;;  %v1131_v6 = vsel %vm4488_vm2, %v1129_v59, %v1130_v54  ;;  %v3835_v7 = vrot.slane %v981_v52, 9  ;;  %1977 = vst.msk [vmem:[#allocation2 + $0x8] sm:$0xff] %vm1975_vm10, %v1930_v56  ;;  %v3940_v16 = vld [vmem:[%s4486_s19 + $0xa4] sm:$0x1]  ;;  %v4405_v26 = vld [vmem:[%s4486_s19 + $0x3c] sm:$0xff]  }
  0xb8   : > { %v578_v4 = vsel %vm4538_vm5, %v573_v43, %v577_v36  ;;  %v588_v9 = vsel %vm4538_vm5, %v583_v63, %v587_v45  ;;  %v3850_v10 = vcombine.low %v1128_v20, %v1131_v6  ;;  %v1072_v12 = vsel %vm4488_vm2, %v3826_v55, %v1071_v1  ;;  %v3914_v28 = vld [vmem:[%s4486_s19 + $0x3c] sm:$0xf]  ;;  %391 = vst.msk [vmem:[#allocation2 + $0x68] sm:$0xff] %vm377_vm6, %v4404_v17  ;;  %v3915_v33 = vld [vmem:[%s4486_s19 + $0x40] sm:$0xf] }
  0xb9   : > { %903 = vrot.lane.b32.xlu1 %v3819_v61, %s4436_s22  ;;  %v1073_v14 = vrot.slane %v1071_v1, 4  ;;  %v3811_v18 = vcombine.low %v578_v4, %v588_v9  ;;  %v1134_v19 = vrot.slane %v982_v11, 5  ;;  %v1137_v23 = vrot.slane %v5031_v57, 5  ;;  %2305 = vst.msk [vmem:[#allocation2 + $0x40] sm:$0xff] %vm2296_vm11, %v2265_v60  ;;  %v3916_v52 = vld [vmem:[%s4486_s19 + $0x44] sm:$0x1] }
  0xba   : > { %v2249_v15 = vpop.permute.xlu0 %2248  ;;  %v3827_v24 = vrot.slane %v957_v46, 9  ;;  %v2267_v25 = vpop.permute.xlu1 %2266  ;;  %v1078_v22 = vrot.slane %v958_v44, 5  ;;  %v1081_v27 = vrot.slane %v959_v13, 5  ;;  %v1784_v32 = vshrl.u32 %v3938_v3, 16  ;;  %383 = vst.msk [vmem:[#allocation2 + $0x28] sm:$0xff] %vm377_vm6, %v4405_v26  ;;  %v4379_v55 = vld [vmem:[%s4486_s19 + $0x9c] sm:$0xff]  }
  0xbb   : > { %v1075_v62 = vsel %vm4488_vm2, %v1073_v14, %v1074_v2  ;;  %887 = vrot.lane.b32.xlu0 %v3811_v18, %s4436_s22  ;;  %v1135_v30 = vsel %vm4488_vm2, %v3835_v7, %v1134_v19  ;;  %v1136_v31 = vrot.slane %v1134_v19, 4  ;;  %2297 = vst.msk [vmem:[#allocation2] sm:$0xff] %vm2296_vm11, %v2249_v15  ;;  %2306 = vst.msk [vmem:[#allocation2 + $0x48] sm:$0xff] %vm2296_vm11, %v2267_v25  ;;  %v1787_v38 = vshll.u32 %v3938_v3, 16  ;;  %v3941_v43 = vld [vmem:[%s4486_s19 + $0xa8] sm:$0xf] }
  0xbc   : > { %v3842_v29 = vcombine.low %v1072_v12, %v1075_v62  ;;  %v1079_v34 = vsel %vm4488_vm2, %v3827_v24, %v1078_v22  ;;  %v1080_v35 = vrot.slane %v1078_v22, 4  ;;  %v1793_v39 = vshll.u32 %v3939_v8, 16  ;;  %v3942_v13 = vld [vmem:[%s4486_s19 + $0xac] sm:$0xf]  ;;  %v4380_v3 = vld [vmem:[%s4486_s19 + $0x3c] sm:$0xff]  }
  0xbd   : > { %1225 = vrot.lane.b32.xlu1 %v3850_v10, %s4435_s21  ;;  %v1138_v40 = vsel %vm4488_vm2, %v1136_v31, %v1137_v23  ;;  %v1786_v41 = vrot.slane %v1784_v32, 4  ;;  %v1797_v42 = vshrl.u32 %v3939_v8, 16  ;;  %v1803_v45 = vshll.u32 %v3940_v16, 16  ;;  %v4381_v9 = vld [vmem:[%s4486_s19 + $0xa8] sm:$0xff]   ;;  %v3943_v15 = vld [vmem:[%s4486_s19 + $0xb0] sm:$0x1] }
  0xbe   : > { %v2251_v36 = vpop.permute.xlu0 %2250  ;;  %v2446_v47 = vpop.permute.xlu1 %2445  ;;  %v3851_v48 = vcombine.low %v1135_v30, %v1138_v40  ;;  %v1082_v49 = vsel %vm4488_vm2, %v1080_v35, %v1081_v27  ;;  %v1789_v50 = vrot.slane %v1787_v38, 5  ;;  %v1795_v51 = vrot.slane %v1793_v39, 5  ;;  %v3917_v17 = vld [vmem:[%s4486_s19 + $0x48] sm:$0xf]  ;;  %v3918_v26 = vld [vmem:[%s4486_s19 + $0x4c] sm:$0xf] }
  0xbf   : > { %2298 = vst.msk [vmem:[#allocation2 + $0x8] sm:$0xff] %vm2296_vm11, %v2251_v36  ;;  %1209 = vrot.lane.b32.xlu0 %v3842_v29, %s4435_s21  ;;  %v3843_v53 = vcombine.low %v1079_v34, %v1082_v49  ;;  %v1799_v21 = vrot.slane %v1797_v42, 4  ;;  %v1805_v37 = vrot.slane %v1803_v45, 5  ;;  %v1592_v54 = vshrl.u32 %v3914_v28, 16  ;;  %v3919_v30 = vld [vmem:[%s4486_s19 + $0x50] sm:$0x1] }
  0xc0   : > { %v1790_v11 = vor.u32 %v1789_v50, %v1786_v41  ;;  %v1595_v57 = vshll.u32 %v3914_v28, 16  ;;  %v1601_v46 = vshll.u32 %v3915_v33, 16  ;;  %v1605_v56 = vshrl.u32 %v3915_v33, 16  ;;  %2486 = vst.msk [vmem:[#allocation2 + $0x40] sm:$0xff] %vm2477_vm12, %v2446_v47  ;;  %v4002_v31 = vld [vmem:[%s4486_s19 + $0x9c] sm:$0xe] }
  0xc1   : > { %1227 = vrot.lane.b32.xlu1 %v3851_v48, %s4435_s21  ;;  %v1800_v20 = vor.u32 %v1799_v21, %v1795_v51  ;;  %v1594_v59 = vrot.slane %v1592_v54, 4  ;;  %v1611_v44 = vshll.u32 %v3916_v52, 16  ;;  %v1808_v7 = vshrl.u32 %v3941_v43, 16  ;;  %v4382_v32 = vld [vmem:[%s4486_s19 + $0x48] sm:$0xff]   ;;  %v4003_v38 = vld [vmem:[%s4486_s19 + $0xa0] sm:$0xf] }
  0xc2   : > { %v2430_v58 = vpop.permute.xlu0 %2429  ;;  %v2448_v60 = vpop.permute.xlu1 %2447  ;;  %v1791_v61 = vrot.slane %v1790_v11, 4  ;;  %v1597_v63 = vrot.slane %v1595_v57, 5  ;;  %v1603_v1 = vrot.slane %v1601_v46, 5  ;;  %v1607_v2 = vrot.slane %v1605_v56, 4  ;;  %v4004_v39 = vld [vmem:[%s4486_s19 + $0xa4] sm:$0x1] }
  0xc3   : > { %2478 = vst.msk [vmem:[#allocation2] sm:$0xff] %vm2477_vm12, %v2430_v58  ;;  %2487 = vst.msk [vmem:[#allocation2 + $0x48] sm:$0xff] %vm2477_vm12, %v2448_v60  ;;  %1211 = vrot.lane.b32.xlu0 %v3843_v53, %s4435_s21  ;;  %v1801_v4 = vrot.slane %v1800_v20, 4  ;;  %v1613_v6 = vrot.slane %v1611_v44, 5  ;;  %v1811_v8 = vshll.u32 %v3941_v43, 16  ;;  %v1817_v16 = vshll.u32 %v3942_v13, 16 }
  0xc4   : > { %v1796_v10 = vsel %vm4538_vm5, %v1791_v61, %v1795_v51  ;;  %v1598_v12 = vor.u32 %v1597_v63, %v1594_v59  ;;  %v1608_v14 = vor.u32 %v1607_v2, %v1603_v1  ;;  %v1810_v23 = vrot.slane %v1808_v7, 4  ;;  %v3978_v47 = vld [vmem:[%s4486_s19 + $0x3c] sm:$0xe]  ;;  %v3979_v48 = vld [vmem:[%s4486_s19 + $0x40] sm:$0xf] }
  0xc5   : > { %1406 = vrot.lane.b32.xlu1 %v4379_v55, %s4434_s20  ;;  %v1806_v19 = vsel %vm4538_vm5, %v1801_v4, %v1805_v37  ;;  %v1813_v24 = vrot.slane %v1811_v8, 5  ;;  %v1821_v25 = vshrl.u32 %v3942_v13, 16  ;;  %v1819_v29 = vrot.slane %v1817_v16, 5  ;;  %v3980_v13 = vld [vmem:[%s4486_s19 + $0x44] sm:$0x1] }
  0xc6   : > { %v2432_v18 = vpop.permute.xlu0 %2431  ;;  %v5103_v62 = vpop.permute.xlu1 %2990  ;;  %v3962_v22 = vcombine.low %v1796_v10, %v1806_v19  ;;  %v1599_v27 = vrot.slane %v1598_v12, 4  ;;  %v1609_v28 = vrot.slane %v1608_v14, 4  ;;  %v1827_v35 = vshll.u32 %v3943_v15, 16  ;;  %v4005_v2 = vld [vmem:[%s4486_s19 + $0xa8] sm:$0xe] }
  0xc7   : > { %2479 = vst.msk [vmem:[#allocation2 + $0x8] sm:$0xff] %vm2477_vm12, %v2432_v18  ;;  %1390 = vrot.lane.b32.xlu0 %v4380_v3, %s4434_s20  ;;  %v1814_v33 = vor.u32 %v1813_v24, %v1810_v23  ;;  %v1823_v34 = vrot.slane %v1821_v25, 4  ;;  %v1616_v36 = vshrl.u32 %v3917_v17, 16  ;;  %v1619_v42 = vshll.u32 %v3917_v17, 16  ;;  %v4006_v8 = vld [vmem:[%s4486_s19 + $0xac] sm:$0xf] }
  0xc8   : > { %v1604_v40 = vsel %vm4538_vm5, %v1599_v27, %v1603_v1  ;;  %v1614_v41 = vsel %vm4538_vm5, %v1609_v28, %v1613_v6  ;;  %v1625_v45 = vshll.u32 %v3918_v26, 16  ;;  %v1829_v53 = vrot.slane %v1827_v35, 5  ;;  %v3981_v17 = vld [vmem:[%s4486_s19 + $0x48] sm:$0xe]  ;;  %v3982_v25 = vld [vmem:[%s4486_s19 + $0x4c] sm:$0xf] }
  0xc9   : > { %1408 = vrot.lane.b32.xlu1 %v4381_v9, %s4434_s20  ;;  %v3954_v50 = vcombine.low %v1604_v40, %v1614_v41  ;;  %v1815_v51 = vrot.slane %v1814_v33, 4  ;;  %v1824_v52 = vor.u32 %v1823_v34, %v1819_v29  ;;  %v1618_v37 = vrot.slane %v1616_v36, 4  ;;  %v4007_v9 = vld [vmem:[%s4486_s19 + $0xb0] sm:$0x1]  ;;  %3031 = vst.msk [vmem:[#allocation2 + $0x40] sm:$0xff] %vm3022_vm13, %v5103_v62 }
  0xca   : > { %v2975_v49 = vpop.permute.xlu0 %2974  ;;  %v1621_v54 = vrot.slane %v1619_v42, 5  ;;  %v1627_v55 = vrot.slane %v1625_v45, 5  ;;  %v1629_v11 = vshrl.u32 %v3918_v26, 16  ;;  %v1635_v56 = vshll.u32 %v3919_v30, 16  ;;  %v4130_v30 = vld [vmem:[%s4486_s19 + $0xa8] sm:$0xf] }
  0xcb   : > { %v2993_v21 = vpop.permute.xlu1 %2992  ;;  %1392 = vrot.lane.b32.xlu0 %v4382_v32, %s4434_s20  ;;  %v1820_v57 = vsel %vm4538_vm5, %v1815_v51, %v1819_v29  ;;  %v1825_v46 = vrot.slane %v1824_v52, 4  ;;  %v4026_v58 = vrot.slane %v4002_v31, 9  ;;  %v2174_v59 = vrot.slane %v4003_v38, 5  ;;  %3023 = vst.msk [vmem:[#allocation2] sm:$0xff] %vm3022_vm13, %v2975_v49  ;;  %v3983_v29 = vld [vmem:[%s4486_s19 + $0x50] sm:$0x1] }
  0xcc   : > { %v1622_v43 = vor.u32 %v1621_v54, %v1618_v37  ;;  %v1631_v20 = vrot.slane %v1629_v11, 4  ;;  %v2177_v44 = vrot.slane %v4004_v39, 5  ;;  %v1637_v61 = vrot.slane %v1635_v56, 5  ;;  %3032 = vst.msk [vmem:[#allocation2 + $0x48] sm:$0xff] %vm3022_vm13, %v2993_v21  ;;  %v4131_v35 = vld [vmem:[%s4486_s19 + $0xac] sm:$0xf] }
  0xcd   : > { %1951 = vrot.lane.b32.xlu1 %v3962_v22, %s4437_s23  ;;  %v1830_v60 = vsel %vm4538_vm5, %v1825_v46, %v1829_v53  ;;  %v4018_v63 = vrot.slane %v3978_v47, 9  ;;  %v2118_v1 = vrot.slane %v3979_v48, 5  ;;  %v2175_v7 = vsel %vm4488_vm2, %v4026_v58, %v2174_v59  ;;  %v4132_v41 = vld [vmem:[%s4486_s19 + $0xb0] sm:$0x1]  ;;  %v4106_v48 = vld [vmem:[%s4486_s19 + $0x48] sm:$0xf] }
  0xce   : > { %v3963_v3 = vcombine.low %v1820_v57, %v1830_v60  ;;  %v1623_v4 = vrot.slane %v1622_v43, 4  ;;  %v1632_v6 = vor.u32 %v1631_v20, %v1627_v55  ;;  %v2176_v12 = vrot.slane %v2174_v59, 4  ;;  %v4107_v11 = vld [vmem:[%s4486_s19 + $0x4c] sm:$0xf]  ;;  %v4108_v58 = vld [vmem:[%s4486_s19 + $0x50] sm:$0x1] }
  0xcf   : > { %v2977_v10 = vpop.permute.xlu0 %2976  ;;  %1935 = vrot.lane.b32.xlu0 %v3954_v50, %s4437_s23  ;;  %v5133_v14 = vsel %vm4488_vm2, %v4018_v63, %v2118_v1  ;;  %v2120_v15 = vrot.slane %v2118_v1, 4  ;;  %v2121_v16 = vrot.slane %v3980_v13, 5  ;;  %v3312_v18 = vpop.permute.xlu1 %3311  ;;  %v4027_v24 = vrot.slane %v4005_v2, 9  ;;  %v4383_v59 = vld [vmem:[%s4486_s19 + $0xa8] sm:$0xff]   ;;  %v4133_v63 = vld [vmem:[%s4486_s19 + $0xb4] sm:$0xf] }
  0xd0   : > { %v1628_v19 = vsel %vm4538_vm5, %v1623_v4, %v1627_v55  ;;  %v1633_v23 = vrot.slane %v1632_v6, 4  ;;  %v2178_v26 = vsel %vm4488_vm2, %v2176_v12, %v2177_v44  ;;  %v2181_v27 = vrot.slane %v4006_v8, 5  ;;  %3024 = vst.msk [vmem:[#allocation2 + $0x8] sm:$0xff] %vm3022_vm13, %v2977_v10  ;;  %v4134_v12 = vld [vmem:[%s4486_s19 + $0xb8] sm:$0xf] }
  0xd1   : > { %1953 = vrot.lane.b32.xlu1 %v3963_v3, %s4437_s23  ;;  %v2122_v22 = vsel %vm4488_vm2, %v2120_v15, %v2121_v16  ;;  %v2184_v28 = vrot.slane %v4007_v9, 5  ;;  %v4042_v32 = vcombine.low %v2175_v7, %v2178_v26  ;;  %v4019_v34 = vrot.slane %v3981_v17, 9  ;;  %3352 = vst.msk [vmem:[#allocation2 + $0x40] sm:$0xff] %vm3343_vm14, %v3312_v18  ;;  %v4135_v16 = vld [vmem:[%s4486_s19 + $0xbc] sm:$0x1]  ;;  %v4385_v18 = vld [vmem:[%s4486_s19 + $0xb4] sm:$0xff]  }
  0xd2   : > { %v1638_v31 = vsel %vm4538_vm5, %v1633_v23, %v1637_v61  ;;  %v4034_v33 = vcombine.low %v5133_v14, %v2122_v22  ;;  %v2182_v38 = vsel %vm4488_vm2, %v4027_v24, %v2181_v27  ;;  %v2183_v39 = vrot.slane %v2181_v27, 4 }
  0xd3   : > { %v3296_v62 = vpop.permute.xlu0 %3295  ;;  %v3955_v36 = vcombine.low %v1628_v19, %v1638_v31  ;;  %v2125_v40 = vrot.slane %v3982_v25, 5  ;;  %v2128_v42 = vrot.slane %v3983_v29, 5  ;;  %v2831_v45 = vshrl.u32 %v4130_v30, 16 }
  0xd4   : > { %v2834_v47 = vshll.u32 %v4130_v30, 16  ;;  %v2185_v49 = vsel %vm4488_vm2, %v2183_v39, %v2184_v28  ;;  %3344 = vst.msk [vmem:[#allocation2] sm:$0xff] %vm3343_vm14, %v3296_v62  ;;  %v2840_v53 = vshll.u32 %v4131_v35, 16  ;;  %v2844_v55 = vshrl.u32 %v4131_v35, 16  ;;  %v4384_v28 = vld [vmem:[%s4486_s19 + $0x48] sm:$0xff]  }
  0xd5   : > { %2272 = vrot.lane.b32.xlu1 %v4042_v32, %s4438_s24  ;;  %1937 = vrot.lane.b32.xlu0 %v3955_v36, %s4437_s23  ;;  %v2126_v50 = vsel %vm4488_vm2, %v4019_v34, %v2125_v40  ;;  %v2127_v51 = vrot.slane %v2125_v40, 4  ;;  %v4043_v21 = vcombine.low %v2182_v38, %v2185_v49  ;;  %v2833_v37 = vrot.slane %v2831_v45, 4  ;;  %v4110_v38 = vld [vmem:[%s4486_s19 + $0x58] sm:$0xf]  ;;  %v4111_v45 = vld [vmem:[%s4486_s19 + $0x5c] sm:$0x1] }
  0xd6   : > { %v898_v52 = vpop.permute.xlu1 %897  ;;  %v2836_v54 = vrot.slane %v2834_v47, 5  ;;  %v2842_v46 = vrot.slane %v2840_v53, 5  ;;  %v2850_v56 = vshll.u32 %v4132_v41, 16  ;;  %v2639_v43 = vshrl.u32 %v4106_v48, 16 }
  0xd7   : > { %936 = vst.msk [vmem:[#allocation2 + $0x50] sm:$0xff] %vm925_vm7, %v898_v52  ;;  %v2129_v57 = vsel %vm4488_vm2, %v2127_v51, %v2128_v42  ;;  %v2846_v60 = vrot.slane %v2844_v55, 4  ;;  %v2642_v61 = vshll.u32 %v4106_v48, 16  ;;  %v2648_v3 = vshll.u32 %v4107_v11, 16  ;;  %v4386_v52 = vld [vmem:[%s4486_s19 + $0x54] sm:$0xff]  }
  0xd8   : > { %v4035_v20 = vcombine.low %v2126_v50, %v2129_v57  ;;  %v2837_v13 = vor.u32 %v2836_v54, %v2833_v37  ;;  %v2852_v1 = vrot.slane %v2850_v56, 5  ;;  %v2641_v2 = vrot.slane %v2639_v43, 4  ;;  %v3368_v27 = vld [vmem:[#allocation2 + $0x40] sm:$0xff]  ;;  %v4393_v51 = vld [vmem:[%s5670_s1 + $0x10] ss:$0 sps:$4 sm:$0x33]  }
  0xd9   : > { %2274 = vrot.lane.b32.xlu1 %v4043_v21, %s4438_s24  ;;  %2256 = vrot.lane.b32.xlu0 %v4034_v33, %s4438_s24  ;;  %v2652_v4 = vshrl.u32 %v4107_v11, 16  ;;  %v2847_v8 = vor.u32 %v2846_v60, %v2842_v46  ;;  %v2644_v9 = vrot.slane %v2642_v61, 5  ;;  %v2658_v10 = vshll.u32 %v4108_v58, 16  ;;  %v4109_v33 = vld [vmem:[%s4486_s19 + $0x54] sm:$0xf] }
  0xda   : > { %v882_v44 = vpop.permute.xlu0 %881  ;;  %v3314_v6 = vpop.permute.xlu1 %3313  ;;  %v2838_v7 = vrot.slane %v2837_v13, 4  ;;  %v2650_v14 = vrot.slane %v2648_v3, 5  ;;  %v2855_v17 = vshrl.u32 %v4133_v63, 16  ;;  %v2858_v31 = vshll.u32 %v4133_v63, 16  ;;  %4302 = vmatprep.mubr.msk.bf16.mxu1 %vm3403_vm15, %v3368_v27  ;;  %v4194_v55 = vld [vmem:[%s4486_s19 + $0xa8] sm:$0xe]  ;;  %4324 = vmatprep.subr.msk.bf16.mxu0 %vm3452_vm0, %v4393_v51 }
  0xdb   : > { %928 = vst.msk [vmem:[#allocation2 + $0x10] sm:$0xff] %vm925_vm7, %v882_v44  ;;  %v2654_v15 = vrot.slane %v2652_v4, 4  ;;  %v2848_v23 = vrot.slane %v2847_v8, 4  ;;  %v2645_v24 = vor.u32 %v2644_v9, %v2641_v2  ;;  %v2660_v25 = vrot.slane %v2658_v10, 5  ;;  %v3360_v22 = vld [vmem:[#allocation2] sm:$0xff]  ;;  %4325 = vmatprep.subr.msk.bf16.mxu1 %vm3452_vm0, %v4393_v51 }
  0xdc   : > { %3353 = vst.msk [vmem:[#allocation2 + $0x48] sm:$0xff] %vm3343_vm14, %v3314_v6  ;;  %v2843_v19 = vsel %vm4538_vm5, %v2838_v7, %v2842_v46  ;;  %4286 = vmatprep.mubr.msk.bf16.mxu0 %vm3403_vm15, %v3360_v22  ;;  %v2857_v30 = vrot.slane %v2855_v17, 4  ;;  %v2864_v32 = vshll.u32 %v4134_v12, 16  ;;  %v2868_v35 = vshrl.u32 %v4134_v12, 16  ;;  %v4195_v43 = vld [vmem:[%s4486_s19 + $0xac] sm:$0xf] }
  0xdd   : > { %2453 = vrot.lane.b32.xlu1 %v4383_v59, %s4439_s25  ;;  %2258 = vrot.lane.b32.xlu0 %v4035_v20, %s4438_s24  ;;  %v2655_v29 = vor.u32 %v2654_v15, %v2650_v14  ;;  %v2853_v34 = vsel %vm4538_vm5, %v2848_v23, %v2852_v1  ;;  %v2646_v62 = vrot.slane %v2645_v24, 4  ;;  %v2874_v36 = vshll.u32 %v4135_v16, 16  ;;  %v4196_v20 = vld [vmem:[%s4486_s19 + $0xb0] sm:$0x1]  ;;  %v4170_v61 = vld [vmem:[%s4486_s19 + $0x48] sm:$0xe] }
  0xde   : > { %v3298_v26 = vpop.permute.xlu0 %3297  ;;  %v4154_v39 = vcombine.low %v2843_v19, %v2853_v34  ;;  %v2860_v41 = vrot.slane %v2858_v31, 5  ;;  %v2866_v42 = vrot.slane %v2864_v32, 5  ;;  %v2870_v48 = vrot.slane %v2868_v35, 4  ;;  %v4171_v4 = vld [vmem:[%s4486_s19 + $0x4c] sm:$0xf] }
  0xdf   : > { %3345 = vst.msk [vmem:[#allocation2 + $0x8] sm:$0xff] %vm3343_vm14, %v3298_v26  ;;  %v2656_v40 = vrot.slane %v2655_v29, 4  ;;  %v2651_v47 = vsel %vm4538_vm5, %v2646_v62, %v2650_v14  ;;  %v2876_v49 = vrot.slane %v2874_v36, 5  ;;  %v2663_v50 = vshrl.u32 %v4109_v33, 16  ;;  %v4172_v10 = vld [vmem:[%s4486_s19 + $0x50] sm:$0x1] }
  0xe0   : > { %v2861_v21 = vor.u32 %v2860_v41, %v2857_v30  ;;  %v2666_v37 = vshll.u32 %v4109_v33, 16  ;;  %v2672_v54 = vshll.u32 %v4110_v38, 16  ;;  %v2871_v57 = vor.u32 %v2870_v48, %v2866_v42  ;;  %v437_v19 = vld [vmem:[%s4486_s19 + $0xac] sm:$0xf]  ;;  %v438_v33 = vld [vmem:[%s4486_s19 + $0xb0] sm:$0x1] }
  0xe1   : > { %2455 = vrot.lane.b32.xlu1 %v4385_v18, %s4439_s25  ;;  %2437 = vrot.lane.b32.xlu0 %v4384_v28, %s4439_s25  ;;  %v2661_v53 = vsel %vm4538_vm5, %v2656_v40, %v2660_v25  ;;  %v2665_v46 = vrot.slane %v2663_v50, 4  ;;  %v2676_v56 = vshrl.u32 %v4110_v38, 16  ;;  %v2682_v60 = vshll.u32 %v4111_v45, 16  ;;  %v436_v18 = vld [vmem:[%s4486_s19 + $0xa8] sm:$0xf] }
  0xe2   : > { %v4146_v11 = vcombine.low %v2651_v47, %v2661_v53  ;;  %v2862_v59 = vrot.slane %v2861_v21, 4  ;;  %v2668_v44 = vrot.slane %v2666_v37, 5  ;;  %v2674_v13 = vrot.slane %v2672_v54, 5  ;;  %v412_v34 = vld [vmem:[%s4486_s19 + $0x48] sm:$0xf] }
  0xe3   : > { %v2872_v63 = vrot.slane %v2871_v57, 4  ;;  %v2678_v1 = vrot.slane %v2676_v56, 4  ;;  %v4218_v3 = vrot.slane %v4194_v55, 9  ;;  %v2684_v8 = vrot.slane %v2682_v60, 5  ;;  %v3369_v27 = vld [vmem:[#allocation2 + $0x48] sm:$0xff] }
  0xe4   : > { %v900_v58 = vpop.permute.xlu1 %899  ;;  %v2867_v6 = vsel %vm4538_vm5, %v2862_v59, %v2866_v42  ;;  %v2669_v7 = vor.u32 %v2668_v44, %v2665_v46  ;;  %v3454_v9 = vsel %vm3452_vm0, %v4393_v51, 0  ;;  %v3221_v15 = vrot.slane %v4195_v43, 5  ;;  %v413_v62 = vld [vmem:[%s4486_s19 + $0x4c] sm:$0xf]  ;;  %v414_v40 = vld [vmem:[%s4486_s19 + $0x50] sm:$0x1] }
  0xe5   : > { %937 = vst.msk [vmem:[#allocation2 + $0x58] sm:$0xff] %vm925_vm7, %v900_v58  ;;  %2998 = vrot.lane.b32.xlu1 %v4154_v39, %s4440_s26  ;;  %v884_v2 = vpop.permute.xlu0 %883  ;;  %2439 = vrot.lane.b32.xlu0 %v4386_v52, %s4439_s25  ;;  %v2877_v12 = vsel %vm4538_vm5, %v2872_v63, %v2876_v49  ;;  %v2679_v14 = vor.u32 %v2678_v1, %v2674_v13  ;;  %v3224_v16 = vrot.slane %v4196_v20, 5  ;;  %v4210_v25 = vrot.slane %v4170_v61, 9  ;;  %v4406_v53 = vld [vmem:[%s4486_s19 + $0xa8] sm:$0xff]   ;;  %v4197_v57 = vld [vmem:[%s4486_s19 + $0xb4] sm:$0xe] }
  0xe6   : > { %929 = vst.msk [vmem:[#allocation2 + $0x18] sm:$0xff] %vm925_vm7, %v884_v2  ;;  %4285 = vmatpush3.bf16.msra.mxu0 %v3454_v9  ;;  %v4155_v23 = vcombine.low %v2867_v6, %v2877_v12  ;;  %v2670_v24 = vrot.slane %v2669_v7, 4  ;;  %4323 = vmatpush3.bf16.msra.mxu1 %v3454_v9  ;;  %v3165_v26 = vrot.slane %v4171_v4, 5  ;;  %v3361_v22 = vld [vmem:[#allocation2 + $0x8] sm:$0xff]  ;;  %v3222_v29 = vsel %vm4488_vm2, %v4218_v3, %v3221_v15  ;;  %v4198_v46 = vld [vmem:[%s4486_s19 + $0xb8] sm:$0xf] }
  0xe7   : > { %v2680_v28 = vrot.slane %v2679_v14, 4  ;;  %v3223_v30 = vrot.slane %v3221_v15, 4  ;;  %v3168_v31 = vrot.slane %v4172_v10, 5  ;;  %v782_v39 = vshrl.u32 %v436_v18, 16  ;;  %v4407_v56 = vld [vmem:[%s4486_s19 + $0x48] sm:$0xff]   ;;  %392 = vst.msk [vmem:[#allocation2 + $0x70] sm:$0xff] %vm377_vm6, %v4406_v53 }
  0xe8   : > { %v1222_v17 = vpop.permute.xlu1 %1221  ;;  %v2675_v35 = vsel %vm4538_vm5, %v2670_v24, %v2674_v13  ;;  %v3166_v36 = vsel %vm4488_vm2, %v4210_v25, %v3165_v26  ;;  %v3167_v38 = vrot.slane %v3165_v26, 4  ;;  %v785_v45 = vshll.u32 %v436_v18, 16  ;;  %v4199_v44 = vld [vmem:[%s4486_s19 + $0xbc] sm:$0x1]  ;;  %v4173_v1 = vld [vmem:[%s4486_s19 + $0x54] sm:$0xe] }
  0xe9   : > { %1260 = vst.msk [vmem:[#allocation2 + $0x50] sm:$0xff] %vm1249_vm8, %v1222_v17  ;;  %v1206_v32 = vpop.permute.xlu0 %1205  ;;  %2982 = vrot.lane.b32.xlu0 %v4146_v11, %s4440_s26  ;;  %3000 = vrot.lane.b32.xlu1 %v4155_v23, %s4440_s26  ;;  %v2685_v41 = vsel %vm4538_vm5, %v2680_v28, %v2684_v8  ;;  %v3225_v42 = vsel %vm4488_vm2, %v3223_v30, %v3224_v16  ;;  %v791_v47 = vshll.u32 %v437_v19, 16  ;;  %v784_v52 = vrot.slane %v782_v39, 4  ;;  %v4174_v8 = vld [vmem:[%s4486_s19 + $0x58] sm:$0xf] }
  0xea   : > { %1252 = vst.msk [vmem:[#allocation2 + $0x10] sm:$0xff] %vm1249_vm8, %v1206_v32  ;;  %4287 = vmatmul.mubr.msk.bf16.vlgmr.msra.gmra.mrb[0].mxu0 %vm3403_vm15, %v3361_v22  ;;  %4303 = vmatmul.mubr.msk.bf16.vlgmr.msra.gmra.mrb[0].mxu1 %vm3403_vm15, %v3369_v27  ;;  %v4147_v49 = vcombine.low %v2675_v35, %v2685_v41  ;;  %v4234_v50 = vcombine.low %v3222_v29, %v3225_v42  ;;  %v787_v37 = vrot.slane %v785_v45, 5  ;;  %v795_v55 = vshrl.u32 %v437_v19, 16  ;;  %v4175_v15 = vld [vmem:[%s4486_s19 + $0x5c] sm:$0x1]  ;;  %v4408_v39 = vld [vmem:[%s4486_s19 + $0xb4] sm:$0xff]  }
  0xeb   : > { %v3169_v51 = vsel %vm4488_vm2, %v3167_v38, %v3168_v31  ;;  %v793_v54 = vrot.slane %v791_v47, 5  ;;  %v801_v58 = vshll.u32 %v438_v33, 16  ;;  %v590_v43 = vshrl.u32 %v412_v34, 16  ;;  %384 = vst.msk [vmem:[#allocation2 + $0x30] sm:$0xff] %vm377_vm6, %v4407_v56  ;;  %v439_v24 = vld [vmem:[%s4486_s19 + $0xb4] sm:$0xf] }
  0xec   : > { %v1224_v48 = vpop.permute.xlu1 %1223  ;;  %v4226_v21 = vcombine.low %v3166_v36, %v3169_v51  ;;  %v593_v20 = vshll.u32 %v412_v34, 16  ;;  %v599_v59 = vshll.u32 %v413_v62, 16  ;;  %v788_v13 = vor.u32 %v787_v37, %v784_v52  ;;  %v440_v35 = vld [vmem:[%s4486_s19 + $0xb8] sm:$0xf]  ;;  %v441_v47 = vld [vmem:[%s4486_s19 + $0xbc] sm:$0x1] }
  0xed   : > { %1261 = vst.msk [vmem:[#allocation2 + $0x58] sm:$0xff] %vm1249_vm8, %v1224_v48  ;;  %v1208_v11 = vpop.permute.xlu0 %1207  ;;  %2984 = vrot.lane.b32.xlu0 %v4147_v49, %s4440_s26  ;;  %3319 = vrot.lane.b32.xlu1 %v4234_v50, %s4441_s27  ;;  %v797_v60 = vrot.slane %v795_v55, 4  ;;  %v603_v61 = vshrl.u32 %v413_v62, 16  ;;  %v609_v63 = vshll.u32 %v414_v40, 16  ;;  %v803_v3 = vrot.slane %v801_v58, 5 }
  0xee   : > { %1253 = vst.msk [vmem:[#allocation2 + $0x18] sm:$0xff] %vm1249_vm8, %v1208_v11  ;;  %v592_v4 = vrot.slane %v590_v43, 4  ;;  %v595_v6 = vrot.slane %v593_v20, 5  ;;  %v601_v7 = vrot.slane %v599_v59, 5  ;;  %v789_v9 = vrot.slane %v788_v13, 4 }
  0xef   : > { %v798_v10 = vor.u32 %v797_v60, %v793_v54  ;;  %v605_v12 = vrot.slane %v603_v61, 4  ;;  %v611_v14 = vrot.slane %v609_v63, 5  ;;  %v4219_v18 = vrot.slane %v4197_v57, 9  ;;  %v415_v48 = vld [vmem:[%s4486_s19 + $0x54] sm:$0xf]  ;;  %393 = vst.msk [vmem:[#allocation2 + $0x78] sm:$0xff] %vm377_vm6, %v4408_v39 }
  0xf0   : > { %v1403_v2 = vpop.permute.xlu1 %1402  ;;  %v596_v17 = vor.u32 %v595_v6, %v592_v4  ;;  %v3228_v19 = vrot.slane %v4198_v46, 5  ;;  %v3231_v23 = vrot.slane %v4199_v44, 5  ;;  %v794_v25 = vsel %vm4538_vm5, %v789_v9, %v793_v54  ;;  %v416_v53 = vld [vmem:[%s4486_s19 + $0x58] sm:$0xf]  ;;  %v417_v57 = vld [vmem:[%s4486_s19 + $0x5c] sm:$0x1] }
  0xf1   : > { %1441 = vst.msk [vmem:[#allocation2 + $0x50] sm:$0xff] %vm1430_vm9, %v1403_v2  ;;  %v1387_v16 = vpop.permute.xlu0 %1386  ;;  %3303 = vrot.lane.b32.xlu0 %v4226_v21, %s4441_s27  ;;  %v799_v26 = vrot.slane %v798_v10, 4  ;;  %v606_v22 = vor.u32 %v605_v12, %v601_v7  ;;  %v4211_v27 = vrot.slane %v4173_v1, 9  ;;  %v3172_v32 = vrot.slane %v4174_v8, 5  ;;  %v4409_v46 = vld [vmem:[%s4486_s19 + $0x54] sm:$0xff]  }
  0xf2   : > { %1433 = vst.msk [vmem:[#allocation2 + $0x10] sm:$0xff] %vm1430_vm9, %v1387_v16  ;;  %v597_v29 = vrot.slane %v596_v17, 4  ;;  %v3229_v30 = vsel %vm4488_vm2, %v4219_v18, %v3228_v19  ;;  %v3230_v31 = vrot.slane %v3228_v19, 4  ;;  %v3175_v62 = vrot.slane %v4175_v15, 5  ;;  %v984_v59 = vld [vmem:[%s4486_s19 + $0xa8] sm:$0xe] }
  0xf3   : > { %v804_v33 = vsel %vm4538_vm5, %v799_v26, %v803_v3  ;;  %v607_v34 = vrot.slane %v606_v22, 4  ;;  %v806_v36 = vshrl.u32 %v439_v24, 16  ;;  %v3173_v45 = vsel %vm4488_vm2, %v4211_v27, %v3172_v32  ;;  %v985_v1 = vld [vmem:[%s4486_s19 + $0xac] sm:$0xf]  ;;  %385 = vst.msk [vmem:[#allocation2 + $0x38] sm:$0xff] %vm377_vm6, %v4409_v46 }
  0xf4   : > { %v1405_v28 = vpop.permute.xlu1 %1404  ;;  %v3820_v40 = vcombine.low %v794_v25, %v804_v33  ;;  %v602_v41 = vsel %vm4538_vm5, %v597_v29, %v601_v7  ;;  %v3232_v42 = vsel %vm4488_vm2, %v3230_v31, %v3231_v23  ;;  %v3174_v51 = vrot.slane %v3172_v32, 4  ;;  %v986_v7 = vld [vmem:[%s4486_s19 + $0xb0] sm:$0x1]  ;;  %v960_v15 = vld [vmem:[%s4486_s19 + $0x48] sm:$0xe] }
  0xf5   : > { %1442 = vst.msk [vmem:[#allocation2 + $0x58] sm:$0xff] %vm1430_vm9, %v1405_v28  ;;  %v1389_v38 = vpop.permute.xlu0 %1388  ;;  %v612_v49 = vsel %vm4538_vm5, %v607_v34, %v611_v14  ;;  %v4235_v50 = vcombine.low %v3229_v30, %v3232_v42  ;;  %v808_v52 = vrot.slane %v806_v36, 4  ;;  %v809_v54 = vshll.u32 %v439_v24, 16  ;;  %v961_v16 = vld [vmem:[%s4486_s19 + $0x4c] sm:$0xf] }
  0xf6   : > { %1434 = vst.msk [vmem:[#allocation2 + $0x18] sm:$0xff] %vm1430_vm9, %v1389_v38  ;;  %905 = vrot.lane.b32.xlu1 %v3820_v40, %s4436_s22  ;;  %v3812_v37 = vcombine.low %v602_v41, %v612_v49  ;;  %v815_v55 = vshll.u32 %v440_v35, 16  ;;  %v819_v11 = vshrl.u32 %v440_v35, 16  ;;  %v3176_v56 = vsel %vm4488_vm2, %v3174_v51, %v3175_v62  ;;  %v962_v24 = vld [vmem:[%s4486_s19 + $0x50] sm:$0x1] }
  0xf7   : > { %v825_v58 = vshll.u32 %v441_v47, 16  ;;  %v614_v43 = vshrl.u32 %v415_v48, 16  ;;  %v617_v20 = vshll.u32 %v415_v48, 16  ;;  %v4227_v13 = vcombine.low %v3173_v45, %v3176_v56  ;;  %v987_v25 = vld [vmem:[%s4486_s19 + $0xb4] sm:$0xe] }
  0xf8   : > { %v1948_v21 = vpop.permute.xlu1 %1947  ;;  %889 = vrot.lane.b32.xlu0 %v3812_v37, %s4436_s22  ;;  %v811_v60 = vrot.slane %v809_v54, 5  ;;  %v817_v61 = vrot.slane %v815_v55, 5  ;;  %v821_v63 = vrot.slane %v819_v11, 4  ;;  %v623_v6 = vshll.u32 %v416_v53, 16  ;;  %v988_v29 = vld [vmem:[%s4486_s19 + $0xb8] sm:$0xf] }
  0xf9   : > { %1986 = vst.msk [vmem:[#allocation2 + $0x50] sm:$0xff] %vm1975_vm10, %v1948_v21  ;;  %v1932_v44 = vpop.permute.xlu0 %1931  ;;  %v827_v2 = vrot.slane %v825_v58, 5  ;;  %v616_v3 = vrot.slane %v614_v43, 4  ;;  %v619_v4 = vrot.slane %v617_v20, 5  ;;  %v627_v12 = vshrl.u32 %v416_v53, 16 }
  0xfa   : > { %1978 = vst.msk [vmem:[#allocation2 + $0x10] sm:$0xff] %vm1975_vm10, %v1932_v44  ;;  %3321 = vrot.lane.b32.xlu1 %v4235_v50, %s4441_s27  ;;  %v812_v9 = vor.u32 %v811_v60, %v808_v52  ;;  %v822_v10 = vor.u32 %v821_v63, %v817_v61  ;;  %v633_v14 = vshll.u32 %v417_v57, 16  ;;  %v625_v18 = vrot.slane %v623_v6, 5  ;;  %v989_v30 = vld [vmem:[%s4486_s19 + $0xbc] sm:$0x1] }
  0xfb   : > { %v620_v17 = vor.u32 %v619_v4, %v616_v3  ;;  %v3836_v19 = vrot.slane %v984_v59, 9  ;;  %v1141_v23 = vrot.slane %v985_v1, 5  ;;  %v629_v27 = vrot.slane %v627_v12, 4  ;;  %v963_v62 = vld [vmem:[%s4486_s19 + $0x54] sm:$0xe] }
  0xfc   : > { %v1950_v8 = vpop.permute.xlu1 %1949  ;;  %3305 = vrot.lane.b32.xlu0 %v4227_v13, %s4441_s27  ;;  %v813_v26 = vrot.slane %v812_v9, 4  ;;  %v823_v22 = vrot.slane %v822_v10, 4  ;;  %v635_v28 = vrot.slane %v633_v14, 5  ;;  %v1144_v34 = vrot.slane %v986_v7, 5  ;;  %v964_v35 = vld [vmem:[%s4486_s19 + $0x58] sm:$0xf] }
  0xfd   : > { %1987 = vst.msk [vmem:[#allocation2 + $0x58] sm:$0xff] %vm1975_vm10, %v1950_v8  ;;  %v621_v31 = vrot.slane %v620_v17, 4  ;;  %v1142_v32 = vsel %vm4488_vm2, %v3836_v19, %v1141_v23  ;;  %v1143_v33 = vrot.slane %v1141_v23, 4  ;;  %v630_v41 = vor.u32 %v629_v27, %v625_v18  ;;  %v965_v45 = vld [vmem:[%s4486_s19 + $0x5c] sm:$0x1] }
  0xfe   : > { %v818_v39 = vsel %vm4538_vm5, %v813_v26, %v817_v61  ;;  %v828_v40 = vsel %vm4538_vm5, %v823_v22, %v827_v2  ;;  %v3828_v42 = vrot.slane %v960_v15, 9  ;;  %v1085_v50 = vrot.slane %v961_v16, 5  ;;  %v3944_v51 = vld [vmem:[%s4486_s19 + $0xb4] sm:$0xf]  ;;  %v3945_v54 = vld [vmem:[%s4486_s19 + $0xb8] sm:$0xf] }
  0xff   : > { %v1934_v36 = vpop.permute.xlu0 %1933  ;;  %v3821_v47 = vcombine.low %v818_v39, %v828_v40  ;;  %v626_v48 = vsel %vm4538_vm5, %v621_v31, %v625_v18  ;;  %v1145_v49 = vsel %vm4488_vm2, %v1143_v33, %v1144_v34  ;;  %v631_v52 = vrot.slane %v630_v41, 4  ;;  %v3946_v43 = vld [vmem:[%s4486_s19 + $0xbc] sm:$0x1]  ;;  %v3920_v2 = vld [vmem:[%s4486_s19 + $0x54] sm:$0xf] }
 0x100   : > { %v2269_v38 = vpop.permute.xlu1 %2268  ;;  %1979 = vst.msk [vmem:[#allocation2 + $0x18] sm:$0xff] %vm1975_vm10, %v1934_v36  ;;  %v3852_v53 = vcombine.low %v1142_v32, %v1145_v49  ;;  %v1088_v21 = vrot.slane %v962_v24, 5  ;;  %v3837_v37 = vrot.slane %v987_v25, 9  ;;  %v1086_v55 = vsel %vm4488_vm2, %v3828_v42, %v1085_v50  ;;  %v3921_v3 = vld [vmem:[%s4486_s19 + $0x58] sm:$0xf] }
 0x101   : > { %2307 = vst.msk [vmem:[#allocation2 + $0x50] sm:$0xff] %vm2296_vm11, %v2269_v38  ;;  %907 = vrot.lane.b32.xlu1 %v3821_v47, %s4436_s22  ;;  %v1087_v11 = vrot.slane %v1085_v50, 4  ;;  %v1148_v57 = vrot.slane %v988_v29, 5  ;;  %v1151_v46 = vrot.slane %v989_v30, 5  ;;  %v636_v20 = vsel %vm4538_vm5, %v631_v52, %v635_v28  ;;  %v3922_v24 = vld [vmem:[%s4486_s19 + $0x5c] sm:$0x1] }
 0x102   : > { %v3829_v59 = vrot.slane %v963_v62, 9  ;;  %v1092_v44 = vrot.slane %v964_v35, 5  ;;  %v1095_v13 = vrot.slane %v965_v45, 5  ;;  %v3813_v60 = vcombine.low %v626_v48, %v636_v20  ;;  %v3947_v28 = vld [vmem:[%s4486_s19 + $0xc0] sm:$0xf]  ;;  %v4394_v33 = vld [vmem:[%s4486_s19 + $0xb4] sm:$0xff]  }
 0x103   : > { %v2253_v56 = vpop.permute.xlu0 %2252  ;;  %v1089_v61 = vsel %vm4488_vm2, %v1087_v11, %v1088_v21  ;;  %v1149_v63 = vsel %vm4488_vm2, %v3837_v37, %v1148_v57  ;;  %v1150_v1 = vrot.slane %v1148_v57, 4  ;;  %v1832_v8 = vshrl.u32 %v3944_v51, 16  ;;  %v3948_v39 = vld [vmem:[%s4486_s19 + $0xc4] sm:$0xf]  ;;  %v3949_v52 = vld [vmem:[%s4486_s19 + $0xc8] sm:$0x1] }
 0x104   : > { %v2271_v58 = vpop.permute.xlu1 %2270  ;;  %2299 = vst.msk [vmem:[#allocation2 + $0x10] sm:$0xff] %vm2296_vm11, %v2253_v56  ;;  %v3844_v4 = vcombine.low %v1086_v55, %v1089_v61  ;;  %v1093_v6 = vsel %vm4488_vm2, %v3829_v59, %v1092_v44  ;;  %v1094_v7 = vrot.slane %v1092_v44, 4  ;;  %891 = vrot.lane.b32.xlu0 %v3813_v60, %s4436_s22  ;;  %v1835_v12 = vshll.u32 %v3944_v51, 16  ;;  %v3923_v11 = vld [vmem:[%s4486_s19 + $0x60] sm:$0xf] }
 0x105   : > { %2308 = vst.msk [vmem:[#allocation2 + $0x58] sm:$0xff] %vm2296_vm11, %v2271_v58  ;;  %1229 = vrot.lane.b32.xlu1 %v3852_v53, %s4435_s21  ;;  %v1152_v9 = vsel %vm4488_vm2, %v1150_v1, %v1151_v46  ;;  %v1841_v14 = vshll.u32 %v3945_v54, 16  ;;  %v1845_v15 = vshrl.u32 %v3945_v54, 16  ;;  %v1834_v19 = vrot.slane %v1832_v8, 4  ;;  %v4395_v53 = vld [vmem:[%s4486_s19 + $0x54] sm:$0xff]   ;;  %v4396_v57 = vld [vmem:[%s4486_s19 + $0xc0] sm:$0xff]  }
 0x106   : > { %v3853_v17 = vcombine.low %v1149_v63, %v1152_v9  ;;  %v1096_v18 = vsel %vm4488_vm2, %v1094_v7, %v1095_v13  ;;  %v1851_v23 = vshll.u32 %v3946_v43, 16  ;;  %v1837_v26 = vrot.slane %v1835_v12, 5  ;;  %v3924_v20 = vld [vmem:[%s4486_s19 + $0x64] sm:$0xf]  ;;  %v3925_v1 = vld [vmem:[%s4486_s19 + $0x68] sm:$0x1] }
 0x107   : > { %v2255_v10 = vpop.permute.xlu0 %2254  ;;  %v3845_v25 = vcombine.low %v1093_v6, %v1096_v18  ;;  %v1843_v22 = vrot.slane %v1841_v14, 5  ;;  %v1847_v27 = vrot.slane %v1845_v15, 4  ;;  %v1640_v30 = vshrl.u32 %v3920_v2, 16  ;;  %v4009_v9 = vld [vmem:[%s4486_s19 + $0xb8] sm:$0xf] }
 0x108   : > { %v2450_v16 = vpop.permute.xlu1 %2449  ;;  %2300 = vst.msk [vmem:[#allocation2 + $0x18] sm:$0xff] %vm2296_vm11, %v2255_v10  ;;  %v1853_v29 = vrot.slane %v1851_v23, 5  ;;  %v1643_v31 = vshll.u32 %v3920_v2, 16  ;;  %v1649_v32 = vshll.u32 %v3921_v3, 16  ;;  %1213 = vrot.lane.b32.xlu0 %v3844_v4, %s4435_s21  ;;  %v1838_v34 = vor.u32 %v1837_v26, %v1834_v19  ;;  %v4008_v2 = vld [vmem:[%s4486_s19 + $0xb4] sm:$0xe] }
 0x109   : > { %2488 = vst.msk [vmem:[#allocation2 + $0x50] sm:$0xff] %vm2477_vm12, %v2450_v16  ;;  %1231 = vrot.lane.b32.xlu1 %v3853_v17, %s4435_s21  ;;  %v1848_v62 = vor.u32 %v1847_v27, %v1843_v22  ;;  %v1653_v35 = vshrl.u32 %v3921_v3, 16  ;;  %v1659_v36 = vshll.u32 %v3922_v24, 16  ;;  %v1642_v41 = vrot.slane %v1640_v30, 4  ;;  %v4397_v3 = vld [vmem:[%s4486_s19 + $0x60] sm:$0xff]  }
 0x10a   : > { %v1645_v42 = vrot.slane %v1643_v31, 5  ;;  %v1651_v45 = vrot.slane %v1649_v32, 5  ;;  %v1856_v47 = vshrl.u32 %v3947_v28, 16  ;;  %v1839_v48 = vrot.slane %v1838_v34, 4  ;;  %v4010_v10 = vld [vmem:[%s4486_s19 + $0xbc] sm:$0x1] }
 0x10b   : > { %v2434_v38 = vpop.permute.xlu0 %2433  ;;  %v1849_v49 = vrot.slane %v1848_v62, 4  ;;  %v1655_v50 = vrot.slane %v1653_v35, 4  ;;  %v1661_v51 = vrot.slane %v1659_v36, 5  ;;  %v1859_v54 = vshll.u32 %v3947_v28, 16  ;;  %v3984_v17 = vld [vmem:[%s4486_s19 + $0x54] sm:$0xe] }
 0x10c   : > { %v2452_v40 = vpop.permute.xlu1 %2451  ;;  %2480 = vst.msk [vmem:[#allocation2 + $0x10] sm:$0xff] %vm2477_vm12, %v2434_v38  ;;  %v1646_v21 = vor.u32 %v1645_v42, %v1642_v41  ;;  %v1858_v37 = vrot.slane %v1856_v47, 4  ;;  %v1865_v55 = vshll.u32 %v3948_v39, 16  ;;  %1215 = vrot.lane.b32.xlu0 %v3845_v25, %s4435_s21  ;;  %v1844_v46 = vsel %vm4538_vm5, %v1839_v48, %v1843_v22  ;;  %v3985_v30 = vld [vmem:[%s4486_s19 + $0x58] sm:$0xf] }
 0x10d   : > { %2489 = vst.msk [vmem:[#allocation2 + $0x58] sm:$0xff] %vm2477_vm12, %v2452_v40  ;;  %1410 = vrot.lane.b32.xlu1 %v4394_v33, %s4434_s20  ;;  %v1854_v56 = vsel %vm4538_vm5, %v1849_v49, %v1853_v29  ;;  %v1656_v58 = vor.u32 %v1655_v50, %v1651_v45  ;;  %v1869_v43 = vshrl.u32 %v3948_v39, 16  ;;  %v1861_v61 = vrot.slane %v1859_v54, 5  ;;  %v3986_v62 = vld [vmem:[%s4486_s19 + $0x5c] sm:$0x1] }
 0x10e   : > { %v3964_v13 = vcombine.low %v1844_v46, %v1854_v56  ;;  %v1647_v60 = vrot.slane %v1646_v21, 4  ;;  %v1867_v63 = vrot.slane %v1865_v55, 5  ;;  %v1875_v7 = vshll.u32 %v3949_v52, 16  ;;  %v4011_v40 = vld [vmem:[%s4486_s19 + $0xc0] sm:$0xe] }
 0x10f   : > { %v2436_v59 = vpop.permute.xlu0 %2435  ;;  %v1657_v4 = vrot.slane %v1656_v58, 4  ;;  %v1871_v6 = vrot.slane %v1869_v43, 4  ;;  %v1664_v8 = vshrl.u32 %v3923_v11, 16  ;;  %v1862_v14 = vor.u32 %v1861_v61, %v1858_v37  ;;  %v4012_v41 = vld [vmem:[%s4486_s19 + $0xc4] sm:$0xf] }
 0x110   : > { %v2995_v44 = vpop.permute.xlu1 %2994  ;;  %2481 = vst.msk [vmem:[#allocation2 + $0x18] sm:$0xff] %vm2477_vm12, %v2436_v59  ;;  %v1652_v12 = vsel %vm4538_vm5, %v1647_v60, %v1651_v45  ;;  %v1667_v15 = vshll.u32 %v3923_v11, 16  ;;  %v1673_v16 = vshll.u32 %v3924_v20, 16  ;;  %1394 = vrot.lane.b32.xlu0 %v4395_v53, %s4434_s20  ;;  %v1877_v23 = vrot.slane %v1875_v7, 5  ;;  %v4013_v49 = vld [vmem:[%s4486_s19 + $0xc8] sm:$0x1] }
 0x111   : > { %3033 = vst.msk [vmem:[#allocation2 + $0x50] sm:$0xff] %vm3022_vm13, %v2995_v44  ;;  %1412 = vrot.lane.b32.xlu1 %v4396_v57, %s4434_s20  ;;  %v1662_v18 = vsel %vm4538_vm5, %v1657_v4, %v1661_v51  ;;  %v1872_v19 = vor.u32 %v1871_v6, %v1867_v63  ;;  %v1666_v24 = vrot.slane %v1664_v8, 4  ;;  %v1863_v27 = vrot.slane %v1862_v14, 4  ;;  %v3987_v54 = vld [vmem:[%s4486_s19 + $0x60] sm:$0xe] }
 0x112   : > { %v3956_v22 = vcombine.low %v1652_v12, %v1662_v18  ;;  %v1669_v28 = vrot.slane %v1667_v15, 5  ;;  %v5377_v29 = vrot.slane %v1673_v16, 5  ;;  %v1677_v32 = vshrl.u32 %v3924_v20, 16  ;;  %v3988_v56 = vld [vmem:[%s4486_s19 + $0x64] sm:$0xf] }
 0x113   : > { %v2979_v25 = vpop.permute.xlu0 %2978  ;;  %v1873_v31 = vrot.slane %v1872_v19, 4  ;;  %v1683_v33 = vshll.u32 %v3925_v1, 16  ;;  %v4028_v34 = vrot.slane %v4008_v2, 9  ;;  %v1868_v35 = vsel %vm4538_vm5, %v1863_v27, %v1867_v63  ;;  %v3989_v44 = vld [vmem:[%s4486_s19 + $0x68] sm:$0x1] }
 0x114   : > { %v2997_v26 = vpop.permute.xlu1 %2996  ;;  %3025 = vst.msk [vmem:[#allocation2 + $0x10] sm:$0xff] %vm3022_vm13, %v2979_v25  ;;  %v1670_v36 = vor.u32 %v1669_v28, %v1666_v24  ;;  %v2188_v38 = vrot.slane %v4009_v9, 5  ;;  %v2191_v39 = vrot.slane %v4010_v10, 5  ;;  %1396 = vrot.lane.b32.xlu0 %v4397_v3, %s4434_s20  ;;  %v1679_v45 = vrot.slane %v1677_v32, 4  ;;  %v4137_v3 = vld [vmem:[%s4486_s19 + $0xc4] sm:$0xf] }
 0x115   : > { %3034 = vst.msk [vmem:[#allocation2 + $0x58] sm:$0xff] %vm3022_vm13, %v2997_v26  ;;  %1955 = vrot.lane.b32.xlu1 %v3964_v13, %s4437_s23  ;;  %v1878_v42 = vsel %vm4538_vm5, %v1873_v31, %v1877_v23  ;;  %v1685_v47 = vrot.slane %v1683_v33, 5  ;;  %v4020_v48 = vrot.slane %v3984_v17, 9  ;;  %v2132_v11 = vrot.slane %v3985_v30, 5  ;;  %v4136_v13 = vld [vmem:[%s4486_s19 + $0xc0] sm:$0xf] }
 0x116   : > { %v3965_v52 = vcombine.low %v1868_v35, %v1878_v42  ;;  %v1671_v53 = vrot.slane %v1670_v36, 4  ;;  %v2189_v21 = vsel %vm4488_vm2, %v4028_v34, %v2188_v38  ;;  %v2190_v37 = vrot.slane %v2188_v38, 4  ;;  %v4138_v4 = vld [vmem:[%s4486_s19 + $0xc8] sm:$0x1]  ;;  %v4112_v6 = vld [vmem:[%s4486_s19 + $0x60] sm:$0xf] }
 0x117   : > { %v2981_v50 = vpop.permute.xlu0 %2980  ;;  %v1680_v55 = vor.u32 %v1679_v45, %v5377_v29  ;;  %v2135_v57 = vrot.slane %v3986_v62, 5  ;;  %v4029_v46 = vrot.slane %v4011_v40, 9  ;;  %v2195_v20 = vrot.slane %v4012_v41, 5  ;;  %v4113_v12 = vld [vmem:[%s4486_s19 + $0x64] sm:$0xf] }
 0x118   : > { %v3316_v51 = vpop.permute.xlu1 %3315  ;;  %3026 = vst.msk [vmem:[#allocation2 + $0x18] sm:$0xff] %vm3022_vm13, %v2981_v50  ;;  %v1676_v58 = vsel %vm4538_vm5, %v1671_v53, %v5377_v29  ;;  %v2192_v43 = vsel %vm4488_vm2, %v2190_v37, %v2191_v39  ;;  %v2198_v59 = vrot.slane %v4013_v49, 5  ;;  %1939 = vrot.lane.b32.xlu0 %v3956_v22, %s4437_s23  ;;  %v2133_v63 = vsel %vm4488_vm2, %v4020_v48, %v2132_v11  ;;  %v4114_v29 = vld [vmem:[%s4486_s19 + $0x68] sm:$0x1]  ;;  %v4139_v40 = vld [vmem:[%s4486_s19 + $0xcc] sm:$0xf] }
 0x119   : > { %3354 = vst.msk [vmem:[#allocation2 + $0x50] sm:$0xff] %vm3343_vm14, %v3316_v51  ;;  %1957 = vrot.lane.b32.xlu1 %v3965_v52, %s4437_s23  ;;  %v1681_v60 = vrot.slane %v1680_v55, 4  ;;  %v4044_v61 = vcombine.low %v2189_v21, %v2192_v43  ;;  %v2134_v1 = vrot.slane %v2132_v11, 4  ;;  %v2196_v7 = vsel %vm4488_vm2, %v4029_v46, %v2195_v20  ;;  %v4140_v48 = vld [vmem:[%s4486_s19 + $0xd0] sm:$0xf]  ;;  %v4398_v49 = vld [vmem:[%s4486_s19 + $0xc0] sm:$0xff]  }
 0x11a   : > { %v2197_v8 = vrot.slane %v2195_v20, 4  ;;  %v4021_v9 = vrot.slane %v3987_v54, 9  ;;  %v2139_v10 = vrot.slane %v3988_v56, 5  ;;  %v2142_v16 = vrot.slane %v3989_v44, 5  ;;  %v4141_v43 = vld [vmem:[%s4486_s19 + $0xd4] sm:$0x1] }
 0x11b   : > { %v3300_v2 = vpop.permute.xlu0 %3299  ;;  %v1686_v14 = vsel %vm4538_vm5, %v1681_v60, %v1685_v47  ;;  %v2136_v15 = vsel %vm4488_vm2, %v2134_v1, %v2135_v57  ;;  %v2879_v17 = vshrl.u32 %v4136_v13, 16  ;;  %v2882_v28 = vshll.u32 %v4136_v13, 16  ;;  %v4400_v1 = vld [vmem:[%s4486_s19 + $0xcc] sm:$0xff]  }
 0x11c   : > { %3346 = vst.msk [vmem:[#allocation2 + $0x10] sm:$0xff] %vm3343_vm14, %v3300_v2  ;;  %v3957_v18 = vcombine.low %v1676_v58, %v1686_v14  ;;  %v4036_v19 = vcombine.low %v2133_v63, %v2136_v15  ;;  %v2199_v23 = vsel %vm4488_vm2, %v2197_v8, %v2198_v59  ;;  %v2140_v24 = vsel %vm4488_vm2, %v4021_v9, %v2139_v10  ;;  %v4115_v63 = vld [vmem:[%s4486_s19 + $0x6c] sm:$0xf]  ;;  %v4116_v14 = vld [vmem:[%s4486_s19 + $0x70] sm:$0xf] }
 0x11d   : > { %2276 = vrot.lane.b32.xlu1 %v4044_v61, %s4438_s24  ;;  %v4045_v25 = vcombine.low %v2196_v7, %v2199_v23  ;;  %v2141_v26 = vrot.slane %v2139_v10, 4  ;;  %v2881_v27 = vrot.slane %v2879_v17, 4  ;;  %v2888_v31 = vshll.u32 %v4137_v3, 16  ;;  %v4399_v7 = vld [vmem:[%s4486_s19 + $0x60] sm:$0xff]  }
 0x11e   : > { %1941 = vrot.lane.b32.xlu0 %v3957_v18, %s4437_s23  ;;  %v2892_v32 = vshrl.u32 %v4137_v3, 16  ;;  %v2898_v33 = vshll.u32 %v4138_v4, 16  ;;  %v2687_v34 = vshrl.u32 %v4112_v6, 16  ;;  %v2884_v36 = vrot.slane %v2882_v28, 5  ;;  %v4117_v18 = vld [vmem:[%s4486_s19 + $0x74] sm:$0x1] }
 0x11f   : > { %v902_v22 = vpop.permute.xlu1 %901  ;;  %v2143_v62 = vsel %vm4488_vm2, %v2141_v26, %v2142_v16  ;;  %v2690_v38 = vshll.u32 %v4112_v6, 16  ;;  %v2696_v39 = vshll.u32 %v4113_v12, 16  ;;  %v2890_v42 = vrot.slane %v2888_v31, 5  ;;  %v4200_v23 = vld [vmem:[%s4486_s19 + $0xc0] sm:$0xe] }
 0x120   : > { %v3370_v30 = vld [vmem:[#allocation2 + $0x50] sm:$0xff]  ;;  %938 = vst.msk [vmem:[#allocation2 + $0x60] sm:$0xff] %vm925_vm7, %v902_v22  ;;  %v4037_v41 = vcombine.low %v2140_v24, %v2143_v62  ;;  %v2894_v45 = vrot.slane %v2892_v32, 4  ;;  %v2900_v47 = vrot.slane %v2898_v33, 5  ;;  %v2885_v50 = vor.u32 %v2884_v36, %v2881_v27  ;;  %v4201_v27 = vld [vmem:[%s4486_s19 + $0xc4] sm:$0xf] }
 0x121   : > { %4306 = vmatprep.mubr.msk.bf16.mxu1 %vm3403_vm15, %v3370_v30  ;;  %v886_v35 = vpop.permute.xlu0 %885  ;;  %2278 = vrot.lane.b32.xlu1 %v4045_v25, %s4438_s24  ;;  %v2689_v51 = vrot.slane %v2687_v34, 4  ;;  %v2692_v52 = vrot.slane %v2690_v38, 5  ;;  %v5437_v53 = vrot.slane %v2696_v39, 5  ;;  %v2700_v55 = vshrl.u32 %v4113_v12, 16  ;;  %v4202_v28 = vld [vmem:[%s4486_s19 + $0xc8] sm:$0x1] }
 0x122   : > { %930 = vst.msk [vmem:[#allocation2 + $0x20] sm:$0xff] %vm925_vm7, %v886_v35  ;;  %2260 = vrot.lane.b32.xlu0 %v4036_v19, %s4438_s24  ;;  %v2895_v54 = vor.u32 %v2894_v45, %v2890_v42  ;;  %v2706_v11 = vshll.u32 %v4114_v29, 16  ;;  %v2903_v57 = vshrl.u32 %v4139_v40, 16  ;;  %v2886_v46 = vrot.slane %v2885_v50, 4  ;;  %v4401_v29 = vld [vmem:[%s4486_s19 + $0x6c] sm:$0xff]  }
 0x123   : > { %v3318_v21 = vpop.permute.xlu1 %3317  ;;  %v3362_v37 = vld [vmem:[#allocation2 + $0x10] sm:$0xff]  ;;  %v2693_v56 = vor.u32 %v2692_v52, %v2689_v51  ;;  %v2906_v20 = vshll.u32 %v4139_v40, 16  ;;  %v2912_v59 = vshll.u32 %v4140_v48, 16  ;;  %v2702_v13 = vrot.slane %v2700_v55, 4  ;;  %v4176_v40 = vld [vmem:[%s4486_s19 + $0x60] sm:$0xe] }
 0x124   : > { %3355 = vst.msk [vmem:[#allocation2 + $0x58] sm:$0xff] %vm3343_vm14, %v3318_v21  ;;  %4290 = vmatprep.mubr.msk.bf16.mxu0 %vm3403_vm15, %v3362_v37  ;;  %v2896_v44 = vrot.slane %v2895_v54, 4  ;;  %v2708_v60 = vrot.slane %v2706_v11, 5  ;;  %v2905_v61 = vrot.slane %v2903_v57, 4  ;;  %v2891_v2 = vsel %vm4538_vm5, %v2886_v46, %v2890_v42  ;;  %v4203_v54 = vld [vmem:[%s4486_s19 + $0xcc] sm:$0xe] }
 0x125   : > { %v3302_v58 = vpop.permute.xlu0 %3301  ;;  %2457 = vrot.lane.b32.xlu1 %v4398_v49, %s4439_s25  ;;  %v2694_v3 = vrot.slane %v2693_v56, 4  ;;  %v2908_v4 = vrot.slane %v2906_v20, 5  ;;  %v5449_v6 = vrot.slane %v2912_v59, 5  ;;  %v2703_v9 = vor.u32 %v2702_v13, %v5437_v53  ;;  %v4178_v49 = vld [vmem:[%s4486_s19 + $0x68] sm:$0x1] }
 0x126   : > { %3347 = vst.msk [vmem:[#allocation2 + $0x18] sm:$0xff] %vm3343_vm14, %v3302_v58  ;;  %2262 = vrot.lane.b32.xlu0 %v4037_v41, %s4438_s24  ;;  %v2901_v8 = vsel %vm4538_vm5, %v2896_v44, %v2900_v47  ;;  %v2916_v10 = vshrl.u32 %v4140_v48, 16  ;;  %v2922_v12 = vshll.u32 %v4141_v43, 16  ;;  %v2711_v19 = vshrl.u32 %v4115_v63, 16  ;;  %v4177_v41 = vld [vmem:[%s4486_s19 + $0x64] sm:$0xf] }
 0x127   : > { %v4156_v15 = vcombine.low %v2891_v2, %v2901_v8  ;;  %v2699_v16 = vsel %vm4538_vm5, %v2694_v3, %v5437_v53  ;;  %v2909_v17 = vor.u32 %v2908_v4, %v2905_v61  ;;  %v2704_v24 = vrot.slane %v2703_v9, 4  ;;  %v4204_v58 = vld [vmem:[%s4486_s19 + $0xd0] sm:$0xf]  ;;  %v4205_v13 = vld [vmem:[%s4486_s19 + $0xd4] sm:$0x1] }
 0x128   : > { %v2918_v25 = vrot.slane %v2916_v10, 4  ;;  %v2924_v26 = vrot.slane %v2922_v12, 5  ;;  %v2714_v22 = vshll.u32 %v4115_v63, 16  ;;  %v2713_v31 = vrot.slane %v2711_v19, 4  ;;  %v4180_v8 = vld [vmem:[%s4486_s19 + $0x70] sm:$0xf] }
 0x129   : > { %2459 = vrot.lane.b32.xlu1 %v4400_v1, %s4439_s25  ;;  %v2910_v30 = vrot.slane %v2909_v17, 4  ;;  %v2720_v32 = vshll.u32 %v4116_v14, 16  ;;  %v2724_v33 = vshrl.u32 %v4116_v14, 16  ;;  %v2709_v35 = vsel %vm4538_vm5, %v2704_v24, %v2708_v60 }
 0x12a   : > { %2441 = vrot.lane.b32.xlu0 %v4399_v7, %s4439_s25  ;;  %v2919_v36 = vor.u32 %v2918_v25, %v5449_v6  ;;  %v2716_v38 = vrot.slane %v2714_v22, 5  ;;  %v2730_v39 = vshll.u32 %v4117_v18, 16  ;;  %v4148_v42 = vcombine.low %v2699_v16, %v2709_v35  ;;  %v4179_v7 = vld [vmem:[%s4486_s19 + $0x6c] sm:$0xe] }
 0x12b   : > { %v904_v34 = vpop.permute.xlu1 %903  ;;  %v3371_v62 = vld [vmem:[#allocation2 + $0x58] sm:$0xff]  ;;  %v2915_v45 = vsel %vm4538_vm5, %v2910_v30, %v5449_v6  ;;  %v2722_v47 = vrot.slane %v2720_v32, 5  ;;  %v2726_v48 = vrot.slane %v2724_v33, 4  ;;  %v4220_v37 = vrot.slane %v4200_v23, 9 }
 0x12c   : > { %939 = vst.msk [vmem:[#allocation2 + $0x68] sm:$0xff] %vm925_vm7, %v904_v34  ;;  %4307 = vmatmul.mubr.msk.bf16.gmra.mrb[4].mxu1 %vm3403_vm15, %v3371_v62  ;;  %v2920_v51 = vrot.slane %v2919_v36, 4  ;;  %v2717_v52 = vor.u32 %v2716_v38, %v2713_v31  ;;  %v2732_v53 = vrot.slane %v2730_v39, 5  ;;  %v3235_v11 = vrot.slane %v4201_v27, 5 }
 0x12d   : > { %v3363_v50 = vld [vmem:[#allocation2 + $0x18] sm:$0xff]  ;;  %v888_v21 = vpop.permute.xlu0 %887  ;;  %3002 = vrot.lane.b32.xlu1 %v4156_v15, %s4440_s26  ;;  %v2727_v55 = vor.u32 %v2726_v48, %v2722_v47  ;;  %v3238_v57 = vrot.slane %v4202_v28, 5  ;;  %v4212_v46 = vrot.slane %v4176_v40, 9  ;;  %v3179_v59 = vrot.slane %v4177_v41, 5  ;;  %v4181_v15 = vld [vmem:[%s4486_s19 + $0x74] sm:$0x1] }
 0x12e   : > { %4291 = vmatmul.mubr.msk.bf16.gmra.mrb[4].mxu0 %vm3403_vm15, %v3363_v50  ;;  %931 = vst.msk [vmem:[#allocation2 + $0x28] sm:$0xff] %vm925_vm7, %v888_v21  ;;  %2443 = vrot.lane.b32.xlu0 %v4401_v29, %s4439_s25  ;;  %v2925_v43 = vsel %vm4538_vm5, %v2920_v51, %v2924_v26  ;;  %v2718_v20 = vrot.slane %v2717_v52, 4  ;;  %v3182_v44 = vrot.slane %v4178_v49, 5  ;;  %v3236_v63 = vsel %vm4488_vm2, %v4220_v37, %v3235_v11 }
 0x12f   : > { %v1226_v56 = vpop.permute.xlu1 %1225  ;;  %v4157_v60 = vcombine.low %v2915_v45, %v2925_v43  ;;  %v2728_v61 = vrot.slane %v2727_v55, 4  ;;  %v3237_v1 = vrot.slane %v3235_v11, 4  ;;  %v3181_v3 = vrot.slane %v3179_v59, 4 }
 0x130   : > { %1262 = vst.msk [vmem:[#allocation2 + $0x60] sm:$0xff] %vm1249_vm8, %v1226_v56  ;;  %v2723_v2 = vsel %vm4538_vm5, %v2718_v20, %v2722_v47  ;;  %v4221_v6 = vrot.slane %v4203_v54, 9  ;;  %v3242_v12 = vrot.slane %v4204_v58, 5  ;;  %v3245_v14 = vrot.slane %v4205_v13, 5 }
 0x131   : > { %v1210_v4 = vpop.permute.xlu0 %1209  ;;  %3004 = vrot.lane.b32.xlu1 %v4157_v60, %s4440_s26  ;;  %v2733_v9 = vsel %vm4538_vm5, %v2728_v61, %v2732_v53  ;;  %v3239_v10 = vsel %vm4488_vm2, %v3237_v1, %v3238_v57  ;;  %v3180_v19 = vsel %vm4488_vm2, %v4212_v46, %v3179_v59  ;;  %v3183_v5 = vsel %vm4488_vm2, %v3181_v3, %v3182_v44 }
 0x132   : > { %1254 = vst.msk [vmem:[#allocation2 + $0x20] sm:$0xff] %vm1249_vm8, %v1210_v4  ;;  %2986 = vrot.lane.b32.xlu0 %v4148_v42, %s4440_s26  ;;  %v4149_v17 = vcombine.low %v2723_v2, %v2733_v9  ;;  %v4236_v18 = vcombine.low %v3236_v63, %v3239_v10  ;;  %v3243_v23 = vsel %vm4488_vm2, %v4221_v6, %v3242_v12  ;;  %v3244_v24 = vrot.slane %v3242_v12, 4 }
 0x133   : > { %v1228_v16 = vpop.permute.xlu1 %1227  ;;  %v4213_v25 = vrot.slane %v4179_v7, 9  ;;  %v3186_v26 = vrot.slane %v4180_v8, 5  ;;  %v3189_v22 = vrot.slane %v4181_v15, 5  ;;  %v4228_v31 = vcombine.low %v3180_v19, %v3183_v5 }
 0x134   : > { %1263 = vst.msk [vmem:[#allocation2 + $0x68] sm:$0xff] %vm1249_vm8, %v1228_v16  ;;  %v3246_v28 = vsel %vm4488_vm2, %v3244_v24, %v3245_v14 }
 0x135   : > { %v1212_v27 = vpop.permute.xlu0 %1211  ;;  %3323 = vrot.lane.b32.xlu1 %v4236_v18, %s4441_s27  ;;  %v3188_v29 = vrot.slane %v3186_v26, 4  ;;  %v4237_v32 = vcombine.low %v3243_v23, %v3246_v28  ;;  %v3187_v33 = vsel %vm4488_vm2, %v4213_v25, %v3186_v26 }
 0x136   : > { %1255 = vst.msk [vmem:[#allocation2 + $0x28] sm:$0xff] %vm1249_vm8, %v1212_v27  ;;  %2988 = vrot.lane.b32.xlu0 %v4149_v17, %s4440_s26 }
 0x137   : > { %v1407_v30 = vpop.permute.xlu1 %1406  ;;  %v3190_v34 = vsel %vm4488_vm2, %v3188_v29, %v3189_v22 }
 0x138   : > { %1443 = vst.msk [vmem:[#allocation2 + $0x60] sm:$0xff] %vm1430_vm9, %v1407_v30  ;;  %v4229_v36 = vcombine.low %v3187_v33, %v3190_v34 }
 0x139   : > { %v1391_v62 = vpop.permute.xlu0 %1390  ;;  %3325 = vrot.lane.b32.xlu1 %v4237_v32, %s4441_s27 }
 0x13a   : > { %1435 = vst.msk [vmem:[#allocation2 + $0x20] sm:$0xff] %vm1430_vm9, %v1391_v62  ;;  %3307 = vrot.lane.b32.xlu0 %v4228_v31, %s4441_s27  ;;  %v5589_v62 = vld [vmem:[%s5671_s2] ss:$0 sm:$0xff] }
 0x13b   : > { %v1409_v35 = vpop.permute.xlu1 %1408 }
 0x13c   : > { %1444 = vst.msk [vmem:[#allocation2 + $0x68] sm:$0xff] %vm1430_vm9, %v1409_v35 }
 0x13d   : > { %v1393_v38 = vpop.permute.xlu0 %1392 }
 0x13e   : > { %1436 = vst.msk [vmem:[#allocation2 + $0x28] sm:$0xff] %vm1430_vm9, %v1393_v38  ;;  %3309 = vrot.lane.b32.xlu0 %v4229_v36, %s4441_s27 }
 0x13f   : > { %v1952_v39 = vpop.permute.xlu1 %1951 }
 0x140   : > { %1988 = vst.msk [vmem:[#allocation2 + $0x60] sm:$0xff] %vm1975_vm10, %v1952_v39 }
 0x141   : > { %v1936_v0 = vpop.permute.xlu0 %1935 }
 0x142   : > { %1980 = vst.msk [vmem:[#allocation2 + $0x20] sm:$0xff] %vm1975_vm10, %v1936_v0 }
 0x143   : > { %v1954_v40 = vpop.permute.xlu1 %1953 }
 0x144   : > { %1989 = vst.msk [vmem:[#allocation2 + $0x68] sm:$0xff] %vm1975_vm10, %v1954_v40 }
 0x147   : > { %v2273_v41 = vpop.permute.xlu1 %2272  ;;  %v1938_v42 = vpop.permute.xlu0 %1937 }
 0x148   : > { %2309 = vst.msk [vmem:[#allocation2 + $0x60] sm:$0xff] %vm2296_vm11, %v2273_v41 }
 0x149   : > { %1981 = vst.msk [vmem:[#allocation2 + $0x28] sm:$0xff] %vm1975_vm10, %v1938_v42 }
 0x14b   : > { %v2275_v45 = vpop.permute.xlu1 %2274  ;;  %v2257_v47 = vpop.permute.xlu0 %2256 }
 0x14c   : > { %2310 = vst.msk [vmem:[#allocation2 + $0x68] sm:$0xff] %vm2296_vm11, %v2275_v45  ;;  %2301 = vst.msk [vmem:[#allocation2 + $0x20] sm:$0xff] %vm2296_vm11, %v2257_v47 }
 0x14f   : > { %v2454_v48 = vpop.permute.xlu1 %2453  ;;  %v2259_v49 = vpop.permute.xlu0 %2258 }
 0x150   : > { %2490 = vst.msk [vmem:[#allocation2 + $0x60] sm:$0xff] %vm2477_vm12, %v2454_v48 }
 0x151   : > { %2302 = vst.msk [vmem:[#allocation2 + $0x28] sm:$0xff] %vm2296_vm11, %v2259_v49 }
 0x153   : > { %v2456_v50 = vpop.permute.xlu1 %2455  ;;  %v2438_v51 = vpop.permute.xlu0 %2437 }
 0x154   : > { %2491 = vst.msk [vmem:[#allocation2 + $0x68] sm:$0xff] %vm2477_vm12, %v2456_v50  ;;  %2482 = vst.msk [vmem:[#allocation2 + $0x20] sm:$0xff] %vm2477_vm12, %v2438_v51 }
 0x157   : > { %v2999_v52 = vpop.permute.xlu1 %2998  ;;  %v2440_v53 = vpop.permute.xlu0 %2439 }
 0x158   : > { %3035 = vst.msk [vmem:[#allocation2 + $0x60] sm:$0xff] %vm3022_vm13, %v2999_v52 }
 0x159   : > { %2483 = vst.msk [vmem:[#allocation2 + $0x28] sm:$0xff] %vm2477_vm12, %v2440_v53 }
 0x15b   : > { %v2983_v21 = vpop.permute.xlu0 %2982  ;;  %v3001_v37 = vpop.permute.xlu1 %3000 }
 0x15c   : > { %3027 = vst.msk [vmem:[#allocation2 + $0x20] sm:$0xff] %vm3022_vm13, %v2983_v21  ;;  %3036 = vst.msk [vmem:[#allocation2 + $0x68] sm:$0xff] %vm3022_vm13, %v3001_v37 }
 0x15f   : > { %v2985_v54 = vpop.permute.xlu0 %2984  ;;  %v3320_v55 = vpop.permute.xlu1 %3319 }
 0x160   : > { %3028 = vst.msk [vmem:[#allocation2 + $0x28] sm:$0xff] %vm3022_vm13, %v2985_v54 }
 0x161   : > { %3356 = vst.msk [vmem:[#allocation2 + $0x60] sm:$0xff] %vm3343_vm14, %v3320_v55 }
 0x163   : > { %v3304_v11 = vpop.permute.xlu0 %3303 }
 0x164   : > { %3348 = vst.msk [vmem:[#allocation2 + $0x20] sm:$0xff] %vm3343_vm14, %v3304_v11 }
 0x168   : > { %v3372_v57 = vld [vmem:[#allocation2 + $0x60] sm:$0xff]  ;;  %v906_v46 = vpop.permute.xlu1 %905 }
 0x169   : > { %4310 = vmatprep.mubr.msk.bf16.mxu1 %vm3403_vm15, %v3372_v57  ;;  %940 = vst.msk [vmem:[#allocation2 + $0x70] sm:$0xff] %vm925_vm7, %v906_v46 }
 0x16a   : > { %v890_v56 = vpop.permute.xlu0 %889 }
 0x16b   : > { %v3364_v58 = vld [vmem:[#allocation2 + $0x20] sm:$0xff]  ;;  %932 = vst.msk [vmem:[#allocation2 + $0x30] sm:$0xff] %vm925_vm7, %v890_v56 }
 0x16c   : > { %4294 = vmatprep.mubr.msk.bf16.mxu0 %vm3403_vm15, %v3364_v58  ;;  %v3322_v43 = vpop.permute.xlu1 %3321 }
 0x16d   : > { %3357 = vst.msk [vmem:[#allocation2 + $0x68] sm:$0xff] %vm3343_vm14, %v3322_v43 }
 0x16e   : > { %v3306_v20 = vpop.permute.xlu0 %3305 }
 0x16f   : > { %3349 = vst.msk [vmem:[#allocation2 + $0x28] sm:$0xff] %vm3343_vm14, %v3306_v20 }
 0x173   : > { %v908_v59 = vpop.permute.xlu1 %907 }
 0x174   : > { %941 = vst.msk [vmem:[#allocation2 + $0x78] sm:$0xff] %vm925_vm7, %v908_v59  ;;  %v3373_v44 = vld [vmem:[#allocation2 + $0x68] sm:$0xff] }
 0x175   : > { %4311 = vmatmul.mubr.msk.bf16.gmra.mrb[8].mxu1 %vm3403_vm15, %v3373_v44 }
 0x176   : > { %v3365_v13 = vld [vmem:[#allocation2 + $0x28] sm:$0xff]  ;;  %v892_v60 = vpop.permute.xlu0 %891 }
 0x177   : > { %v1230_v61 = vpop.permute.xlu1 %1229  ;;  %4295 = vmatmul.mubr.msk.bf16.gmra.mrb[8].mxu0 %vm3403_vm15, %v3365_v13  ;;  %933 = vst.msk [vmem:[#allocation2 + $0x38] sm:$0xff] %vm925_vm7, %v892_v60 }
 0x178   : > { %1264 = vst.msk [vmem:[#allocation2 + $0x70] sm:$0xff] %vm1249_vm8, %v1230_v61 }
 0x17a   : > { %v1214_v63 = vpop.permute.xlu0 %1213 }
 0x17b   : > { %v1232_v1 = vpop.permute.xlu1 %1231  ;;  %1256 = vst.msk [vmem:[#allocation2 + $0x30] sm:$0xff] %vm1249_vm8, %v1214_v63 }
 0x17c   : > { %1265 = vst.msk [vmem:[#allocation2 + $0x78] sm:$0xff] %vm1249_vm8, %v1232_v1 }
 0x17e   : > { %v1216_v2 = vpop.permute.xlu0 %1215 }
 0x17f   : > { %v1411_v3 = vpop.permute.xlu1 %1410  ;;  %1257 = vst.msk [vmem:[#allocation2 + $0x38] sm:$0xff] %vm1249_vm8, %v1216_v2 }
 0x180   : > { %1445 = vst.msk [vmem:[#allocation2 + $0x70] sm:$0xff] %vm1430_vm9, %v1411_v3 }
 0x182   : > { %v1395_v4 = vpop.permute.xlu0 %1394 }
 0x183   : > { %v1413_v6 = vpop.permute.xlu1 %1412  ;;  %1437 = vst.msk [vmem:[#allocation2 + $0x30] sm:$0xff] %vm1430_vm9, %v1395_v4 }
 0x184   : > { %1446 = vst.msk [vmem:[#allocation2 + $0x78] sm:$0xff] %vm1430_vm9, %v1413_v6 }
 0x186   : > { %v1397_v7 = vpop.permute.xlu0 %1396 }
 0x187   : > { %v1956_v8 = vpop.permute.xlu1 %1955  ;;  %1438 = vst.msk [vmem:[#allocation2 + $0x38] sm:$0xff] %vm1430_vm9, %v1397_v7 }
 0x188   : > { %1990 = vst.msk [vmem:[#allocation2 + $0x70] sm:$0xff] %vm1975_vm10, %v1956_v8 }
 0x18a   : > { %v1940_v9 = vpop.permute.xlu0 %1939 }
 0x18b   : > { %v1958_v10 = vpop.permute.xlu1 %1957  ;;  %1982 = vst.msk [vmem:[#allocation2 + $0x30] sm:$0xff] %vm1975_vm10, %v1940_v9 }
 0x18c   : > { %1991 = vst.msk [vmem:[#allocation2 + $0x78] sm:$0xff] %vm1975_vm10, %v1958_v10 }
 0x18f   : > { %v2277_v12 = vpop.permute.xlu1 %2276 }
 0x190   : > { %v1942_v14 = vpop.permute.xlu0 %1941  ;;  %2311 = vst.msk [vmem:[#allocation2 + $0x70] sm:$0xff] %vm2296_vm11, %v2277_v12 }
 0x191   : > { %1983 = vst.msk [vmem:[#allocation2 + $0x38] sm:$0xff] %vm1975_vm10, %v1942_v14 }
 0x193   : > { %v2279_v15 = vpop.permute.xlu1 %2278 }
 0x194   : > { %v2261_v16 = vpop.permute.xlu0 %2260  ;;  %2312 = vst.msk [vmem:[#allocation2 + $0x78] sm:$0xff] %vm2296_vm11, %v2279_v15 }
 0x195   : > { %2303 = vst.msk [vmem:[#allocation2 + $0x30] sm:$0xff] %vm2296_vm11, %v2261_v16 }
 0x197   : > { %v2458_v17 = vpop.permute.xlu1 %2457 }
 0x198   : > { %v2263_v18 = vpop.permute.xlu0 %2262  ;;  %2492 = vst.msk [vmem:[#allocation2 + $0x70] sm:$0xff] %vm2477_vm12, %v2458_v17 }
 0x199   : > { %2304 = vst.msk [vmem:[#allocation2 + $0x38] sm:$0xff] %vm2296_vm11, %v2263_v18 }
 0x19b   : > { %v2460_v19 = vpop.permute.xlu1 %2459 }
 0x19c   : > { %v2442_v5 = vpop.permute.xlu0 %2441  ;;  %2493 = vst.msk [vmem:[#allocation2 + $0x78] sm:$0xff] %vm2477_vm12, %v2460_v19 }
 0x19d   : > { %2484 = vst.msk [vmem:[#allocation2 + $0x30] sm:$0xff] %vm2477_vm12, %v2442_v5 }
 0x19f   : > { %v3003_v23 = vpop.permute.xlu1 %3002 }
 0x1a0   : > { %v2444_v24 = vpop.permute.xlu0 %2443  ;;  %3037 = vst.msk [vmem:[#allocation2 + $0x70] sm:$0xff] %vm3022_vm13, %v3003_v23 }
 0x1a1   : > { %2485 = vst.msk [vmem:[#allocation2 + $0x38] sm:$0xff] %vm2477_vm12, %v2444_v24 }
 0x1a3   : > { %v3005_v25 = vpop.permute.xlu1 %3004 }
 0x1a4   : > { %v2987_v26 = vpop.permute.xlu0 %2986  ;;  %3038 = vst.msk [vmem:[#allocation2 + $0x78] sm:$0xff] %vm3022_vm13, %v3005_v25 }
 0x1a5   : > { %3029 = vst.msk [vmem:[#allocation2 + $0x30] sm:$0xff] %vm3022_vm13, %v2987_v26 }
 0x1a7   : > { %v3324_v22 = vpop.permute.xlu1 %3323 }
 0x1a8   : > { %v2989_v27 = vpop.permute.xlu0 %2988  ;;  %3358 = vst.msk [vmem:[#allocation2 + $0x70] sm:$0xff] %vm3343_vm14, %v3324_v22 }
 0x1a9   : > { %3030 = vst.msk [vmem:[#allocation2 + $0x38] sm:$0xff] %vm3022_vm13, %v2989_v27 }
 0x1ab   : > { %v3326_v28 = vpop.permute.xlu1 %3325 }
 0x1ac   : > { %v3308_v29 = vpop.permute.xlu0 %3307  ;;  %3359 = vst.msk [vmem:[#allocation2 + $0x78] sm:$0xff] %vm3343_vm14, %v3326_v28 }
 0x1ad   : > { %3350 = vst.msk [vmem:[#allocation2 + $0x30] sm:$0xff] %vm3343_vm14, %v3308_v29 }
 0x1af   : > { %v3374_v30 = vld [vmem:[#allocation2 + $0x70] sm:$0xff] }
 0x1b0   : > { %v3310_v31 = vpop.permute.xlu0 %3309  ;;  %4314 = vmatprep.mubr.msk.bf16.mxu1 %vm3403_vm15, %v3374_v30 }
 0x1b1   : > { %3351 = vst.msk [vmem:[#allocation2 + $0x38] sm:$0xff] %vm3343_vm14, %v3310_v31 }
 0x1b3   : > { %v3375_v32 = vld [vmem:[#allocation2 + $0x78] sm:$0xff] }
 0x1b4   : > { %v3366_v33 = vld [vmem:[#allocation2 + $0x30] sm:$0xff]  ;;  %4315 = vmatmul.mubr.msk.bf16.gmra.mrb[12].mxu1 %vm3403_vm15, %v3375_v32 }
 0x1b5   : > { %4298 = vmatprep.mubr.msk.bf16.mxu0 %vm3403_vm15, %v3366_v33 }
 0x1b8   : > { %v3367_v34 = vld [vmem:[#allocation2 + $0x38] sm:$0xff] }
 0x1b9   : > { %4299 = vmatmul.mubr.msk.bf16.gmra.mrb[12].mxu0 %vm3403_vm15, %v3367_v34 }
 0x1bd   : > { %v4288_v35 = vpop.f32.mrb[0].mxu0  ;;  %v4304_v36 = vpop.f32.mrb[0].mxu1 }
 0x1be   : > { %v3499_v38 = vadd.f32 %v4288_v35, %v5589_v62  ;;  %v3563_v39 = vadd.f32 %v4304_v36, %v5589_v62  ;;  %v3490_v0 = vpop.f32.mrb[1].mxu0  ;;  %v3554_v40 = vpop.f32.mrb[1].mxu1 }
 0x1bf   : > { %v3491_v41 = vadd.f32 %v5589_v62, %v3490_v0  ;;  %v3555_v42 = vadd.f32 %v5589_v62, %v3554_v40  ;;  %v4289_v45 = vpop.f32.mrb[2].mxu0  ;;  %v4305_v47 = vpop.f32.mrb[2].mxu1 }
 0x1c0   : > { %3619 = vst [vmem:[%s5594_s16 + $0x10] sm:$0xff] %v3499_v38  ;;  %3635 = vst [vmem:[%s5594_s16 + $0x90] sm:$0xff] %v3563_v39  ;;  %v3502_v48 = vadd.f32 %v4289_v45, %v5589_v62  ;;  %v3566_v49 = vadd.f32 %v4305_v47, %v5589_v62  ;;  %v3493_v50 = vpop.f32.mrb[3].mxu0  ;;  %v3557_v51 = vpop.f32.mrb[3].mxu1 }
 0x1c1   : > { %3617 = vst [vmem:[%s5594_s16] sm:$0xff] %v3491_v41  ;;  %3633 = vst [vmem:[%s5594_s16 + $0x80] sm:$0xff] %v3555_v42  ;;  %v3494_v52 = vadd.f32 %v5589_v62, %v3493_v50  ;;  %v3558_v53 = vadd.f32 %v5589_v62, %v3557_v51 }
 0x1c2   : > { %3620 = vst [vmem:[%s5594_s16 + $0x18] sm:$0xff] %v3502_v48  ;;  %3636 = vst [vmem:[%s5594_s16 + $0x98] sm:$0xff] %v3566_v49 }
 0x1c3   : > { %3618 = vst [vmem:[%s5594_s16 + $0x8] sm:$0xff] %v3494_v52  ;;  %3634 = vst [vmem:[%s5594_s16 + $0x88] sm:$0xff] %v3558_v53 }
 0x1ff   : > { %v4308_v21 = vpop.f32.mrb[4].mxu1 }
 0x200   : > { %v3579_v37 = vadd.f32 %v4308_v21, %v5589_v62  ;;  %v3570_v54 = vpop.f32.mrb[5].mxu1 }
 0x201   : > { %v4292_v55 = vpop.f32.mrb[4].mxu0  ;;  %v3571_v11 = vadd.f32 %v5589_v62, %v3570_v54  ;;  %v4309_v57 = vpop.f32.mrb[6].mxu1 }
 0x202   : > { %v3515_v46 = vadd.f32 %v4292_v55, %v5589_v62  ;;  %3639 = vst [vmem:[%s5594_s16 + $0xb0] sm:$0xff] %v3579_v37  ;;  %v3506_v56 = vpop.f32.mrb[5].mxu0  ;;  %v3582_v58 = vadd.f32 %v4309_v57, %v5589_v62  ;;  %v3573_v43 = vpop.f32.mrb[7].mxu1 }
 0x203   : > { %v3507_v20 = vadd.f32 %v5589_v62, %v3506_v56  ;;  %3637 = vst [vmem:[%s5594_s16 + $0xa0] sm:$0xff] %v3571_v11  ;;  %v4293_v59 = vpop.f32.mrb[6].mxu0  ;;  %v3574_v44 = vadd.f32 %v5589_v62, %v3573_v43 }
 0x204   : > { %3623 = vst [vmem:[%s5594_s16 + $0x30] sm:$0xff] %v3515_v46  ;;  %v3518_v13 = vadd.f32 %v4293_v59, %v5589_v62  ;;  %3640 = vst [vmem:[%s5594_s16 + $0xb8] sm:$0xff] %v3582_v58  ;;  %v3509_v60 = vpop.f32.mrb[7].mxu0 }
 0x205   : > { %3621 = vst [vmem:[%s5594_s16 + $0x20] sm:$0xff] %v3507_v20  ;;  %v3510_v61 = vadd.f32 %v5589_v62, %v3509_v60  ;;  %3638 = vst [vmem:[%s5594_s16 + $0xa8] sm:$0xff] %v3574_v44 }
 0x206   : > { %3624 = vst [vmem:[%s5594_s16 + $0x38] sm:$0xff] %v3518_v13 }
 0x207   : > { %3622 = vst [vmem:[%s5594_s16 + $0x28] sm:$0xff] %v3510_v61 }
 0x248   : > { %v4312_v63 = vpop.f32.mrb[8].mxu1 }
 0x249   : > { %v3595_v1 = vadd.f32 %v4312_v63, %v5589_v62  ;;  %v3586_v2 = vpop.f32.mrb[9].mxu1 }
 0x24a   : > { %v4296_v3 = vpop.f32.mrb[8].mxu0  ;;  %v3587_v4 = vadd.f32 %v5589_v62, %v3586_v2  ;;  %v4313_v6 = vpop.f32.mrb[10].mxu1 }
 0x24b   : > { %v3531_v7 = vadd.f32 %v4296_v3, %v5589_v62  ;;  %3643 = vst [vmem:[%s5594_s16 + $0xd0] sm:$0xff] %v3595_v1  ;;  %v3522_v8 = vpop.f32.mrb[9].mxu0  ;;  %v3598_v9 = vadd.f32 %v4313_v6, %v5589_v62  ;;  %v3589_v10 = vpop.f32.mrb[11].mxu1 }
 0x24c   : > { %v3523_v12 = vadd.f32 %v5589_v62, %v3522_v8  ;;  %3641 = vst [vmem:[%s5594_s16 + $0xc0] sm:$0xff] %v3587_v4  ;;  %v4297_v14 = vpop.f32.mrb[10].mxu0  ;;  %v3590_v15 = vadd.f32 %v5589_v62, %v3589_v10 }
 0x24d   : > { %3627 = vst [vmem:[%s5594_s16 + $0x50] sm:$0xff] %v3531_v7  ;;  %v3534_v16 = vadd.f32 %v4297_v14, %v5589_v62  ;;  %3644 = vst [vmem:[%s5594_s16 + $0xd8] sm:$0xff] %v3598_v9  ;;  %v3525_v17 = vpop.f32.mrb[11].mxu0 }
 0x24e   : > { %3625 = vst [vmem:[%s5594_s16 + $0x40] sm:$0xff] %v3523_v12  ;;  %v3526_v18 = vadd.f32 %v5589_v62, %v3525_v17  ;;  %3642 = vst [vmem:[%s5594_s16 + $0xc8] sm:$0xff] %v3590_v15 }
 0x24f   : > { %3628 = vst [vmem:[%s5594_s16 + $0x58] sm:$0xff] %v3534_v16 }
 0x250   : > { %3626 = vst [vmem:[%s5594_s16 + $0x48] sm:$0xff] %v3526_v18 }
 0x287   : > { %v4316_v19 = vpop.f32.mrb[12].mxu1 }
 0x288   : > { %v3611_v5 = vadd.f32 %v4316_v19, %v5589_v62  ;;  %v3602_v23 = vpop.f32.mrb[13].mxu1 }
 0x289   : > { %v3603_v24 = vadd.f32 %v5589_v62, %v3602_v23  ;;  %v4317_v25 = vpop.f32.mrb[14].mxu1 }
 0x28a   : > { %3647 = vst [vmem:[%s5594_s16 + $0xf0] sm:$0xff] %v3611_v5  ;;  %v3614_v26 = vadd.f32 %v4317_v25, %v5589_v62  ;;  %v3605_v22 = vpop.f32.mrb[15].mxu1 }
 0x28b   : > { %3645 = vst [vmem:[%s5594_s16 + $0xe0] sm:$0xff] %v3603_v24  ;;  %v3606_v27 = vadd.f32 %v5589_v62, %v3605_v22 }
 0x28c   : > { %v4300_v28 = vpop.f32.mrb[12].mxu0  ;;  %3648 = vst [vmem:[%s5594_s16 + $0xf8] sm:$0xff] %v3614_v26 }
 0x28d   : > { %v3547_v29 = vadd.f32 %v4300_v28, %v5589_v62  ;;  %v3538_v30 = vpop.f32.mrb[13].mxu0  ;;  %3646 = vst [vmem:[%s5594_s16 + $0xe8] sm:$0xff] %v3606_v27 }
 0x28e   : > { %v3539_v31 = vadd.f32 %v5589_v62, %v3538_v30  ;;  %v4301_v32 = vpop.f32.mrb[14].mxu0 }
 0x28f   : > { %3631 = vst [vmem:[%s5594_s16 + $0x70] sm:$0xff] %v3547_v29  ;;  %v3550_v33 = vadd.f32 %v4301_v32, %v5589_v62  ;;  %v3541_v34 = vpop.f32.mrb[15].mxu0 }
 0x290   : > { %3629 = vst [vmem:[%s5594_s16 + $0x60] sm:$0xff] %v3539_v31  ;;  %v3542_v35 = vadd.f32 %v5589_v62, %v3541_v34 }
 0x291   : > { %3632 = vst [vmem:[%s5594_s16 + $0x78] sm:$0xff] %v3550_v33 }
 0x292   : > { %3630 = vst [vmem:[%s5594_s16 + $0x68] sm:$0xff] %v3542_v35 }
 0x293 PF: > { %s13_s14 = sadd.s32 1, %s4432_s14   ;;  %s5677_s12 = smov %s4428_s13 }
 0x294   : > { %p10_p5 = scmp.ge.s32.totalorder %s13_s14, 4   ;;  %s5678_s13 = smov %s5680_s15 }
 0x296   :  { %12 = sbr.rel (!%p10_p5) target bundleno = 2 (0x2), region = 75 }

</bundles_post_ra>
